<compile_context>
chip_gen: v5e
topology: v5e:2x2
jax: 0.10.0
libtpu: 0.0.40
codegen_flags: <defaults>
</compile_context>

<pallas_src>
import functools

import jax
import jax.numpy as jnp
from jax import lax
from jax.experimental import pallas as pl
from jax.experimental.pallas import tpu as pltpu


# ---------------------------------------------------------------------------
# small helpers
# ---------------------------------------------------------------------------
def _swap01(x):
    """(a, b, lane) -> (b, a, lane); the lane (last) dim is untouched."""
    try:
        # Mosaic-native combined reshape+transpose (XLU path, ~free here).
        return pltpu.einshape("abl->bal", x)
    except Exception:            # older toolchains: generic transpose
        return jnp.swapaxes(x, 0, 1)


def _divisors(n):
    return [d for d in range(1, n + 1) if n % d == 0]


def _largest_time_chunk(T, cap):
    """Largest divisor of T that is a multiple of 8 (or T itself) and <= cap."""
    cands = [d for d in _divisors(T) if (d % 8 == 0 or d == T) and d <= cap]
    return max(cands) if cands else T


def _pick_bt(B, A):
    """Batch rows per grid step: largest multiple-of-8 divisor of B, capped so
    the WKV recurrence's live values (~14 temps * (bt/8)*(A/128) vregs) stay in
    registers."""
    cap = (48 * 8 * 128) // (14 * max(A, 128))
    cap = max(8, cap - cap % 8)
    mult8 = [d for d in _divisors(B) if d % 8 == 0 and d <= cap]
    if mult8:
        return max(mult8)
    return max(d for d in _divisors(B) if d <= 8)


def _tpu_vmem_bytes():
    try:
        return int(pltpu.get_tpu_info().vmem_capacity_bytes)
    except Exception:
        return 64 * 1024 * 1024          # conservative (v7x-sized) default


def _chunk_cap(budget_bytes, fixed_bytes, per_row_bytes):
    avail = budget_bytes - fixed_bytes
    return max(8, int(avail // per_row_bytes)) if avail > 0 else 8


# ---------------------------------------------------------------------------
# Kernel 1: fused time-shift + time-mix + K/V/R projections + sigmoid(R)
#   grid = (B//bt, T//mix_tt); the previous chunk's last row is carried in
#   prev_ref so the shift is exact across T chunks.
# ---------------------------------------------------------------------------
def mix_proj_kernel(x_ref, mk_ref, mv_ref, mr_ref,
                    wk_ref, wv_ref, wr_ref,
                    sr_ref, k_ref, v_ref, prev_ref):
    bt, tt, C = x_ref.shape
    A = k_ref.shape[2]

    @pl.when(pl.program_id(1) == 0)
    def _():
        prev_ref[...] = jnp.zeros_like(prev_ref)     # ZeroPad2d row 0 -> zeros

    x3 = x_ref[...]                                   # (bt, tt, C) f32
    # time_shift: xx[:, t] = x[:, t-1]; row 0 of this chunk is the carried row.
    xx3 = jnp.concatenate([prev_ref[...], x3[:, :tt - 1, :]], axis=1)
    prev_ref[...] = x3[:, tt - 1:tt, :]               # carry for the next chunk

    mk = mk_ref[...].reshape(1, 1, C)
    mv = mv_ref[...].reshape(1, 1, C)
    mr = mr_ref[...].reshape(1, 1, C)

    # x*m + xx*(1-m) == xx + m*(x - xx): share the (x-xx) term across mixes.
    d = x3 - xx3
    xk = (xx3 + mk * d).reshape(bt * tt, C).astype(jnp.bfloat16)
    xv = (xx3 + mv * d).reshape(bt * tt, C).astype(jnp.bfloat16)
    xr = (xx3 + mr * d).reshape(bt * tt, C).astype(jnp.bfloat16)

    k = jnp.dot(xk, wk_ref[...], preferred_element_type=jnp.float32)
    v = jnp.dot(xv, wv_ref[...], preferred_element_type=jnp.float32)
    r = jnp.dot(xr, wr_ref[...], preferred_element_type=jnp.float32)

    # bf16 outputs: matches the bf16 WKV path and halves inter-kernel traffic.
    k_ref[...] = k.reshape(bt, tt, A).astype(jnp.bfloat16)
    v_ref[...] = v.reshape(bt, tt, A).astype(jnp.bfloat16)
    sr_ref[...] = jax.nn.sigmoid(r).reshape(bt, tt, A).astype(jnp.bfloat16)


# ---------------------------------------------------------------------------
# Kernel 2: WKV recurrence fused with rwkv = sr*y and the output projection.
#   grid = (B//bt, T//tt); state (aa, bb, pp) carried in VMEM across T chunks.
# ---------------------------------------------------------------------------
def wkv_out_kernel(w_ref, u_ref, k_ref, v_ref, sr_ref, wo_ref, o_ref,
                   aa_ref, bb_ref, pp_ref, kf_ref, vf_ref, yf_ref,
                   *, time_major, unroll):
    bt, tt, A = k_ref.shape
    C = o_ref.shape[2]

    @pl.when(pl.program_id(1) == 0)
    def _():
        aa_ref[...] = jnp.zeros_like(aa_ref)
        bb_ref[...] = jnp.zeros_like(bb_ref)
        pp_ref[...] = jnp.full_like(pp_ref, -1e38)

    # Stage the bf16 chunk once as f32.  Time-major layout (tt, bt, A) makes
    # every recurrence step a dense (bt, A) vld/vst (no sublane-strided masks
    # in the hot serial loop); the transpose rides the otherwise-idle XLU.
    if time_major:
        kf_ref[...] = _swap01(k_ref[...].astype(jnp.float32))
        vf_ref[...] = _swap01(v_ref[...].astype(jnp.float32))
    else:
        kf_ref[...] = k_ref[...].astype(jnp.float32)
        vf_ref[...] = v_ref[...].astype(jnp.float32)

    w = w_ref[...]               # (1, A) f32, w = -exp(time_decay)
    u = u_ref[...]               # (1, A) f32

    def body(t, carry):
        aa, bb, pp = carry
        if time_major:
            kk = kf_ref[t]                                    # (bt, A) dense
            vv = vf_ref[t]
        else:
            kk = kf_ref[:, pl.ds(t, 1), :].reshape(bt, A)
            vv = vf_ref[:, pl.ds(t, 1), :].reshape(bt, A)
        ww = u + kk
        p = jnp.maximum(pp, ww)
        e1 = jnp.exp(pp - p)
        e2 = jnp.exp(ww - p)
        # approx reciprocal (EUP): ~2^-12 rel err, below the bf16 ulp of y.
        y = (e1 * aa + e2 * vv) * pl.reciprocal(e1 * bb + e2, approx=True)
        if time_major:
            yf_ref[pl.ds(t, 1), :, :] = y.reshape(1, bt, A)
        else:
            yf_ref[:, pl.ds(t, 1), :] = y.reshape(bt, 1, A)
        ww2 = pp + w
        p2 = jnp.maximum(ww2, kk)
        e1b = jnp.exp(ww2 - p2)
        e2b = jnp.exp(kk - p2)
        return e1b * aa + e2b * vv, e1b * bb + e2b, p2

    aa, bb, pp = lax.fori_loop(0, tt, body,
                               (aa_ref[...], bb_ref[...], pp_ref[...]),
                               unroll=unroll)
    aa_ref[...] = aa
    bb_ref[...] = bb
    pp_ref[...] = pp

    # Fused epilogue: rwkv = sigmoid(r) * y (y rounded to bf16 like the torch
    # bf16 WKV output), then the output projection on the idle MXU.
    y_bt = _swap01(yf_ref[...]) if time_major else yf_ref[...]    # (bt, tt, A)
    y_bt = y_bt.astype(jnp.bfloat16).astype(jnp.float32)
    rwkv = (sr_ref[...].astype(jnp.float32) * y_bt).reshape(bt * tt, A)
    o = jnp.dot(rwkv.astype(jnp.bfloat16), wo_ref[...],
                preferred_element_type=jnp.float32)
    o_ref[...] = o.reshape(bt, tt, C)


# ---------------------------------------------------------------------------
# Wrapper
# ---------------------------------------------------------------------------
def rwkv_time_mix_forward(x, params, *, bt=None, tt=None, mix_tt=None, unroll=4):
    B, T, C = x.shape
    A = params["wk"].shape[1]          # dim_att
    assert C % 128 == 0 and A % 128 == 0, "n_embd / dim_att must be 128-aligned"

    x = x.astype(jnp.float32)

    vmem_cap = _tpu_vmem_bytes()
    # ~48 MiB usable on v7x (64 MiB parts), ~96-100 MiB on v5e/v6e (128 MiB).
    vmem_limit = int(min(100 * 2**20, (vmem_cap * 3) // 4))
    budget = int(vmem_limit * 0.8)

    if bt is None:
        bt = _pick_bt(B, A)
    assert B % bt == 0

    if mix_tt is None:
        cap = _chunk_cap(budget, 12 * C * A, bt * (8 * C + 12 * A))
        mix_tt = _largest_time_chunk(T, cap)
    assert T % mix_tt == 0 and (mix_tt % 8 == 0 or mix_tt == T)

    if tt is None:
        gen_cap = 128 if vmem_cap < 100 * 2**20 else 256   # smaller chunks on v7x
        cap = min(gen_cap, _chunk_cap(budget, 4 * A * C, bt * (24 * A + 8 * C)))
        tt = _largest_time_chunk(T, cap)
    assert T % tt == 0 and (tt % 8 == 0 or tt == T)
    unroll = max(1, min(unroll, tt))

    cp_mix = pltpu.CompilerParams(dimension_semantics=("parallel", "arbitrary"),
                                  vmem_limit_bytes=vmem_limit)
    cp_wkv = pltpu.CompilerParams(dimension_semantics=("parallel", "arbitrary"),
                                  vmem_limit_bytes=vmem_limit)

    # bf16 weights -> native MXU throughput (f32 accumulation inside kernels).
    wk = params["wk"].astype(jnp.bfloat16)
    wv = params["wv"].astype(jnp.bfloat16)
    wr = params["wr"].astype(jnp.bfloat16)
    wo = params["wo"].astype(jnp.bfloat16)
    mk = params["mix_k"].reshape(1, C).astype(jnp.float32)
    mv = params["mix_v"].reshape(1, C).astype(jnp.float32)
    mr = params["mix_r"].reshape(1, C).astype(jnp.float32)

    # ---- kernel 1: fused shift + mix + projections (T-tiled, carried row) ----
    sr, k, v = pl.pallas_call(
        mix_proj_kernel,
        grid=(B // bt, T // mix_tt),
        in_specs=[
            pl.BlockSpec((bt, mix_tt, C), lambda i, j: (i, j, 0)),
            pl.BlockSpec((1, C), lambda i, j: (0, 0)),
            pl.BlockSpec((1, C), lambda i, j: (0, 0)),
            pl.BlockSpec((1, C), lambda i, j: (0, 0)),
            pl.BlockSpec((C, A), lambda i, j: (0, 0)),
            pl.BlockSpec((C, A), lambda i, j: (0, 0)),
            pl.BlockSpec((C, A), lambda i, j: (0, 0)),
        ],
        out_specs=[
            pl.BlockSpec((bt, mix_tt, A), lambda i, j: (i, j, 0)),
            pl.BlockSpec((bt, mix_tt, A), lambda i, j: (i, j, 0)),
            pl.BlockSpec((bt, mix_tt, A), lambda i, j: (i, j, 0)),
        ],
        out_shape=[
            jax.ShapeDtypeStruct((B, T, A), jnp.bfloat16),   # sr
            jax.ShapeDtypeStruct((B, T, A), jnp.bfloat16),   # k
            jax.ShapeDtypeStruct((B, T, A), jnp.bfloat16),   # v
        ],
        scratch_shapes=[pltpu.VMEM((bt, 1, C), jnp.float32)],   # carried shift row
        compiler_params=cp_mix,
    )(x, mk, mv, mr, wk, wv, wr)

    # bf16-mode WKV constants (w = -exp(time_decay) in f32, u rounded to bf16).
    w_dec = (-jnp.exp(params["time_decay"].astype(jnp.float32))).reshape(1, A)
    u_first = (params["time_first"].astype(jnp.bfloat16)
               .astype(jnp.float32).reshape(1, A))

    # ---- kernel 2: WKV recurrence + fused output projection ----
    def call_wkv(time_major):
        kern = functools.partial(wkv_out_kernel, time_major=time_major,
                                 unroll=unroll)
        stage = (tt, bt, A) if time_major else (bt, tt, A)
        return pl.pallas_call(
            kern,
            grid=(B // bt, T // tt),
            in_specs=[
                pl.BlockSpec((1, A), lambda i, j: (0, 0)),
                pl.BlockSpec((1, A), lambda i, j: (0, 0)),
                pl.BlockSpec((bt, tt, A), lambda i, j: (i, j, 0)),
                pl.BlockSpec((bt, tt, A), lambda i, j: (i, j, 0)),
                pl.BlockSpec((bt, tt, A), lambda i, j: (i, j, 0)),
                pl.BlockSpec((A, C), lambda i, j: (0, 0)),
            ],
            out_specs=pl.BlockSpec((bt, tt, C), lambda i, j: (i, j, 0)),
            out_shape=jax.ShapeDtypeStruct((B, T, C), jnp.float32),
            scratch_shapes=[
                pltpu.VMEM((bt, A), jnp.float32),     # aa
                pltpu.VMEM((bt, A), jnp.float32),     # bb
                pltpu.VMEM((bt, A), jnp.float32),     # pp
                pltpu.VMEM(stage, jnp.float32),       # k chunk (f32 staging)
                pltpu.VMEM(stage, jnp.float32),       # v chunk (f32 staging)
                pltpu.VMEM(stage, jnp.float32),       # y chunk
            ],
            compiler_params=cp_wkv,
        )(w_dec, u_first, k, v, sr, wo)

    try:
        return call_wkv(True)      # time-major staging: dense per-step access
    except Exception:
        # Portability fallback (eager calls): batch-major staging with strided
        # per-step access, no in-kernel transpose.  Same math, lower perf.
        return call_wkv(False)


# ---------------------------------------------------------------------------
# Pure-JAX reference (PyTorch-module semantics, bf16 float mode) for checking
# ---------------------------------------------------------------------------
def wkv_ref(w, u, k, v):
    B, T, A = k.shape

    def step(carry, kv):
        aa, bb, pp = carry
        kk, vv = kv
        ww = u + kk
        p = jnp.maximum(pp, ww)
        e1 = jnp.exp(pp - p)
        e2 = jnp.exp(ww - p)
        y = (e1 * aa + e2 * vv) / (e1 * bb + e2)
        ww2 = pp + w
        p2 = jnp.maximum(ww2, kk)
        e1b = jnp.exp(ww2 - p2)
        e2b = jnp.exp(kk - p2)
        return (e1b * aa + e2b * vv, e1b * bb + e2b, p2), y

    init = (jnp.zeros((B, A)), jnp.zeros((B, A)), jnp.full((B, A), -1e38))
    _, ys = jax.lax.scan(step, init,
                         (jnp.moveaxis(k, 1, 0), jnp.moveaxis(v, 1, 0)))
    return jnp.moveaxis(ys, 0, 1)


def forward_ref(x, params):
    """Mirrors the module's RWKV_FLOAT_MODE='bf16' path: bf16 MXU operands with
    f32 accumulation, bf16 u/k/v/y inside the WKV op, f32 elsewhere."""
    B, T, C = x.shape
    f32, bf16 = jnp.float32, jnp.bfloat16

    def mm(a, w):
        return jnp.dot(a.astype(bf16), w.astype(bf16), preferred_element_type=f32)

    xx = jnp.concatenate([jnp.zeros((B, 1, C), x.dtype), x[:, :-1, :]], axis=1)
    mk = params["mix_k"].reshape(1, 1, C)
    mv = params["mix_v"].reshape(1, 1, C)
    mr = params["mix_r"].reshape(1, 1, C)
    xk = x * mk + xx * (1.0 - mk)
    xv = x * mv + xx * (1.0 - mv)
    xr = x * mr + xx * (1.0 - mr)
    k = mm(xk, params["wk"])
    v = mm(xv, params["wv"])
    sr = jax.nn.sigmoid(mm(xr, params["wr"]))
    w = -jnp.exp(params["time_decay"].astype(f32))
    u = params["time_first"].astype(bf16).astype(f32)
    k = k.astype(bf16).astype(f32)
    v = v.astype(bf16).astype(f32)
    y = wkv_ref(w, u, k, v).astype(bf16).astype(f32)
    rwkv = sr * y
    return mm(rwkv, params["wo"])


# ---------------------------------------------------------------------------
if __name__ == "__main__":
    B, T = 8, 64
    n_embd = dim_att = 128     # lane-aligned; module asserts T <= 1024 and
                               # B * C % min(C, 32) == 0 both hold

    key = jax.random.PRNGKey(0)
    ks = jax.random.split(key, 10)

    def xavier(k_, fan_in, fan_out):
        bound = (6.0 / (fan_in + fan_out)) ** 0.5
        # torch Linear weight is (out, in); we store the transpose (in, out)
        return jax.random.uniform(k_, (fan_in, fan_out), jnp.float32, -bound, bound)

    params = {
        "time_decay": 0.02 * jax.random.normal(ks[0], (dim_att,), jnp.float32),
        "time_first": 0.02 * jax.random.normal(ks[1], (dim_att,), jnp.float32),
        "mix_k": 0.02 * jax.random.normal(ks[2], (1, 1, n_embd), jnp.float32),
        "mix_v": 0.02 * jax.random.normal(ks[3], (1, 1, n_embd), jnp.float32),
        "mix_r": 0.02 * jax.random.normal(ks[4], (1, 1, n_embd), jnp.float32),
        "wk": xavier(ks[5], n_embd, dim_att),
        "wv": xavier(ks[6], n_embd, dim_att),
        "wr": xavier(ks[7], n_embd, dim_att),
        "wo": xavier(ks[8], dim_att, n_embd),
    }

    x = jax.random.normal(ks[9], (B, T, n_embd), jnp.float32)

    # Auto-tiled call (single T chunk at this size) ...
    out_auto = jax.block_until_ready(rwkv_time_mix_forward(x, params))
    # ... and an explicitly chunked call that exercises the carried time-shift
    # row and the carried WKV state across multiple T chunks.
    out_chunk = jax.block_until_ready(
        rwkv_time_mix_forward(x, params, bt=8, tt=16, mix_tt=16))

    ref = jax.block_until_ready(forward_ref(x, params))

    assert out_auto.shape == (B, T, n_embd)
    for name, got in (("auto", out_auto), ("chunked", out_chunk)):
        max_err = float(jnp.max(jnp.abs(got - ref)))
        assert jnp.allclose(got, ref, atol=5e-2, rtol=5e-2), (
            f"{name}: mismatch vs reference, max abs err = {max_err}")

    print("KERNEL_OK")
</pallas_src>

<mosaic_0001>
module attributes {stable_mosaic.version = 11 : i64} {
  func.func @mix_proj_kernel(%arg0: i32, %arg1: i32, %arg2: memref<8x64x128xf32, #tpu.memory_space<vmem>>, %arg3: memref<1x128xf32, #tpu.memory_space<vmem>>, %arg4: memref<1x128xf32, #tpu.memory_space<vmem>>, %arg5: memref<1x128xf32, #tpu.memory_space<vmem>>, %arg6: memref<128x128xbf16, #tpu.memory_space<vmem>>, %arg7: memref<128x128xbf16, #tpu.memory_space<vmem>>, %arg8: memref<128x128xbf16, #tpu.memory_space<vmem>>, %arg9: memref<8x64x128xbf16, #tpu.memory_space<vmem>>, %arg10: memref<8x64x128xbf16, #tpu.memory_space<vmem>>, %arg11: memref<8x64x128xbf16, #tpu.memory_space<vmem>>, %arg12: memref<8x1x128xf32, #tpu.memory_space<vmem>>) attributes {dimension_semantics = [#tpu.dimension_semantics<parallel>, #tpu.dimension_semantics<arbitrary>], iteration_bounds = array<i64: 1, 1>, scalar_prefetch = 0 : i64, scratch_operands = 1 : i64, tpu.core_type = #tpu.core_type<tc>, window_params = [{transform_indices = @transform_0, window_bounds = array<i64: 8, 64, 128>}, {pipeline_mode = #tpu.pipeline_mode<synchronous>, transform_indices = @transform_1, window_bounds = array<i64: 1, 128>}, {pipeline_mode = #tpu.pipeline_mode<synchronous>, transform_indices = @transform_2, window_bounds = array<i64: 1, 128>}, {pipeline_mode = #tpu.pipeline_mode<synchronous>, transform_indices = @transform_3, window_bounds = array<i64: 1, 128>}, {pipeline_mode = #tpu.pipeline_mode<synchronous>, transform_indices = @transform_4, window_bounds = array<i64: 128, 128>}, {pipeline_mode = #tpu.pipeline_mode<synchronous>, transform_indices = @transform_5, window_bounds = array<i64: 128, 128>}, {pipeline_mode = #tpu.pipeline_mode<synchronous>, transform_indices = @transform_6, window_bounds = array<i64: 128, 128>}, {transform_indices = @transform_7, window_bounds = array<i64: 8, 64, 128>}, {transform_indices = @transform_8, window_bounds = array<i64: 8, 64, 128>}, {transform_indices = @transform_9, window_bounds = array<i64: 8, 64, 128>}]} {
    %c0_i32 = arith.constant 0 : i32
    %0 = arith.cmpi eq, %arg1, %c0_i32 : i32
    %1 = arith.extui %0 : i1 to i32
    %c0_i32_0 = arith.constant 0 : i32
    %2 = arith.cmpi ne, %1, %c0_i32_0 : i32
    scf.if %2 {
      %cst_33 = arith.constant 0.000000e+00 : f32
      %51 = vector.broadcast %cst_33 : f32 to vector<8x1x128xf32>
      %c0_34 = arith.constant 0 : index
      %c0_35 = arith.constant 0 : index
      %c0_36 = arith.constant 0 : index
      %52 = vector.load %arg12[%c0_34, %c0_35, %c0_36] : memref<8x1x128xf32, #tpu.memory_space<vmem>>, vector<8x1x128xf32>
      tpu.vector_store %arg12[%c0_34, %c0_35, %c0_36], %51 {strides = array<i32>} : memref<8x1x128xf32, #tpu.memory_space<vmem>>, vector<8x1x128xf32>,
    } else {
    }
    %c0 = arith.constant 0 : index
    %c0_1 = arith.constant 0 : index
    %c0_2 = arith.constant 0 : index
    %3 = vector.load %arg2[%c0, %c0_1, %c0_2] : memref<8x64x128xf32, #tpu.memory_space<vmem>>, vector<8x64x128xf32>
    %c0_3 = arith.constant 0 : index
    %c0_4 = arith.constant 0 : index
    %c0_5 = arith.constant 0 : index
    %4 = vector.load %arg12[%c0_3, %c0_4, %c0_5] : memref<8x1x128xf32, #tpu.memory_space<vmem>>, vector<8x1x128xf32>
    %5 = vector.extract_strided_slice %3 {offsets = [0, 0, 0], sizes = [8, 63, 128], strides = [1, 1, 1]} : vector<8x64x128xf32> to vector<8x63x128xf32>
    %6 = tpu.concatenate %4, %5 in 1 : vector<8x1x128xf32>, vector<8x63x128xf32> -> vector<8x64x128xf32>
    %7 = vector.extract_strided_slice %3 {offsets = [0, 63, 0], sizes = [8, 1, 128], strides = [1, 1, 1]} : vector<8x64x128xf32> to vector<8x1x128xf32>
    %c0_6 = arith.constant 0 : index
    %c0_7 = arith.constant 0 : index
    %c0_8 = arith.constant 0 : index
    %8 = vector.load %arg12[%c0_6, %c0_7, %c0_8] : memref<8x1x128xf32, #tpu.memory_space<vmem>>, vector<8x1x128xf32>
    tpu.vector_store %arg12[%c0_6, %c0_7, %c0_8], %7 {strides = array<i32>} : memref<8x1x128xf32, #tpu.memory_space<vmem>>, vector<8x1x128xf32>,
    %c0_9 = arith.constant 0 : index
    %c0_10 = arith.constant 0 : index
    %9 = vector.load %arg3[%c0_9, %c0_10] : memref<1x128xf32, #tpu.memory_space<vmem>>, vector<1x128xf32>
    %10 = vector.shape_cast %9 : vector<1x128xf32> to vector<1x1x128xf32>
    %c0_11 = arith.constant 0 : index
    %c0_12 = arith.constant 0 : index
    %11 = vector.load %arg4[%c0_11, %c0_12] : memref<1x128xf32, #tpu.memory_space<vmem>>, vector<1x128xf32>
    %12 = vector.shape_cast %11 : vector<1x128xf32> to vector<1x1x128xf32>
    %c0_13 = arith.constant 0 : index
    %c0_14 = arith.constant 0 : index
    %13 = vector.load %arg5[%c0_13, %c0_14] : memref<1x128xf32, #tpu.memory_space<vmem>>, vector<1x128xf32>
    %14 = vector.shape_cast %13 : vector<1x128xf32> to vector<1x1x128xf32>
    %15 = arith.subf %3, %6 : vector<8x64x128xf32>
    %16 = vector.broadcast %10 : vector<1x1x128xf32> to vector<8x64x128xf32>
    %17 = arith.mulf %16, %15 : vector<8x64x128xf32>
    %18 = arith.addf %6, %17 : vector<8x64x128xf32>
    %19 = vector.shape_cast %18 : vector<8x64x128xf32> to vector<512x128xf32>
    %20 = arith.truncf %19 : vector<512x128xf32> to vector<512x128xbf16>
    %21 = vector.broadcast %12 : vector<1x1x128xf32> to vector<8x64x128xf32>
    %22 = arith.mulf %21, %15 : vector<8x64x128xf32>
    %23 = arith.addf %6, %22 : vector<8x64x128xf32>
    %24 = vector.shape_cast %23 : vector<8x64x128xf32> to vector<512x128xf32>
    %25 = arith.truncf %24 : vector<512x128xf32> to vector<512x128xbf16>
    %26 = vector.broadcast %14 : vector<1x1x128xf32> to vector<8x64x128xf32>
    %27 = arith.mulf %26, %15 : vector<8x64x128xf32>
    %28 = arith.addf %6, %27 : vector<8x64x128xf32>
    %29 = vector.shape_cast %28 : vector<8x64x128xf32> to vector<512x128xf32>
    %30 = arith.truncf %29 : vector<512x128xf32> to vector<512x128xbf16>
    %c0_15 = arith.constant 0 : index
    %c0_16 = arith.constant 0 : index
    %31 = vector.load %arg6[%c0_15, %c0_16] : memref<128x128xbf16, #tpu.memory_space<vmem>>, vector<128x128xbf16>
    %cst = arith.constant dense<0.000000e+00> : vector<512x128xf32>
    %32 = tpu.matmul %20, %31, %cst {dimension_numbers = #tpu.dot_dimension_numbers<[1], [0], [0], [1], [0, 0, 1, 1], [], []>} : vector<512x128xbf16>, vector<128x128xbf16>, vector<512x128xf32> -> vector<512x128xf32>
    %c0_17 = arith.constant 0 : index
    %c0_18 = arith.constant 0 : index
    %33 = vector.load %arg7[%c0_17, %c0_18] : memref<128x128xbf16, #tpu.memory_space<vmem>>, vector<128x128xbf16>
    %cst_19 = arith.constant dense<0.000000e+00> : vector<512x128xf32>
    %34 = tpu.matmul %25, %33, %cst_19 {dimension_numbers = #tpu.dot_dimension_numbers<[1], [0], [0], [1], [0, 0, 1, 1], [], []>} : vector<512x128xbf16>, vector<128x128xbf16>, vector<512x128xf32> -> vector<512x128xf32>
    %c0_20 = arith.constant 0 : index
    %c0_21 = arith.constant 0 : index
    %35 = vector.load %arg8[%c0_20, %c0_21] : memref<128x128xbf16, #tpu.memory_space<vmem>>, vector<128x128xbf16>
    %cst_22 = arith.constant dense<0.000000e+00> : vector<512x128xf32>
    %36 = tpu.matmul %30, %35, %cst_22 {dimension_numbers = #tpu.dot_dimension_numbers<[1], [0], [0], [1], [0, 0, 1, 1], [], []>} : vector<512x128xbf16>, vector<128x128xbf16>, vector<512x128xf32> -> vector<512x128xf32>
    %37 = vector.shape_cast %32 : vector<512x128xf32> to vector<8x64x128xf32>
    %38 = arith.truncf %37 : vector<8x64x128xf32> to vector<8x64x128xbf16>
    %c0_23 = arith.constant 0 : index
    %c0_24 = arith.constant 0 : index
    %c0_25 = arith.constant 0 : index
    %39 = vector.load %arg10[%c0_23, %c0_24, %c0_25] : memref<8x64x128xbf16, #tpu.memory_space<vmem>>, vector<8x64x128xbf16>
    tpu.vector_store %arg10[%c0_23, %c0_24, %c0_25], %38 {strides = array<i32>} : memref<8x64x128xbf16, #tpu.memory_space<vmem>>, vector<8x64x128xbf16>,
    %40 = vector.shape_cast %34 : vector<512x128xf32> to vector<8x64x128xf32>
    %41 = arith.truncf %40 : vector<8x64x128xf32> to vector<8x64x128xbf16>
    %c0_26 = arith.constant 0 : index
    %c0_27 = arith.constant 0 : index
    %c0_28 = arith.constant 0 : index
    %42 = vector.load %arg11[%c0_26, %c0_27, %c0_28] : memref<8x64x128xbf16, #tpu.memory_space<vmem>>, vector<8x64x128xbf16>
    tpu.vector_store %arg11[%c0_26, %c0_27, %c0_28], %41 {strides = array<i32>} : memref<8x64x128xbf16, #tpu.memory_space<vmem>>, vector<8x64x128xbf16>,
    %43 = arith.negf %36 : vector<512x128xf32>
    %44 = math.exp %43 : vector<512x128xf32>
    %cst_29 = arith.constant 1.000000e+00 : f32
    %45 = vector.broadcast %cst_29 : f32 to vector<512x128xf32>
    %46 = arith.addf %45, %44 : vector<512x128xf32>
    %47 = arith.divf %45, %46 : vector<512x128xf32>
    %48 = vector.shape_cast %47 : vector<512x128xf32> to vector<8x64x128xf32>
    %49 = arith.truncf %48 : vector<8x64x128xf32> to vector<8x64x128xbf16>
    %c0_30 = arith.constant 0 : index
    %c0_31 = arith.constant 0 : index
    %c0_32 = arith.constant 0 : index
    %50 = vector.load %arg9[%c0_30, %c0_31, %c0_32] : memref<8x64x128xbf16, #tpu.memory_space<vmem>>, vector<8x64x128xbf16>
    tpu.vector_store %arg9[%c0_30, %c0_31, %c0_32], %49 {strides = array<i32>} : memref<8x64x128xbf16, #tpu.memory_space<vmem>>, vector<8x64x128xbf16>,
    return
  }
  func.func @transform_0(%arg0: i32, %arg1: i32) -> (i32, i32, i32) {
    %c0_i32 = arith.constant 0 : i32
    %c0_i32_0 = arith.constant 0 : i32
    return %arg0, %arg1, %c0_i32 : i32, i32, i32
  }
  func.func @transform_1(%arg0: i32, %arg1: i32) -> (i32, i32) {
    %c0_i32 = arith.constant 0 : i32
    %c0_i32_0 = arith.constant 0 : i32
    %c0_i32_1 = arith.constant 0 : i32
    return %c0_i32, %c0_i32_0 : i32, i32
  }
  func.func @transform_2(%arg0: i32, %arg1: i32) -> (i32, i32) {
    %c0_i32 = arith.constant 0 : i32
    %c0_i32_0 = arith.constant 0 : i32
    %c0_i32_1 = arith.constant 0 : i32
    return %c0_i32, %c0_i32_0 : i32, i32
  }
  func.func @transform_3(%arg0: i32, %arg1: i32) -> (i32, i32) {
    %c0_i32 = arith.constant 0 : i32
    %c0_i32_0 = arith.constant 0 : i32
    %c0_i32_1 = arith.constant 0 : i32
    return %c0_i32, %c0_i32_0 : i32, i32
  }
  func.func @transform_4(%arg0: i32, %arg1: i32) -> (i32, i32) {
    %c0_i32 = arith.constant 0 : i32
    %c0_i32_0 = arith.constant 0 : i32
    %c0_i32_1 = arith.constant 0 : i32
    return %c0_i32, %c0_i32_0 : i32, i32
  }
  func.func @transform_5(%arg0: i32, %arg1: i32) -> (i32, i32) {
    %c0_i32 = arith.constant 0 : i32
    %c0_i32_0 = arith.constant 0 : i32
    %c0_i32_1 = arith.constant 0 : i32
    return %c0_i32, %c0_i32_0 : i32, i32
  }
  func.func @transform_6(%arg0: i32, %arg1: i32) -> (i32, i32) {
    %c0_i32 = arith.constant 0 : i32
    %c0_i32_0 = arith.constant 0 : i32
    %c0_i32_1 = arith.constant 0 : i32
    return %c0_i32, %c0_i32_0 : i32, i32
  }
  func.func @transform_7(%arg0: i32, %arg1: i32) -> (i32, i32, i32) {
    %c0_i32 = arith.constant 0 : i32
    %c0_i32_0 = arith.constant 0 : i32
    return %arg0, %arg1, %c0_i32 : i32, i32, i32
  }
  func.func @transform_8(%arg0: i32, %arg1: i32) -> (i32, i32, i32) {
    %c0_i32 = arith.constant 0 : i32
    %c0_i32_0 = arith.constant 0 : i32
    return %arg0, %arg1, %c0_i32 : i32, i32, i32
  }
  func.func @transform_9(%arg0: i32, %arg1: i32) -> (i32, i32, i32) {
    %c0_i32 = arith.constant 0 : i32
    %c0_i32_0 = arith.constant 0 : i32
    return %arg0, %arg1, %c0_i32 : i32, i32, i32
  }
}

</mosaic_0001>

<bundles_post_ra>
// kernel: tpu_custom_call.1
= control target key start
LH: loop header
LB: loop body
LE: loop exit
PB: predicated region body
PF: predicated region fallthrough
CT: control target
= control target key end

     0   :  { %15 = vsyncpa [#allocation4], 0  ;;  %s7145_s0 = inlined_call_operand.hbm [shape: f32[8,64,128], index: 0, kind: input, shape index: {}]   ;;  %s7146_s1 = inlined_call_operand.hbm [shape: f32[1,128], index: 1, kind: input, shape index: {}]   ;;  %s7147_s2 = inlined_call_operand.vmem [shape: f32[1,128], index: 2, kind: input, shape index: {}]   ;;  %s7148_s3 = inlined_call_operand.vmem [shape: f32[1,128], index: 3, kind: input, shape index: {}]   ;;  %s7149_s4 = inlined_call_operand.hbm [shape: bf16[128,128], index: 4, kind: input, shape index: {}]   ;;  %s7150_s5 = inlined_call_operand.hbm [shape: bf16[128,128], index: 5, kind: input, shape index: {}]   ;;  %s7151_s6 = inlined_call_operand.hbm [shape: bf16[128,128], index: 6, kind: input, shape index: {}]   ;;  %s7152_s7 = inlined_call_operand.hbm [shape: bf16[8,64,128], index: 7, kind: output, shape index: {0}]   ;;  %s7153_s8 = inlined_call_operand.hbm [shape: bf16[8,64,128], index: 8, kind: output, shape index: {1}]   ;;  %s7154_s9 = inlined_call_operand.hbm [shape: bf16[8,64,128], index: 9, kind: output, shape index: {2}]  }
   0x1   :  { %16 = vsyncpa [#allocation7], 0 }
   0x2   :  { %17 = vsyncpa [#allocation10], 0 }
   0x3   :  { %18 = vsyncpa [#allocation5], 0  ;;  %s38_s11 = sshll.u32 %s7146_s1, 4  ;;  %s39_s11 = int_to_ptr.hbm [resolvable:$true] %s38_s11 }
   0x4   :  { %19 = vsyncpa [#allocation14], 0  ;;  %s4629_s12 = smov [#allocation6]   ;;  %s65_s16 = sshll.u32 %s7150_s5, 4  ;;  %s66_s16 = int_to_ptr.hbm [resolvable:$true] %s65_s16 }
   0x5   :  { %s40_s13 = sshll.u32 %s4629_s12, 4  ;;  %s4630_s17 = smov [#allocation9]   ;;  %s41_s13 = int_to_ptr.vmem [resolvable:$true] %s40_s13 }
   0x6   :  { %43 = dma.hbm_to_vmem [thread:$0]  %s39_s11, 16, %s41_s13, [#allocation7]  }
   0x7   :  { %s67_s18 = sshll.u32 %s4630_s17, 4  ;;  %s24_s21 = sshll.u32 %s7145_s0, 4  ;;  %s68_s18 = int_to_ptr.vmem [resolvable:$true] %s67_s18  ;;  %s25_s21 = int_to_ptr.hbm [resolvable:$true] %s24_s21 }
   0x8   :  { %s4631_s1 = smov 64   ;;  %s4632_s22 = smov 4  }
   0x9   :  { %73 = dma.hbm_to_vmem [thread:$0]  %s66_s16, 1024, %s68_s18, [#allocation10], %s4631_s1, %s4631_s1, %s4632_s22  }
   0xa   :  { %s4633_s23 = smov [#allocation3]   ;;  %s52_s26 = sshll.u32 %s7149_s4, 4  ;;  %s53_s26 = int_to_ptr.hbm [resolvable:$true] %s52_s26 }
   0xb   :  { %s26_s24 = sshll.u32 %s4633_s23, 4  ;;  %s4634_s27 = smov 128   ;;  %s27_s24 = int_to_ptr.vmem [resolvable:$true] %s26_s24 }
   0xc   :  { %s4635_s28 = smov 8   ;;  %s4636_s0 = smov [#allocation8]  }
   0xd   :  { %32 = dma.hbm_to_vmem [thread:$0]  %s25_s21, 8192, %s27_s24, [#allocation4], %s4634_s27, %s4634_s27, %s4635_s28  }
   0xe   :  { %s54_s29 = sshll.u32 %s4636_s0, 4  ;;  %s78_s11 = sshll.u32 %s7151_s6, 4  ;;  %s55_s29 = int_to_ptr.vmem [resolvable:$true] %s54_s29  ;;  %s79_s11 = int_to_ptr.hbm [resolvable:$true] %s78_s11 }
   0xf   :  { %60 = dma.hbm_to_vmem [thread:$0]  %s53_s26, 1024, %s55_s29, [#allocation7], %s4631_s1, %s4631_s1, %s4632_s22  }
  0x10   :  { %s4637_s12 = smov [#allocation11]  }
  0x11   :  { %s80_s13 = sshll.u32 %s4637_s12, 4  ;;  %s81_s13 = int_to_ptr.vmem [resolvable:$true] %s80_s13 }
  0x12   :  { %86 = dma.hbm_to_vmem [thread:$0]  %s79_s11, 1024, %s81_s13, [#allocation10], %s4631_s1, %s4631_s1, %s4632_s22  }
  0x13   :  { %4619 = dma.done.wait [#allocation4], 8192  }
  0x14   :  { %4620 = vsyncadd [#allocation4], 4294959104 }
  0x15   :  { %4621 = dma.done.wait [#allocation7], 1040  }
  0x16   :  { %4622 = vsyncadd [#allocation7], 4294966256 }
  0x17   :  { %4623 = dma.done.wait [#allocation10], 2048  }
  0x18   :  { %4624 = vsyncadd [#allocation10], 4294965248  ;;  %v4638_v0 = vmov 0.0   ;;  %v3534_v1 = vld [vmem:[#allocation8 + $0x38] sm:$0xff]  ;;  %v3533_v3 = vld [vmem:[#allocation8 + $0x30] sm:$0xff]  ;;  %vm255_vm0 = vcmask 1040384  }
  0x19   :  { %117 = vst [vmem:[#allocation2 + $0x6] sm:$0x1] %v4638_v0  ;;  %v4716_v2 = vld [vmem:[#allocation11 + $0x38] sm:$0xff]  ;;  %4124 = vmatpush.bf16.msra.mxu3 %v3534_v1  ;;  %v4719_v4 = vld [vmem:[#allocation11 + $0x30] sm:$0xff]  ;;  %1076 = vmatpush.bf16.msra.mxu0 %v3534_v1  ;;  %v3532_v6 = vld [vmem:[#allocation8 + $0x28] sm:$0xff]  ;;  %s3330_s26 = sshll.u32 %s7153_s8, 4  ;;  %s3331_s26 = int_to_ptr.hbm [resolvable:$true] %s3330_s26 }
  0x1a   :  { %111 = vst [vmem:[#allocation2] sm:$0x1] %v4638_v0  ;;  %1542 = vmatpush.bf16.msra.mxu2 %v4716_v2  ;;  %v4721_v5 = vld [vmem:[#allocation9 + $0x38] sm:$0xff]  ;;  %v4724_v7 = vld [vmem:[#allocation11 + $0x28] sm:$0xff]  ;;  %v4729_v10 = vld [vmem:[#allocation9 + $0x30] sm:$0xff]  ;;  %s4640_s27 = smov [#allocation15]  }
  0x1b   :  { %112 = vst [vmem:[#allocation2 + $0x1] sm:$0x1] %v4638_v0  ;;  %v167_v8 = vld [vmem:[#allocation3 + $0x180] sm:$0xff]  ;;  %v4726_v9 = vld [vmem:[#allocation3 + $0x188] sm:$0xff]  ;;  %1309 = vmatpush.bf16.msra.mxu1 %v4721_v5  ;;  %v4775_v32 = vld [vmem:[%s7148_s3] ss:$0 sm:$0xff] }
  0x1c   :  { %113 = vst [vmem:[#allocation2 + $0x2] sm:$0x1] %v4638_v0  ;;  %v119_v11 = vld [vmem:[#allocation3] sm:$0xff]  ;;  %v346_v12 = vrot.slane %v167_v8, 7  ;;  %v347_v13 = vrot.slane %v4726_v9, 7  ;;  %v4732_v14 = vld [vmem:[#allocation3 + $0x8] sm:$0xff] }
  0x1d   :  { %114 = vst [vmem:[#allocation2 + $0x3] sm:$0x1] %v4638_v0  ;;  %4125 = vmatpush.bf16.msra.mxu3 %v3533_v3  ;;  %1077 = vmatpush.bf16.msra.mxu0 %v3533_v3  ;;  %v3531_v15 = vld [vmem:[#allocation8 + $0x20] sm:$0xff]  ;;  %v256_v18 = vrot.slane %v119_v11, 7  ;;  %v257_v19 = vrot.slane %v4732_v14, 7  ;;  %v4739_v21 = vld [vmem:[#allocation9 + $0x28] sm:$0xff] }
  0x1e   :  { %115 = vst [vmem:[#allocation2 + $0x4] sm:$0x1] %v4638_v0  ;;  %1543 = vmatpush.bf16.msra.mxu2 %v4719_v4  ;;  %v4735_v16 = vld [vmem:[#allocation11 + $0x20] sm:$0xff]  ;;  %v4744_v22 = vsel %vm255_vm0, %v346_v12, %v347_v13  ;;  %v3530_v24 = vld [vmem:[#allocation8 + $0x18] sm:$0xff]  ;;  %v3529_v35 = vld [vmem:[#allocation8 + $0x10] sm:$0xff]  ;;  %s7011_s28 = sshll.u32 %s4640_s27, 4  ;;  %s3342_s28 = int_to_ptr.vmem [resolvable:$true] %s7011_s28 }
  0x1f   :  { %116 = vst [vmem:[#allocation2 + $0x5] sm:$0x1] %v4638_v0  ;;  %1310 = vmatpush.bf16.msra.mxu1 %v4729_v10  ;;  %v4750_v25 = vld [vmem:[#allocation11 + $0x18] sm:$0xff]  ;;  %v4755_v26 = vsel %vm255_vm0, %v256_v18, %v257_v19  ;;  %v4761_v28 = vld [vmem:[#allocation9 + $0x20] sm:$0xff]  ;;  %v4768_v30 = vsub.f32 %v4726_v9, %v4744_v22  ;;  %v4781_v36 = vld [vmem:[#allocation11 + $0x10] sm:$0xff]  ;;  %s3343_s30 = sshll.u32 %s7154_s9, 4  ;;  %s3344_s30 = int_to_ptr.hbm [resolvable:$true] %s3343_s30 }
  0x20   :  { %118 = vst [vmem:[#allocation2 + $0x7] sm:$0x1] %v4638_v0  ;;  %v189_v17 = vld [vmem:[#allocation2 + $0x6] sm:$0x1]  ;;  %v4770_v31 = vld [vmem:[#allocation6] ss:$0 sm:$0xff]  ;;  %v460_v34 = vsub.f32 %v4732_v14, %v4755_v26 }
  0x21   :  { %4126 = vmatpush.bf16.msra.mxu3 %v3532_v6  ;;  %v183_v20 = vld [vmem:[#allocation2] sm:$0x1]  ;;  %1078 = vmatpush.bf16.msra.mxu0 %v3532_v6  ;;  %7165 = vst [vmem:[#allocation21_spill] sm:$0xff] %v4744_v22  ;;  %v4747_v23 = vsel %vm255_vm0, %v189_v17, %v346_v12  ;;  %v4784_v37 = vld [vmem:[#allocation9 + $0x18] sm:$0xff]  ;;  %v575_v39 = vmul.f32 %v4770_v31, %v4768_v30  ;;  %v169_v40 = vld [vmem:[#allocation3 + $0x190] sm:$0xff]  ;;  %s4641_s8 = smov [#allocation12]  }
  0x22   :  { %1544 = vmatpush.bf16.msra.mxu2 %v4724_v7  ;;  %7166 = vst [vmem:[#allocation22_spill] sm:$0xff] %v4747_v23  ;;  %v4758_v27 = vsel %vm255_vm0, %v183_v20, %v256_v18  ;;  %v4764_v29 = vsub.f32 %v167_v8, %v4747_v23  ;;  %v3528_v41 = vld [vmem:[#allocation8 + $0x8] sm:$0xff]  ;;  %v853_v44 = vmul.f32 %v4775_v32, %v460_v34  ;;  %v4795_v45 = vld [vmem:[#allocation3 + $0x198] sm:$0xff]  ;;  %v349_v49 = vrot.slane %v169_v40, 7  ;;  %v3527_v59 = vld [vmem:[#allocation8] sm:$0xff]  ;;  %s3315_s9 = sshll.u32 %s4641_s8, 4  ;;  %s3316_s9 = int_to_ptr.vmem [resolvable:$true] %s3315_s9 }
  0x23   :  { %1311 = vmatpush.bf16.msra.mxu1 %v4739_v21  ;;  %v459_v33 = vsub.f32 %v119_v11, %v4758_v27  ;;  %v4790_v42 = vld [vmem:[#allocation11 + $0x8] sm:$0xff]  ;;  %v4800_v47 = vld [vmem:[%s7147_s2] ss:$0 sm:$0xff]  ;;  %v639_v52 = vadd.f32 %v575_v39, %v4744_v22  ;;  %v527_v54 = vmul.f32 %v4770_v31, %v460_v34  ;;  %v351_v57 = vrot.slane %v4795_v45, 7  ;;  %v4815_v60 = vld [vmem:[#allocation11] sm:$0xff]  ;;  %s3317_s12 = sshll.u32 %s7152_s7, 4  ;;  %s3318_s12 = int_to_ptr.hbm [resolvable:$true] %s3317_s12 }
  0x24   :  { %v574_v38 = vmul.f32 %v4770_v31, %v4764_v29  ;;  %v121_v46 = vld [vmem:[#allocation3 + $0x10] sm:$0xff]  ;;  %v4805_v50 = vld [vmem:[#allocation3 + $0x18] sm:$0xff]  ;;  %v917_v56 = vadd.f32 %v853_v44, %v4755_v26  ;;  %v690_v63 = vmul.f32 %v4800_v47, %v460_v34  ;;  %v4828_v11 = vsel %vm255_vm0, %v347_v13, %v349_v49  ;;  %v4846_v18 = vld [vmem:[#allocation9] sm:$0xff] }
  0x25   :  { %4127 = vmatpush.bf16.msra.mxu3 %v3531_v15  ;;  %1079 = vmatpush.bf16.msra.mxu0 %v3531_v15  ;;  %v852_v43 = vmul.f32 %v4775_v32, %v459_v33  ;;  %v4803_v48 = vld [vmem:[#allocation9 + $0x10] sm:$0xff]  ;;  %v526_v53 = vmul.f32 %v4770_v31, %v459_v33  ;;  %v259_v58 = vrot.slane %v121_v46, 7  ;;  %v261_v61 = vrot.slane %v4805_v50, 7  ;;  %v4821_v0 = vld [vmem:[#allocation9 + $0x8] sm:$0xff]  ;;  %7167 = vst [vmem:[#allocation23_spill] sm:$0xff] %v4828_v11  ;;  %v171_v39 = vld [vmem:[#allocation3 + $0x1a0] sm:$0xff] }
  0x26   :  { %1545 = vmatpush.bf16.msra.mxu2 %v4735_v16  ;;  %v638_v51 = vadd.f32 %v574_v38, %v4747_v23  ;;  %v689_v62 = vmul.f32 %v4800_v47, %v459_v33  ;;  %v591_v6 = vadd.f32 %v527_v54, %v4755_v26  ;;  %v4833_v12 = vsel %vm255_vm0, %v349_v49, %v351_v57 }
  0x27   :  { %1312 = vmatpush.bf16.msra.mxu1 %v4761_v28  ;;  %v916_v55 = vadd.f32 %v852_v43, %v4758_v27  ;;  %v590_v3 = vadd.f32 %v526_v53, %v4758_v27  ;;  %7168 = vst [vmem:[#allocation24_spill] sm:$0xff] %v4833_v12  ;;  %v260_v15 = vsel %vm255_vm0, %v257_v19, %v259_v58  ;;  %v4873_v43 = vld [vmem:[#allocation3 + $0x28] sm:$0xff] }
  0x28   :  { %v678_v1 = vpack.c.bf16 %v639_v52, %v638_v51  ;;  %v262_v17 = vsel %vm255_vm0, %v259_v58, %v261_v61  ;;  %v753_v9 = vadd.f32 %v689_v62, %v4758_v27  ;;  %v754_v13 = vadd.f32 %v690_v63, %v4755_v26  ;;  %v4856_v27 = vld [vmem:[#allocation3 + $0x1b8] sm:$0xff] }
  0x29   :  { %4128 = vmatpush.bf16.msra.mxu3 %v3530_v24  ;;  %1080 = vmatpush.bf16.msra.mxu0 %v3530_v24  ;;  %v980_v8 = vpack.c.bf16 %v917_v56, %v916_v55  ;;  %v4849_v14 = vsub.f32 %v169_v40, %v4828_v11  ;;  %v654_v19 = vpack.c.bf16 %v591_v6, %v590_v3  ;;  %v4867_v40 = vld [vmem:[#allocation3 + $0x38] sm:$0xff]  ;;  %v265_v58 = vrot.slane %v4873_v43, 7 }
  0x2a   :  { %1546 = vmatpush.bf16.msra.mxu2 %v4750_v25  ;;  %v4853_v20 = vsub.f32 %v4795_v45, %v4833_v12  ;;  %v461_v24 = vsub.f32 %v121_v46, %v260_v15  ;;  %v462_v26 = vsub.f32 %v4805_v50, %v262_v17  ;;  %454 = vst [vmem:[#allocation2 - $0x1] sm:$0x80] %v4856_v27  ;;  %v353_v46 = vrot.slane %v171_v39, 7 }
  0x2b   :  { %1313 = vmatpush.bf16.msra.mxu1 %v4784_v37  ;;  %7169 = vst [vmem:[#allocation25_spill] sm:$0xff] %v4849_v14  ;;  %v576_v33 = vmul.f32 %v4770_v31, %v4849_v14 }
  0x2c   :  { %7170 = vst [vmem:[#allocation26_spill] sm:$0xff] %v4853_v20  ;;  %v577_v34 = vmul.f32 %v4770_v31, %v4853_v20  ;;  %v855_v38 = vmul.f32 %v4775_v32, %v462_v26  ;;  %v528_v49 = vmul.f32 %v4770_v31, %v461_v24  ;;  %v529_v51 = vmul.f32 %v4770_v31, %v462_v26 }
  0x2d   :  { %4129 = vmatpush.bf16.msra.mxu3 %v3529_v35  ;;  %1081 = vmatpush.bf16.msra.mxu0 %v3529_v35  ;;  %v854_v35 = vmul.f32 %v4775_v32, %v461_v24  ;;  %448 = vst [vmem:[#allocation2 - $0x7] sm:$0x80] %v4867_v40  ;;  %v640_v44 = vadd.f32 %v576_v33, %v4828_v11  ;;  %v173_v33 = vld [vmem:[#allocation3 + $0x1b0] sm:$0xff] }
  0x2e   :  { %1547 = vmatpush.bf16.msra.mxu2 %v4781_v36  ;;  %v641_v52 = vadd.f32 %v577_v34, %v4833_v12  ;;  %v919_v54 = vadd.f32 %v855_v38, %v262_v17  ;;  %v592_v62 = vadd.f32 %v528_v49, %v260_v15  ;;  %v593_v63 = vadd.f32 %v529_v51, %v262_v17  ;;  %v125_v34 = vld [vmem:[#allocation3 + $0x30] sm:$0xff] }
  0x2f   :  { %1314 = vmatpush.bf16.msra.mxu1 %v4803_v48  ;;  %v918_v53 = vadd.f32 %v854_v35, %v260_v15  ;;  %v4887_v6 = vsel %vm255_vm0, %v351_v57, %v353_v46  ;;  %v269_v49 = vrot.slane %v4867_v40, 7 }
  0x30   :  { %v655_v57 = vpack.c.bf16 %v593_v63, %v592_v62 }
  0x31   :  { %4130 = vmatpush.bf16.msra.mxu3 %v3528_v41  ;;  %1082 = vmatpush.bf16.msra.mxu0 %v3528_v41  ;;  %v4869_v41 = vld [vmem:[#allocation3 + $0x1a8] sm:$0xff]  ;;  %v981_v3 = vpack.c.bf16 %v919_v54, %v918_v53 }
  0x32   :  { %1548 = vmatpush.bf16.msra.mxu2 %v4790_v42  ;;  %v355_v55 = vrot.slane %v4869_v41, 7 }
  0x33   :  { %1315 = vmatpush.bf16.msra.mxu1 %v4821_v0 }
  0x35   :  { %4131 = vmatpush.bf16.msra.mxu3 %v3527_v59  ;;  %1083 = vmatpush.bf16.msra.mxu0 %v3527_v59  ;;  %v692_v59 = vmul.f32 %v4800_v47, %v462_v26 }
  0x36   :  { %1549 = vmatpush.bf16.msra.mxu2 %v4815_v60 }
  0x37   :  { %1316 = vmatpush.bf16.msra.mxu1 %v4846_v18 }
  0x38   :  { %1204 = vmatmul.bf16.vlgmr.msra.gmra.mxu3 %v678_v1  ;;  %1084 = vmatmul.bf16.vlgmr.msra.gmra.mxu0 %v654_v19  ;;  %v679_v1 = vpack.c.bf16 %v641_v52, %v640_v44  ;;  %v359_v44 = vrot.slane %v4856_v27, 7 }
  0x39   :  { %4132 = vmatpush.bf16.msrb.mxu3 %v4721_v5  ;;  %1550 = vmatmul.bf16.vlgmr.msra.gmra.mxu2 %v980_v8  ;;  %v817_v5 = vpack.c.bf16 %v754_v13, %v753_v9  ;;  %v4890_v8 = vsel %vm255_vm0, %v353_v46, %v355_v55  ;;  %v267_v46 = vrot.slane %v125_v34, 7 }
  0x3a   :  { %v4902_v45 = vsub.f32 %v4869_v41, %v4890_v8 }
  0x3b   :  { %1317 = vmatmul.bf16.vlgmr.msra.gmra.mxu1 %v817_v5  ;;  %v268_v62 = vsel %vm255_vm0, %v265_v58, %v267_v46  ;;  %v270_v63 = vsel %vm255_vm0, %v267_v46, %v269_v49 }
  0x3d   :  { %4133 = vmatpush.bf16.msrb.mxu3 %v4729_v10  ;;  %v123_v10 = vld [vmem:[#allocation3 + $0x20] sm:$0xff] }
  0x3e   :  { %v263_v56 = vrot.slane %v123_v10, 7 }
  0x40   :  { %v264_v9 = vsel %vm255_vm0, %v261_v61, %v263_v56  ;;  %v266_v13 = vsel %vm255_vm0, %v263_v56, %v265_v58 }
  0x41   :  { %4134 = vmatpush.bf16.msrb.mxu3 %v4739_v21  ;;  %v691_v21 = vmul.f32 %v4800_v47, %v461_v24  ;;  %v4898_v24 = vsub.f32 %v171_v39, %v4887_v6  ;;  %v463_v26 = vsub.f32 %v123_v10, %v264_v9  ;;  %v464_v50 = vsub.f32 %v4873_v43, %v266_v13 }
  0x42   :  { %v357_v43 = vrot.slane %v173_v33, 7 }
  0x43   :  { %v755_v19 = vadd.f32 %v691_v21, %v260_v15  ;;  %v578_v15 = vmul.f32 %v4770_v31, %v4898_v24  ;;  %v857_v5 = vmul.f32 %v4775_v32, %v464_v50  ;;  %v530_v38 = vmul.f32 %v4770_v31, %v463_v26 }
  0x44   :  { %v531_v39 = vmul.f32 %v4770_v31, %v464_v50  ;;  %v693_v51 = vmul.f32 %v4800_v47, %v463_v26  ;;  %v4924_v21 = vsel %vm255_vm0, %v355_v55, %v357_v43  ;;  %v465_v55 = vsub.f32 %v125_v34, %v268_v62 }
  0x45   :  { %4135 = vmatpush.bf16.msrb.mxu3 %v4761_v28  ;;  %v756_v28 = vadd.f32 %v692_v59, %v262_v17  ;;  %v856_v17 = vmul.f32 %v4775_v32, %v463_v26  ;;  %v642_v35 = vadd.f32 %v578_v15, %v4887_v6  ;;  %v921_v10 = vadd.f32 %v857_v5, %v266_v13  ;;  %v4947_v26 = vld [vmem:[#allocation3 + $0x1c8] sm:$0xff] }
  0x46   :  { %v594_v52 = vadd.f32 %v530_v38, %v264_v9  ;;  %v595_v53 = vadd.f32 %v531_v39, %v266_v13  ;;  %v4927_v59 = vsel %vm255_vm0, %v357_v43, %v359_v44  ;;  %v362_v34 = vrot.slane %v4947_v26, 7 }
  0x47   :  { %v818_v61 = vpack.c.bf16 %v756_v28, %v755_v19  ;;  %v920_v41 = vadd.f32 %v856_v17, %v264_v9  ;;  %v466_v28 = vsub.f32 %v4867_v40, %v270_v63  ;;  %v4949_v40 = vld [vmem:[#allocation3 + $0x48] sm:$0xff]  ;;  %v695_v39 = vmul.f32 %v4800_v47, %v465_v55 }
  0x48   :  { %1209 = vmatmul.bf16.gmra.mxu3 %v679_v1  ;;  %1089 = vmatmul.bf16.gmra.mxu0 %v655_v57  ;;  %v757_v1 = vadd.f32 %v693_v51, %v264_v9  ;;  %v656_v19 = vpack.c.bf16 %v595_v53, %v594_v52  ;;  %v272_v38 = vrot.slane %v4949_v40, 7 }
  0x49   :  { %4136 = vmatpush.bf16.msrb.mxu3 %v4784_v37  ;;  %1555 = vmatmul.bf16.gmra.mxu2 %v981_v3  ;;  %v579_v37 = vmul.f32 %v4770_v31, %v4902_v45  ;;  %v982_v56 = vpack.c.bf16 %v921_v10, %v920_v41  ;;  %v859_v57 = vmul.f32 %v4775_v32, %v466_v28  ;;  %v184_v10 = vld [vmem:[#allocation2 + $0x1] sm:$0x1] }
  0x4a   :  { %v533_v17 = vmul.f32 %v4770_v31, %v466_v28  ;;  %v696_v41 = vmul.f32 %v4800_v47, %v466_v28  ;;  %v759_v53 = vadd.f32 %v695_v39, %v268_v62 }
  0x4b   :  { %1322 = vmatmul.bf16.gmra.mxu1 %v818_v61  ;;  %v923_v5 = vadd.f32 %v859_v57, %v270_v63 }
  0x4c   :  { %v597_v44 = vadd.f32 %v533_v17, %v270_v63 }
  0x4d   :  { %4137 = vmatpush.bf16.msrb.mxu3 %v4803_v48  ;;  %v643_v48 = vadd.f32 %v579_v37, %v4890_v8  ;;  %v532_v37 = vmul.f32 %v4770_v31, %v465_v55 }
  0x4f   :  { %v680_v54 = vpack.c.bf16 %v643_v48, %v642_v35  ;;  %v190_v35 = vld [vmem:[#allocation2 + $0x7] sm:$0x1]  ;;  %v596_v43 = vadd.f32 %v532_v37, %v268_v62 }
  0x51   :  { %4138 = vmatpush.bf16.msrb.mxu3 %v4821_v0  ;;  %v694_v0 = vmul.f32 %v4800_v47, %v464_v50  ;;  %v127_v50 = vld [vmem:[#allocation3 + $0x40] sm:$0xff] }
  0x52   :  { %v271_v48 = vrot.slane %v127_v50, 7 }
  0x53   :  { %v758_v3 = vadd.f32 %v694_v0, %v266_v13 }
  0x54   :  { %v273_v0 = vsel %vm255_vm0, %v271_v48, %v272_v38  ;;  %v441_v52 = vsel %vm255_vm0, %v184_v10, %v271_v48 }
  0x55   :  { %4139 = vmatpush.bf16.msrb.mxu3 %v4846_v18  ;;  %v4932_v18 = vsub.f32 %v173_v33, %v4924_v21  ;;  %v819_v58 = vpack.c.bf16 %v758_v3, %v757_v1  ;;  %v657_v1 = vpack.c.bf16 %v597_v44, %v596_v43  ;;  %v467_v3 = vsub.f32 %v127_v50, %v441_v52 }
  0x57   :  { %v580_v9 = vmul.f32 %v4770_v31, %v4932_v18  ;;  %v860_v28 = vmul.f32 %v4775_v32, %v467_v3 }
  0x58   :  { %1214 = vmatmul.bf16.gmra.mxu3 %v680_v54  ;;  %1094 = vmatmul.bf16.gmra.mxu0 %v656_v19  ;;  %v760_v54 = vadd.f32 %v696_v41, %v270_v63  ;;  %v468_v19 = vsub.f32 %v4949_v40, %v273_v0 }
  0x59   :  { %4140 = vmatpush.bf16.msra.mxu3 %v4716_v2  ;;  %v4936_v2 = vsub.f32 %v4856_v27, %v4927_v59  ;;  %1560 = vmatmul.bf16.gmra.mxu2 %v982_v56  ;;  %v858_v27 = vmul.f32 %v4775_v32, %v465_v55  ;;  %v644_v61 = vadd.f32 %v580_v9, %v4924_v21  ;;  %v4985_v9 = vld [vmem:[#allocation3 + $0x1d8] sm:$0xff] }
  0x5a   :  { %v820_v55 = vpack.c.bf16 %v760_v54, %v759_v53  ;;  %v535_v50 = vmul.f32 %v4770_v31, %v468_v19 }
  0x5b   :  { %v581_v13 = vmul.f32 %v4770_v31, %v4936_v2  ;;  %1327 = vmatmul.bf16.gmra.mxu1 %v819_v58  ;;  %v861_v58 = vmul.f32 %v4775_v32, %v468_v19 }
  0x5d   :  { %4141 = vmatpush.bf16.msra.mxu3 %v4719_v4  ;;  %v175_v4 = vld [vmem:[#allocation3 + $0x1c0] sm:$0xff]  ;;  %v645_v15 = vadd.f32 %v581_v13, %v4927_v59  ;;  %v129_v13 = vld [vmem:[#allocation3 + $0x50] sm:$0xff]  ;;  %v925_v40 = vadd.f32 %v861_v58, %v273_v0 }
  0x5e   :  { %v361_v33 = vrot.slane %v175_v4, 7  ;;  %v274_v37 = vrot.slane %v129_v13, 7  ;;  %v131_v58 = vld [vmem:[#allocation3 + $0x60] sm:$0xff] }
  0x5f   :  { %v681_v46 = vpack.c.bf16 %v645_v15, %v644_v61  ;;  %v366_v15 = vrot.slane %v4985_v9, 7 }
  0x60   :  { %v4962_v49 = vsel %vm255_vm0, %v361_v33, %v362_v34  ;;  %v4965_v51 = vsel %vm255_vm0, %v190_v35, %v361_v33  ;;  %v599_v35 = vadd.f32 %v535_v50, %v273_v0  ;;  %v275_v10 = vsel %vm255_vm0, %v272_v38, %v274_v37 }
  0x61   :  { %4142 = vmatpush.bf16.msra.mxu3 %v4724_v7  ;;  %v922_v7 = vadd.f32 %v858_v27, %v268_v62  ;;  %v4970_v56 = vsub.f32 %v175_v4, %v4965_v51  ;;  %v4987_v27 = vld [vmem:[#allocation3 + $0x58] sm:$0xff] }
  0x62   :  { %v276_v17 = vrot.slane %v4987_v27, 7 }
  0x63   :  { %v582_v62 = vmul.f32 %v4770_v31, %v4970_v56 }
  0x64   :  { %v277_v43 = vsel %vm255_vm0, %v274_v37, %v276_v17 }
  0x65   :  { %4143 = vmatpush.bf16.msra.mxu3 %v4735_v16  ;;  %v983_v16 = vpack.c.bf16 %v923_v5, %v922_v7  ;;  %v646_v57 = vadd.f32 %v582_v62, %v4965_v51  ;;  %v697_v7 = vmul.f32 %v4800_v47, %v467_v3  ;;  %v698_v5 = vmul.f32 %v4800_v47, %v468_v19  ;;  %v5023_v62 = vld [vmem:[#allocation3 + $0x78] sm:$0xff] }
  0x66   :  { %449 = vst [vmem:[#allocation2 - $0x6] sm:$0x80] %v5023_v62 }
  0x67   :  { %v761_v44 = vadd.f32 %v697_v7, %v441_v52 }
  0x68   :  { %1219 = vmatmul.bf16.gmra.mxu3 %v681_v46  ;;  %1099 = vmatmul.bf16.gmra.mxu0 %v657_v1  ;;  %v762_v46 = vadd.f32 %v698_v5, %v273_v0  ;;  %v470_v1 = vsub.f32 %v4987_v27, %v277_v43 }
  0x69   :  { %4144 = vmatpush.bf16.msra.mxu3 %v4750_v25  ;;  %v4974_v25 = vsub.f32 %v4947_v26, %v4962_v49  ;;  %1565 = vmatmul.bf16.gmra.mxu2 %v983_v16  ;;  %v534_v26 = vmul.f32 %v4770_v31, %v467_v3  ;;  %v5014_v3 = vld [vmem:[#allocation3 + $0x1f8] sm:$0xff] }
  0x6a   :  { %v821_v38 = vpack.c.bf16 %v762_v46, %v761_v44  ;;  %455 = vst [vmem:[#allocation2] sm:$0x80] %v5014_v3  ;;  %v700_v7 = vmul.f32 %v4800_v47, %v470_v1 }
  0x6b   :  { %v583_v63 = vmul.f32 %v4770_v31, %v4974_v25  ;;  %1332 = vmatmul.bf16.gmra.mxu1 %v820_v55  ;;  %v598_v33 = vadd.f32 %v534_v26, %v441_v52  ;;  %v863_v55 = vmul.f32 %v4775_v32, %v470_v1 }
  0x6d   :  { %4145 = vmatpush.bf16.msra.mxu3 %v4781_v36  ;;  %v177_v36 = vld [vmem:[#allocation3 + $0x1d0] sm:$0xff]  ;;  %v647_v4 = vadd.f32 %v583_v63, %v4962_v49  ;;  %v658_v54 = vpack.c.bf16 %v599_v35, %v598_v33  ;;  %v179_v63 = vld [vmem:[#allocation3 + $0x1e0] sm:$0xff]  ;;  %v927_v26 = vadd.f32 %v863_v55, %v277_v43 }
  0x6e   :  { %v364_v61 = vrot.slane %v177_v36, 7  ;;  %v368_v50 = vrot.slane %v179_v63, 7 }
  0x6f   :  { %v682_v48 = vpack.c.bf16 %v647_v4, %v646_v57  ;;  %v537_v57 = vmul.f32 %v4770_v31, %v470_v1 }
  0x70   :  { %v4999_v41 = vsel %vm255_vm0, %v362_v34, %v364_v61  ;;  %v469_v34 = vsub.f32 %v129_v13, %v275_v10 }
  0x71   :  { %4146 = vmatpush.bf16.msra.mxu3 %v4790_v42  ;;  %v924_v42 = vadd.f32 %v860_v28, %v441_v52  ;;  %v5007_v16 = vsub.f32 %v177_v36, %v4999_v41  ;;  %v180_v28 = vld [vmem:[#allocation3 + $0x1e8] sm:$0xff]  ;;  %v601_v33 = vadd.f32 %v537_v57, %v277_v43 }
  0x72   :  { %v862_v19 = vmul.f32 %v4775_v32, %v469_v34  ;;  %v132_v36 = vld [vmem:[#allocation3 + $0x68] sm:$0xff]  ;;  %v536_v27 = vmul.f32 %v4770_v31, %v469_v34  ;;  %v699_v37 = vmul.f32 %v4800_v47, %v469_v34 }
  0x73   :  { %v984_v39 = vpack.c.bf16 %v925_v40, %v924_v42  ;;  %v584_v0 = vmul.f32 %v4770_v31, %v5007_v16  ;;  %v370_v42 = vrot.slane %v180_v28, 7  ;;  %v278_v40 = vrot.slane %v131_v58, 7 }
  0x74   :  { %v926_v4 = vadd.f32 %v862_v19, %v275_v10  ;;  %v600_v5 = vadd.f32 %v536_v27, %v275_v10 }
  0x75   :  { %4147 = vmatpush.bf16.msra.mxu3 %v4815_v60  ;;  %v5002_v60 = vsel %vm255_vm0, %v364_v61, %v366_v15  ;;  %v280_v61 = vrot.slane %v132_v36, 7  ;;  %v5036_v44 = vsel %vm255_vm0, %v368_v50, %v370_v42  ;;  %v279_v46 = vsel %vm255_vm0, %v276_v17, %v278_v40 }
  0x76   :  { %v5011_v53 = vsub.f32 %v4985_v9, %v5002_v60  ;;  %v648_v9 = vadd.f32 %v584_v0, %v4999_v41  ;;  %7171 = vst [vmem:[#allocation27_spill] sm:$0xff] %v5036_v44  ;;  %v764_v0 = vadd.f32 %v700_v7, %v277_v43  ;;  %v5044_v1 = vsub.f32 %v180_v28, %v5036_v44  ;;  %v133_v28 = vld [vmem:[#allocation3 + $0x70] sm:$0xff] }
  0x78   :  { %1224 = vmatmul.bf16.gmra.mxu3 %v682_v48  ;;  %v585_v52 = vmul.f32 %v4770_v31, %v5011_v53  ;;  %1104 = vmatmul.bf16.gmra.mxu0 %v658_v54  ;;  %v985_v48 = vpack.c.bf16 %v927_v26, %v926_v4  ;;  %v281_v54 = vsel %vm255_vm0, %v278_v40, %v280_v61  ;;  %v282_v40 = vrot.slane %v133_v28, 7 }
  0x79   :  { %1570 = vmatmul.bf16.gmra.mxu2 %v984_v39  ;;  %v5033_v39 = vsel %vm255_vm0, %v366_v15, %v368_v50  ;;  %7172 = vst [vmem:[#allocation28_spill] sm:$0xff] %v5044_v1  ;;  %v471_v15 = vsub.f32 %v131_v58, %v279_v46  ;;  %v472_v19 = vsub.f32 %v132_v36, %v281_v54  ;;  %v374_v50 = vrot.slane %v5014_v3, 7 }
  0x7a   :  { %v649_v13 = vadd.f32 %v585_v52, %v5002_v60  ;;  %v5041_v34 = vsub.f32 %v179_v63, %v5033_v39  ;;  %v659_v52 = vpack.c.bf16 %v601_v33, %v600_v5  ;;  %v587_v17 = vmul.f32 %v4770_v31, %v5044_v1  ;;  %v181_v63 = vld [vmem:[#allocation3 + $0x1f0] sm:$0xff] }
  0x7b   :  { %1337 = vmatmul.bf16.gmra.mxu1 %v821_v38  ;;  %v763_v38 = vadd.f32 %v699_v37, %v275_v10  ;;  %v864_v10 = vmul.f32 %v4775_v32, %v471_v15  ;;  %v865_v43 = vmul.f32 %v4775_v32, %v472_v19  ;;  %v538_v36 = vmul.f32 %v4770_v31, %v471_v15 }
  0x7c   :  { %v683_v35 = vpack.c.bf16 %v649_v13, %v648_v9  ;;  %v586_v9 = vmul.f32 %v4770_v31, %v5041_v34  ;;  %v651_v58 = vadd.f32 %v587_v17, %v5036_v44  ;;  %v539_v27 = vmul.f32 %v4770_v31, %v472_v19 }
  0x7d   :  { %v822_v55 = vpack.c.bf16 %v764_v0, %v763_v38  ;;  %v928_v57 = vadd.f32 %v864_v10, %v279_v46  ;;  %v929_v4 = vadd.f32 %v865_v43, %v281_v54  ;;  %v372_v26 = vrot.slane %v181_v63, 7 }
  0x7e   :  { %v650_v13 = vadd.f32 %v586_v9, %v5033_v39  ;;  %v284_v37 = vrot.slane %v5023_v62, 7  ;;  %v701_v7 = vmul.f32 %v4800_v47, %v471_v15  ;;  %v702_v5 = vmul.f32 %v4800_v47, %v472_v19 }
  0x7f   :  { %v602_v33 = vadd.f32 %v538_v36, %v279_v46  ;;  %v986_v38 = vpack.c.bf16 %v929_v4, %v928_v57  ;;  %v5061_v0 = vsel %vm255_vm0, %v370_v42, %v372_v26  ;;  %v135_v36 = vld [vmem:[#allocation3 + $0x80] sm:$0xff] }
  0x80   :  { %v285_v9 = vsel %vm255_vm0, %v282_v40, %v284_v37  ;;  %v765_v17 = vadd.f32 %v701_v7, %v279_v46  ;;  %v766_v10 = vadd.f32 %v702_v5, %v281_v54  ;;  %v5069_v15 = vsub.f32 %v181_v63, %v5061_v0  ;;  %v185_v5 = vld [vmem:[#allocation2 + $0x2] sm:$0x1] }
  0x88   :  { %1229 = vmatmul.bf16.gmra.mxu3 %v683_v35  ;;  %1109 = vmatmul.bf16.gmra.mxu0 %v659_v52  ;;  %v603_v35 = vadd.f32 %v539_v27, %v281_v54  ;;  %v5064_v52 = vsel %vm255_vm0, %v372_v26, %v374_v50  ;;  %v136_v27 = vld [vmem:[#allocation3 + $0x88] sm:$0xff]  ;;  %v286_v50 = vrot.slane %v135_v36, 7 }
  0x89   :  { %1575 = vmatmul.bf16.gmra.mxu2 %v985_v48  ;;  %v684_v48 = vpack.c.bf16 %v651_v58, %v650_v13  ;;  %v5073_v43 = vsub.f32 %v5014_v3, %v5064_v52  ;;  %v474_v13 = vsub.f32 %v5023_v62, %v285_v9  ;;  %v823_v58 = vpack.c.bf16 %v766_v10, %v765_v17 }
  0x8a   :  { %v660_v19 = vpack.c.bf16 %v603_v35, %v602_v33  ;;  %v442_v10 = vsel %vm255_vm0, %v185_v5, %v286_v50 }
  0x8b   :  { %1342 = vmatmul.bf16.gmra.mxu1 %v822_v55  ;;  %v283_v55 = vsel %vm255_vm0, %v280_v61, %v282_v40  ;;  %v588_v61 = vmul.f32 %v4770_v31, %v5069_v15  ;;  %v589_v46 = vmul.f32 %v4770_v31, %v5073_v43  ;;  %v867_v63 = vmul.f32 %v4775_v32, %v474_v13 }
  0x8c   :  { %v473_v42 = vsub.f32 %v133_v28, %v283_v55  ;;  %v541_v28 = vmul.f32 %v4770_v31, %v474_v13  ;;  %v287_v40 = vrot.slane %v136_v27, 7  ;;  %v704_v7 = vmul.f32 %v4800_v47, %v474_v13 }
  0x8d   :  { %v652_v62 = vadd.f32 %v588_v61, %v5061_v0  ;;  %v653_v57 = vadd.f32 %v589_v46, %v5064_v52  ;;  %v931_v26 = vadd.f32 %v867_v63, %v285_v9  ;;  %v475_v46 = vsub.f32 %v135_v36, %v442_v10 }
  0x8e   :  { %v866_v54 = vmul.f32 %v4775_v32, %v473_v42  ;;  %v540_v3 = vmul.f32 %v4770_v31, %v473_v42  ;;  %v703_v37 = vmul.f32 %v4800_v47, %v473_v42  ;;  %v605_v35 = vadd.f32 %v541_v28, %v285_v9 }
  0x8f   :  { %v288_v17 = vsel %vm255_vm0, %v286_v50, %v287_v40  ;;  %v737_v42 = vmul.f32 %v4800_v47, %v4764_v29  ;;  %v738_v13 = vmul.f32 %v4800_v47, %v4768_v30 }
  0x90   :  { %v930_v4 = vadd.f32 %v866_v54, %v283_v55  ;;  %v604_v33 = vadd.f32 %v540_v3, %v283_v55  ;;  %v476_v54 = vsub.f32 %v136_v27, %v288_v17  ;;  %v868_v3 = vmul.f32 %v4775_v32, %v475_v46 }
  0x91   :  { %v801_v27 = vadd.f32 %v737_v42, %v4747_v23 }
  0x92   :  { %v661_v61 = vpack.c.bf16 %v605_v35, %v604_v33  ;;  %v869_v28 = vmul.f32 %v4775_v32, %v476_v54  ;;  %v543_v36 = vmul.f32 %v4770_v31, %v476_v54  ;;  %v706_v5 = vmul.f32 %v4800_v47, %v476_v54 }
  0x94   :  { %v607_v35 = vadd.f32 %v543_v36, %v288_v17  ;;  %v139_v36 = vld [vmem:[#allocation3 + $0xa0] sm:$0xff] }
  0x98   :  { %1234 = vmatmul.bf16.gmra.mxu3 %v684_v48  ;;  %1114 = vmatmul.bf16.gmra.mxu0 %v660_v19  ;;  %v685_v48 = vpack.c.bf16 %v653_v57, %v652_v62  ;;  %v767_v19 = vadd.f32 %v703_v37, %v283_v55  ;;  %v137_v55 = vld [vmem:[#allocation3 + $0x90] sm:$0xff]  ;;  %v542_v62 = vmul.f32 %v4770_v31, %v475_v46 }
  0x99   :  { %1580 = vmatmul.bf16.gmra.mxu2 %v986_v38  ;;  %v987_v38 = vpack.c.bf16 %v931_v26, %v930_v4  ;;  %v802_v57 = vadd.f32 %v738_v13, %v4744_v22  ;;  %v932_v4 = vadd.f32 %v868_v3, %v442_v10  ;;  %v933_v26 = vadd.f32 %v869_v28, %v288_v17 }
  0x9a   :  { %v289_v50 = vrot.slane %v137_v55, 7  ;;  %v606_v33 = vadd.f32 %v542_v62, %v442_v10  ;;  %v739_v62 = vmul.f32 %v4800_v47, %v4849_v14 }
  0x9b   :  { %1347 = vmatmul.bf16.gmra.mxu1 %v823_v58  ;;  %v768_v58 = vadd.f32 %v704_v7, %v285_v9  ;;  %v138_v9 = vld [vmem:[#allocation3 + $0x98] sm:$0xff]  ;;  %v705_v7 = vmul.f32 %v4800_v47, %v475_v46 }
  0x9c   :  { %v291_v37 = vrot.slane %v138_v9, 7  ;;  %v662_v42 = vpack.c.bf16 %v607_v35, %v606_v33 }
  0x9d   :  { %v824_v63 = vpack.c.bf16 %v768_v58, %v767_v19  ;;  %v290_v19 = vsel %vm255_vm0, %v287_v40, %v289_v50 }
  0x9e   :  { %v292_v58 = vsel %vm255_vm0, %v289_v50, %v291_v37  ;;  %v477_v13 = vsub.f32 %v137_v55, %v290_v19  ;;  %v5110_v55 = vld [vmem:[#allocation3 + $0xa8] sm:$0xff] }
  0x9f   :  { %v478_v3 = vsub.f32 %v138_v9, %v292_v58  ;;  %v5112_v9 = vld [vmem:[#allocation3 + $0xb8] sm:$0xff] }
  0xa0   :  { %450 = vst [vmem:[#allocation2 - $0x5] sm:$0x80] %v5112_v9 }
  0xa1   :  { %v545_v50 = vmul.f32 %v4770_v31, %v478_v3 }
  0xa8   :  { %1239 = vmatmul.bf16.gmra.mxu3 %v685_v48  ;;  %1119 = vmatmul.bf16.gmra.mxu0 %v661_v61  ;;  %v841_v48 = vpack.c.bf16 %v802_v57, %v801_v27  ;;  %v769_v61 = vadd.f32 %v705_v7, %v442_v10  ;;  %v740_v10 = vmul.f32 %v4800_v47, %v4853_v20  ;;  %v293_v57 = vrot.slane %v139_v36, 7 }
  0xa9   :  { %1585 = vmatmul.bf16.gmra.mxu2 %v987_v38  ;;  %v988_v38 = vpack.c.bf16 %v933_v26, %v932_v4  ;;  %v871_v27 = vmul.f32 %v4775_v32, %v478_v3  ;;  %v295_v4 = vrot.slane %v5110_v55, 7  ;;  %v544_v26 = vmul.f32 %v4770_v31, %v477_v13 }
  0xaa   :  { %v803_v7 = vadd.f32 %v739_v62, %v4828_v11 }
  0xab   :  { %1352 = vmatmul.bf16.gmra.mxu1 %v824_v63  ;;  %v770_v63 = vadd.f32 %v706_v5, %v288_v17  ;;  %v870_v17 = vmul.f32 %v4775_v32, %v477_v13  ;;  %v804_v5 = vadd.f32 %v740_v10, %v4833_v12  ;;  %v935_v35 = vadd.f32 %v871_v27, %v292_v58 }
  0xac   :  { %v5126_v62 = vsel %vm255_vm0, %v293_v57, %v295_v4  ;;  %v608_v10 = vadd.f32 %v544_v26, %v290_v19 }
  0xad   :  { %v825_v22 = vpack.c.bf16 %v770_v63, %v769_v61  ;;  %v934_v33 = vadd.f32 %v870_v17, %v290_v19  ;;  %v708_v61 = vmul.f32 %v4800_v47, %v478_v3  ;;  %v609_v17 = vadd.f32 %v545_v50, %v292_v58 }
  0xaf   :  { %v772_v14 = vadd.f32 %v708_v61, %v292_v58  ;;  %v663_v26 = vpack.c.bf16 %v609_v17, %v608_v10 }
  0xb5   :  { %v1085_v28 = vpop.f32.mrf.mxu0 }
  0xb8   :  { %1437 = vmatmul.bf16.vlgmr.msrb.gmra.mxu3 %v841_v48  ;;  %v1318_v46 = vpop.f32.mrf.mxu1  ;;  %1124 = vmatmul.bf16.gmra.mxu0 %v662_v42  ;;  %v5123_v42 = vsel %vm255_vm0, %v291_v37, %v293_v57  ;;  %v141_v57 = vld [vmem:[#allocation3 + $0xb0] sm:$0xff] }
  0xb9   :  { %1590 = vmatmul.bf16.gmra.mxu2 %v988_v38  ;;  %v707_v38 = vmul.f32 %v4800_v47, %v477_v13  ;;  %v989_v13 = vpack.c.bf16 %v935_v35, %v934_v33  ;;  %v479_v37 = vsub.f32 %v139_v36, %v5123_v42  ;;  %v297_v58 = vrot.slane %v141_v57, 7 }
  0xbb   :  { %v1205_v23 = vpop.f32.mrf.mxu3  ;;  %1357 = vmatmul.bf16.gmra.mxu1 %v825_v22  ;;  %v771_v3 = vadd.f32 %v707_v38, %v290_v19  ;;  %v872_v19 = vmul.f32 %v4775_v32, %v479_v37 }
  0xbc   :  { %v1551_v54 = vpop.f32.mrf.mxu2 }
  0xbd   :  { %v3463_v40 = vmul.f32 -1.442695, %v1551_v54  ;;  %v1087_v48 = vpop.f32.mrf.mxu0 }
  0xbe   :  { %v3554_v22 = vpack.c.bf16 %v1087_v48, %v1085_v28  ;;  %v842_v48 = vpack.c.bf16 %v804_v5, %v803_v7  ;;  %v299_v7 = vrot.slane %v5112_v9, 7 }
  0xbf   :  { %4164 = vpow2.f32 %v3463_v40 }
  0xc0   :  { %v1320_v63 = vpop.f32.mrf.mxu1  ;;  %3555 = vst [vmem:[#allocation13] sm:$0xff] %v3554_v22  }
  0xc1   :  { %v3714_v20 = vpack.c.bf16 %v1320_v63, %v1318_v46  ;;  %v480_v46 = vsub.f32 %v5110_v55, %v5126_v62 }
  0xc3   :  { %v1207_v54 = vpop.f32.mrf.mxu3  ;;  %3715 = vst [vmem:[#allocation15] sm:$0xff] %v3714_v20   ;;  %v742_v20 = vmul.f32 %v4800_v47, %v4902_v45  ;;  %v873_v36 = vmul.f32 %v4775_v32, %v480_v46 }
  0xc4   :  { %v1553_v40 = vpop.f32.mrf.mxu2  ;;  %v3674_v12 = vpack.c.bf16 %v1207_v54, %v1205_v23  ;;  %v741_v23 = vmul.f32 %v4800_v47, %v4898_v24 }
  0xc5   :  { %v4165_v27 = vpop.eup %4164  ;;  %v3464_v28 = vmul.f32 -1.442695, %v1553_v40  ;;  %v1090_v50 = vpop.f32.mrf.mxu0  ;;  %v806_v54 = vadd.f32 %v742_v20, %v4890_v8  ;;  %v5149_v40 = vsel %vm255_vm0, %v295_v4, %v297_v58  ;;  %v937_v17 = vadd.f32 %v873_v36, %v5126_v62 }
  0xc6   :  { %v5128_v11 = vadd.f32 1.0, %v4165_v27  ;;  %4054 = vst [vmem:[#allocation13 + $0xc0] sm:$0xff] %v3674_v12   ;;  %v826_v12 = vpack.c.bf16 %v772_v14, %v771_v3  ;;  %v805_v38 = vadd.f32 %v741_v23, %v4887_v6  ;;  %v936_v14 = vadd.f32 %v872_v19, %v5123_v42 }
  0xc7   :  { %4166 = vpow2.f32 %v3464_v28  ;;  %v5155_v27 = vsel %vm255_vm0, %v297_v58, %v299_v7  ;;  %v546_v28 = vmul.f32 %v4770_v31, %v479_v37  ;;  %v5161_v4 = vsub.f32 %v141_v57, %v5149_v40 }
  0xc8   :  { %4168 = vrcp.f32 %v5128_v11  ;;  %1442 = vmatmul.bf16.gmra.mxu3 %v842_v48  ;;  %v1323_v55 = vpop.f32.mrf.mxu1  ;;  %1129 = vmatmul.bf16.gmra.mxu0 %v663_v26  ;;  %v547_v48 = vmul.f32 %v4770_v31, %v480_v46  ;;  %v5165_v23 = vsub.f32 %v5112_v9, %v5155_v27  ;;  %v709_v20 = vmul.f32 %v4800_v47, %v479_v37 }
  0xc9   :  { %1595 = vmatmul.bf16.gmra.mxu2 %v989_v13  ;;  %v710_v19 = vmul.f32 %v4800_v47, %v480_v46  ;;  %v990_v58 = vpack.c.bf16 %v937_v17, %v936_v14  ;;  %v743_v31 = vmul.f32 %v4800_v47, %v4932_v18  ;;  %v744_v46 = vmul.f32 %v4800_v47, %v4936_v2 }
  0xca   :  { %v611_v9 = vadd.f32 %v547_v48, %v5126_v62  ;;  %v773_v17 = vadd.f32 %v709_v20, %v5123_v42  ;;  %v2234_v48 = vand.u32 2147483648, %v5128_v11  ;;  %vm2228_vm2 = vweird.f32 %v5128_v11 }
  0xcb   :  { %v1210_v5 = vpop.f32.mrf.mxu3  ;;  %1362 = vmatmul.bf16.gmra.mxu1 %v826_v12  ;;  %v843_v12 = vpack.c.bf16 %v806_v54, %v805_v38  ;;  %v874_v38 = vmul.f32 %v4775_v32, %v5161_v4 }
  0xcc   :  { %v1556_v33 = vpop.f32.mrf.mxu2 }
  0xcd   :  { %v4167_v35 = vpop.eup %4166  ;;  %v3465_v22 = vmul.f32 -1.442695, %v1556_v33  ;;  %v1092_v3 = vpop.f32.mrf.mxu0 }
  0xce   :  { %v5142_v61 = vpop.eup %4168  ;;  %v5144_v63 = vadd.f32 1.0, %v4167_v35  ;;  %v3559_v26 = vpack.c.bf16 %v1092_v3, %v1090_v50  ;;  %v610_v35 = vadd.f32 %v546_v28, %v5123_v42  ;;  %v774_v28 = vadd.f32 %v710_v19, %v5126_v62 }
  0xcf   :  { %v2224_v10 = vmul.f32 %v5142_v61, %v5128_v11  ;;  %4170 = vpow2.f32 %v3465_v22  ;;  %vm2229_vm1 = vweird.f32 %v5142_v61  ;;  %v5194_v62 = vadd.f32 %v743_v31, %v4924_v21 }
  0xd0   :  { %4172 = vrcp.f32 %v5144_v63  ;;  %v1325_v36 = vpop.f32.mrf.mxu1  ;;  %4031 = vst [vmem:[#allocation13 + $0x8] sm:$0xff] %v3559_v26   ;;  %v2247_v20 = vand.u32 2147483647, %v5144_v63  ;;  %v2249_v19 = vand.u32 2147483648, %v5144_v63  ;;  %vm5201_vm3 = vmor %vm2228_vm2, %vm2229_vm1  ;;  %vm2243_vm6 = vweird.f32 %v5144_v63 }
  0xd1   :  { %v2225_v13 = vsub.f32 1.0, %v2224_v10  ;;  %v3719_v50 = vpack.c.bf16 %v1325_v36, %v1323_v55  ;;  %v875_v55 = vmul.f32 %v4775_v32, %v5165_v23  ;;  %v664_v32 = vpack.c.bf16 %v611_v9, %v610_v35 }
  0xd2   :  { %v827_v36 = vpack.c.bf16 %v774_v28, %v773_v17  ;;  %vm2248_vm8 = vcmp.eq.f32.partialorder %v2247_v20, 8.507059e+37 }
  0xd3   :  { %v2226_v7 = vmul.f32 %v5142_v61, %v2225_v13  ;;  %v1212_v33 = vpop.f32.mrf.mxu3  ;;  %4062 = vst [vmem:[#allocation15 + $0x8] sm:$0xff] %v3719_v50   ;;  %v5187_v13 = vld [vmem:[#allocation3 + $0xc0] sm:$0xff]  ;;  %v186_v50 = vld [vmem:[#allocation2 + $0x3] sm:$0x1]  ;;  %v5219_v17 = vadd.f32 %v875_v55, %v5155_v27 }
  0xd4   :  { %v1558_v57 = vpop.f32.mrf.mxu2  ;;  %v3679_v37 = vpack.c.bf16 %v1212_v33, %v1210_v5  ;;  %v2232_v5 = vand.u32 2147483647, %v5128_v11  ;;  %v301_v33 = vrot.slane %v5187_v13, 7 }
  0xd5   :  { %v4171_v22 = vpop.eup %4170  ;;  %v3466_v10 = vmul.f32 -1.442695, %v1558_v57  ;;  %v2227_v3 = vadd.f32 %v5142_v61, %v2226_v7  ;;  %v1095_v26 = vpop.f32.mrf.mxu0  ;;  %v5198_v7 = vld [vmem:[#allocation3 + $0xc8] sm:$0xff]  ;;  %v5236_v57 = vld [vmem:[#allocation6] ss:$0 sm:$0xff] }
  0xd6   :  { %v4173_v54 = vpop.eup %4172  ;;  %v5178_v14 = vadd.f32 1.0, %v4171_v22  ;;  %4055 = vst [vmem:[#allocation13 + $0xc8] sm:$0xff] %v3679_v37   ;;  %vm5214_vm5 = vcmp.eq.f32.partialorder %v2232_v5, 8.507059e+37  ;;  %v2235_v22 = vor.u32 1.1754944e-38, %v2234_v48  ;;  %v5229_v55 = vsel %vm255_vm0, %v186_v50, %v301_v33 }
  0xd7   :  { %v2239_v47 = vmul.f32 %v4173_v54, %v5144_v63  ;;  %4174 = vpow2.f32 %v3466_v10  ;;  %vm2244_vm4 = vweird.f32 %v4173_v54  ;;  %v2231_v35 = vsel %vm5201_vm3, %v5142_v61, %v2227_v3 }
  0xd8   :  { %4176 = vrcp.f32 %v5178_v14  ;;  %1447 = vmatmul.bf16.gmra.mxu3 %v843_v12  ;;  %v5206_v12 = vadd.f32 %v744_v46, %v4927_v59  ;;  %v1328_v31 = vpop.f32.mrf.mxu1  ;;  %1134 = vmatmul.bf16.gmra.mxu0 %v664_v32  ;;  %vm2245_vm7 = vmor %vm2243_vm6, %vm2244_vm4  ;;  %v2250_v61 = vor.u32 1.1754944e-38, %v2249_v19  ;;  %v2236_v48 = vsel %vm5214_vm5, %v2235_v22, %v2231_v35  ;;  %v5252_v22 = vld [vmem:[%s7147_s2] ss:$0 sm:$0xff] }
  0xd9   :  { %v2240_v42 = vsub.f32 1.0, %v2239_v47  ;;  %1600 = vmatmul.bf16.gmra.mxu2 %v990_v58  ;;  %v5209_v58 = vadd.f32 %v874_v38, %v5149_v40  ;;  %v7161_v47 = vrot.slane %v5198_v7, 7  ;;  %v548_v20 = vmul.f32 %v5236_v57, %v5161_v4 }
  0xda   :  { %v549_v19 = vmul.f32 %v5236_v57, %v5165_v23  ;;  %v844_v35 = vpack.c.bf16 %v5206_v12, %v5194_v62  ;;  %v745_v62 = vmul.f32 %v5252_v22, %v4970_v56  ;;  %vm2258_vm10 = vweird.f32 %v5178_v14 }
  0xdb   :  { %v2241_v11 = vmul.f32 %v4173_v54, %v2240_v42  ;;  %v1215_v37 = vpop.f32.mrf.mxu3  ;;  %1367 = vmatmul.bf16.gmra.mxu1 %v827_v36 }
  0xdc   :  { %v1561_v10 = vpop.f32.mrf.mxu2 }
  0xdd   :  { %v4175_v46 = vpop.eup %4174  ;;  %v2242_v38 = vadd.f32 %v4173_v54, %v2241_v11  ;;  %v3467_v28 = vmul.f32 -1.442695, %v1561_v10  ;;  %v1097_v50 = vpop.f32.mrf.mxu0  ;;  %v711_v10 = vmul.f32 %v5252_v22, %v5161_v4 }
  0xde   :  { %v5223_v42 = vpop.eup %4176  ;;  %v5226_v5 = vadd.f32 1.0, %v4175_v46  ;;  %v3564_v9 = vpack.c.bf16 %v1097_v50, %v1095_v26  ;;  %v712_v46 = vmul.f32 %v5252_v22, %v5165_v23  ;;  %v5265_v26 = vsub.f32 %v5187_v13, %v5229_v55 }
  0xdf   :  { %v2246_v3 = vsel %vm2245_vm7, %v4173_v54, %v2242_v38  ;;  %v2254_v63 = vmul.f32 %v5223_v42, %v5178_v14  ;;  %4178 = vpow2.f32 %v3467_v28  ;;  %v5245_v54 = vsel %vm255_vm0, %v301_v33, %v7161_v47 }
  0xe0   :  { %v2251_v32 = vsel %vm2248_vm8, %v2250_v61, %v2246_v3  ;;  %4180 = vrcp.f32 %v5226_v5  ;;  %v991_v33 = vpack.c.bf16 %v5219_v17, %v5209_v58  ;;  %v1330_v28 = vpop.f32.mrf.mxu1  ;;  %4032 = vst [vmem:[#allocation13 + $0x10] sm:$0xff] %v3564_v9   ;;  %v5269_v23 = vsub.f32 %v5198_v7, %v5245_v54  ;;  %v5288_v9 = vld [vmem:[%s7148_s3] ss:$0 sm:$0xff] }
  0xe1   :  { %v3874_v36 = vpack.c.bf16 %v2251_v32, %v2236_v48  ;;  %v2255_v11 = vsub.f32 1.0, %v2254_v63  ;;  %v3724_v4 = vpack.c.bf16 %v1330_v28, %v1328_v31  ;;  %v612_v48 = vadd.f32 %v548_v20, %v5149_v40 }
  0xe2   :  { %v613_v58 = vadd.f32 %v549_v19, %v5155_v27  ;;  %v2262_v3 = vand.u32 2147483647, %v5178_v14  ;;  %v746_v13 = vmul.f32 %v5252_v22, %v4974_v25  ;;  %v775_v50 = vadd.f32 %v711_v10, %v5149_v40 }
  0xe3   :  { %3875 = vst [vmem:[#allocation12] sm:$0xff] %v3874_v36   ;;  %v2256_v38 = vmul.f32 %v5223_v42, %v2255_v11  ;;  %v1217_v12 = vpop.f32.mrf.mxu3  ;;  %v2264_v11 = vand.u32 2147483648, %v5178_v14  ;;  %v776_v20 = vadd.f32 %v712_v46, %v5155_v27  ;;  %vm2259_vm9 = vweird.f32 %v5223_v42 }
  0xe4   :  { %v1563_v61 = vpop.f32.mrf.mxu2  ;;  %v3684_v63 = vpack.c.bf16 %v1217_v12, %v1215_v37  ;;  %4063 = vst [vmem:[#allocation15 + $0x10] sm:$0xff] %v3724_v4   ;;  %v876_v40 = vmul.f32 %v5288_v9, %v5265_v26  ;;  %v877_v27 = vmul.f32 %v5288_v9, %v5269_v23  ;;  %v665_v10 = vpack.c.bf16 %v613_v58, %v612_v48  ;;  %vm5295_vm11 = vmor %vm2258_vm10, %vm2259_vm9 }
  0xe5   :  { %v4179_v17 = vpop.eup %4178  ;;  %v3468_v32 = vmul.f32 -1.442695, %v1563_v61  ;;  %v2257_v19 = vadd.f32 %v5223_v42, %v2256_v38  ;;  %v1100_v38 = vpop.f32.mrf.mxu0  ;;  %v2277_v12 = vand.u32 2147483647, %v5226_v5  ;;  %v2279_v61 = vand.u32 2147483648, %v5226_v5 }
  0xe6   :  { %v4181_v36 = vpop.eup %4180  ;;  %v5277_v31 = vadd.f32 1.0, %v4179_v17  ;;  %4056 = vst [vmem:[#allocation13 + $0xd0] sm:$0xff] %v3684_v63   ;;  %v5302_v4 = vadd.f32 %v745_v62, %v4965_v51  ;;  %v828_v17 = vpack.c.bf16 %v776_v20, %v775_v50  ;;  %v145_v63 = vld [vmem:[#allocation3 + $0xd0] sm:$0xff]  ;;  %vm2263_vm13 = vcmp.eq.f32.partialorder %v2262_v3, 8.507059e+37  ;;  %v5316_v50 = vld [vmem:[#allocation3 + $0xd8] sm:$0xff] }
  0xe7   :  { %v2269_v37 = vmul.f32 %v4181_v36, %v5226_v5  ;;  %4182 = vpow2.f32 %v3468_v32  ;;  %v2261_v14 = vsel %vm5295_vm11, %v5223_v42, %v2257_v19  ;;  %vm2274_vm12 = vweird.f32 %v4181_v36 }
  0xe8   :  { %4184 = vrcp.f32 %v5277_v31  ;;  %1452 = vmatmul.bf16.gmra.mxu3 %v844_v35  ;;  %v1333_v48 = vpop.f32.mrf.mxu1  ;;  %v2265_v58 = vor.u32 1.1754944e-38, %v2264_v11  ;;  %v5311_v47 = vadd.f32 %v876_v40, %v5229_v55  ;;  %v5314_v62 = vadd.f32 %v877_v27, %v5245_v54  ;;  %1139 = vmatmul.bf16.gmra.mxu0 %v665_v10 }
  0xe9   :  { %v2270_v46 = vsub.f32 1.0, %v2269_v37  ;;  %1605 = vmatmul.bf16.gmra.mxu2 %v991_v33  ;;  %v5308_v33 = vadd.f32 %v746_v13, %v4962_v49  ;;  %vm2273_vm14 = vweird.f32 %v5226_v5  ;;  %v304_v19 = vrot.slane %v145_v63, 7 }
  0xea   :  { %v2266_v3 = vsel %vm2263_vm13, %v2265_v58, %v2261_v14  ;;  %vm2275_vm15 = vmor %vm2273_vm14, %vm2274_vm12  ;;  %vm2278_vm1 = vcmp.eq.f32.partialorder %v2277_v12, 8.507059e+37  ;;  %v2280_v11 = vor.u32 1.1754944e-38, %v2279_v61  ;;  %v306_v28 = vrot.slane %v5316_v50, 7 }
  0xeb   :  { %v2271_v35 = vmul.f32 %v4181_v36, %v2270_v46  ;;  %v1220_v32 = vpop.f32.mrf.mxu3  ;;  %1372 = vmatmul.bf16.gmra.mxu1 %v828_v17  ;;  %v550_v14 = vmul.f32 %v5236_v57, %v5265_v26  ;;  %v551_v12 = vmul.f32 %v5236_v57, %v5269_v23  ;;  %vm2288_vm3 = vweird.f32 %v5277_v31 }
  0xec   :  { %v1566_v37 = vpop.f32.mrf.mxu2 }
  0xed   :  { %v4183_v42 = vpop.eup %4182  ;;  %v2272_v20 = vadd.f32 %v4181_v36, %v2271_v35  ;;  %v3469_v13 = vmul.f32 -1.442695, %v1566_v37  ;;  %v1102_v58 = vpop.f32.mrf.mxu0  ;;  %v845_v37 = vpack.c.bf16 %v5308_v33, %v5302_v4  ;;  %v714_v4 = vmul.f32 %v5252_v22, %v5269_v23 }
  0xee   :  { %v5319_v46 = vpop.eup %4184  ;;  %v5322_v40 = vadd.f32 1.0, %v4183_v42  ;;  %v992_v42 = vpack.c.bf16 %v5314_v62, %v5311_v47  ;;  %v614_v62 = vadd.f32 %v550_v14, %v5229_v55 }
  0xef   :  { %v2276_v27 = vsel %vm2275_vm15, %v4181_v36, %v2272_v20  ;;  %v2284_v10 = vmul.f32 %v5319_v46, %v5277_v31  ;;  %4186 = vpow2.f32 %v3469_v13  ;;  %v7179_v36 = vrot.slane %v5198_v7, 7 }
  0xf0   :  { %v2281_v5 = vsel %vm2278_vm1, %v2280_v11, %v2276_v27  ;;  %4188 = vrcp.f32 %v5322_v40  ;;  %v3569_v20 = vpack.c.bf16 %v1102_v58, %v1100_v38  ;;  %v713_v13 = vmul.f32 %v5252_v22, %v5265_v26  ;;  %v1335_v11 = vpop.f32.mrf.mxu1 }
  0xf1   :  { %v3879_v61 = vpack.c.bf16 %v2281_v5, %v2266_v3  ;;  %v2285_v35 = vsub.f32 1.0, %v2284_v10  ;;  %v5335_v17 = vsel %vm255_vm0, %v7179_v36, %v304_v19  ;;  %v747_v7 = vmul.f32 %v5252_v22, %v5007_v16 }
  0xf2   :  { %v5349_v27 = vsel %vm255_vm0, %v304_v19, %v306_v28  ;;  %4033 = vst [vmem:[#allocation13 + $0x18] sm:$0xff] %v3569_v20   ;;  %v3729_v33 = vpack.c.bf16 %v1335_v11, %v1333_v48  ;;  %v5354_v26 = vsub.f32 %v145_v63, %v5335_v17  ;;  %v615_v10 = vadd.f32 %v551_v12, %v5245_v54 }
  0xf3   :  { %4093 = vst [vmem:[#allocation12 + $0x8] sm:$0xff] %v3879_v61   ;;  %v2286_v3 = vmul.f32 %v5319_v46, %v2285_v35  ;;  %v1222_v47 = vpop.f32.mrf.mxu3  ;;  %v2292_v61 = vand.u32 2147483647, %v5277_v31  ;;  %v748_v58 = vmul.f32 %v5252_v22, %v5011_v53  ;;  %v5365_v63 = vsub.f32 %v5316_v50, %v5349_v27 }
  0xf4   :  { %v1568_v38 = vpop.f32.mrf.mxu2  ;;  %v3689_v35 = vpack.c.bf16 %v1222_v47, %v1220_v32  ;;  %4064 = vst [vmem:[#allocation15 + $0x18] sm:$0xff] %v3729_v33   ;;  %v777_v48 = vadd.f32 %v713_v13, %v5229_v55  ;;  %v778_v14 = vadd.f32 %v714_v4, %v5245_v54  ;;  %vm2289_vm2 = vweird.f32 %v5319_v46  ;;  %v5412_v4 = vld [vmem:[#allocation3 + $0xf8] sm:$0xff] }
  0xf5   :  { %v4187_v5 = vpop.eup %4186  ;;  %v3470_v19 = vmul.f32 -1.442695, %v1568_v38  ;;  %v2287_v12 = vadd.f32 %v5319_v46, %v2286_v3  ;;  %v2294_v20 = vand.u32 2147483648, %v5277_v31  ;;  %v878_v11 = vmul.f32 %v5288_v9, %v5354_v26  ;;  %v1105_v3 = vpop.f32.mrf.mxu0  ;;  %vm5381_vm4 = vmor %vm2288_vm3, %vm2289_vm2  ;;  %451 = vst [vmem:[#allocation2 - $0x4] sm:$0x80] %v5412_v4 }
  0xf6   :  { %v4189_v23 = vpop.eup %4188  ;;  %v5361_v36 = vadd.f32 1.0, %v4187_v5  ;;  %4057 = vst [vmem:[#allocation13 + $0xd8] sm:$0xff] %v3689_v35   ;;  %v666_v47 = vpack.c.bf16 %v615_v10, %v614_v62  ;;  %v2307_v54 = vand.u32 2147483647, %v5322_v40  ;;  %v2309_v13 = vand.u32 2147483648, %v5322_v40  ;;  %v147_v5 = vld [vmem:[#allocation3 + $0xe0] sm:$0xff] }
  0xf7   :  { %v2299_v32 = vmul.f32 %v4189_v23, %v5322_v40  ;;  %4190 = vpow2.f32 %v3470_v19  ;;  %v5386_v38 = vadd.f32 %v747_v7, %v4999_v41  ;;  %v879_v31 = vmul.f32 %v5288_v9, %v5365_v63 }
  0xf8   :  { %4192 = vrcp.f32 %v5361_v36  ;;  %1457 = vmatmul.bf16.gmra.mxu3 %v845_v37  ;;  %v829_v33 = vpack.c.bf16 %v778_v14, %v777_v48  ;;  %v2291_v62 = vsel %vm5381_vm4, %v5319_v46, %v2287_v12  ;;  %vm2304_vm5 = vweird.f32 %v4189_v23  ;;  %v1338_v10 = vpop.f32.mrf.mxu1  ;;  %1144 = vmatmul.bf16.gmra.mxu0 %v666_v47  ;;  %v5400_v48 = vld [vmem:[#allocation3 + $0xe8] sm:$0xff] }
  0xf9   :  { %v2300_v55 = vsub.f32 1.0, %v2299_v32  ;;  %1610 = vmatmul.bf16.gmra.mxu2 %v992_v42  ;;  %v5394_v42 = vadd.f32 %v748_v58, %v5002_v60  ;;  %vm2293_vm6 = vcmp.eq.f32.partialorder %v2292_v61, 8.507059e+37  ;;  %v2295_v35 = vor.u32 1.1754944e-38, %v2294_v20 }
  0xfa   :  { %vm2303_vm7 = vweird.f32 %v5322_v40  ;;  %v5398_v32 = vadd.f32 %v878_v11, %v5335_v17  ;;  %vm5402_vm8 = vcmp.eq.f32.partialorder %v2307_v54, 8.507059e+37  ;;  %v2310_v58 = vor.u32 1.1754944e-38, %v2309_v13 }
  0xfb   :  { %v2301_v37 = vmul.f32 %v4189_v23, %v2300_v55  ;;  %v1225_v7 = vpop.f32.mrf.mxu3  ;;  %v2296_v20 = vsel %vm2293_vm6, %v2295_v35, %v2291_v62  ;;  %vm2305_vm9 = vmor %vm2303_vm7, %vm2304_vm5  ;;  %v943_v11 = vadd.f32 %v879_v31, %v5349_v27  ;;  %1377 = vmatmul.bf16.gmra.mxu1 %v829_v33  ;;  %v308_v47 = vrot.slane %v147_v5, 7 }
  0xfc   :  { %v1571_v19 = vpop.f32.mrf.mxu2  ;;  %v7163_v13 = vrot.slane %v5400_v48, 7  ;;  %v552_v31 = vmul.f32 %v5236_v57, %v5354_v26  ;;  %v553_v33 = vmul.f32 %v5236_v57, %v5365_v63  ;;  %vm2318_vm11 = vweird.f32 %v5361_v36 }
  0xfd   :  { %v4191_v46 = vpop.eup %4190  ;;  %v2302_v14 = vadd.f32 %v4189_v23, %v2301_v37  ;;  %v3471_v55 = vmul.f32 -1.442695, %v1571_v19  ;;  %v1107_v19 = vpop.f32.mrf.mxu0  ;;  %v5430_v12 = vsel %vm255_vm0, %v306_v28, %v308_v47 }
  0xfe   :  { %v5406_v61 = vpop.eup %4192  ;;  %v5409_v40 = vadd.f32 1.0, %v4191_v46  ;;  %v846_v46 = vpack.c.bf16 %v5394_v42, %v5386_v38  ;;  %v5442_v50 = vsel %vm255_vm0, %v308_v47, %v7163_v13  ;;  %v617_v42 = vadd.f32 %v553_v33, %v5349_v27 }
  0xff   :  { %v2306_v37 = vsel %vm2305_vm9, %v4189_v23, %v2302_v14  ;;  %v2314_v54 = vmul.f32 %v5406_v61, %v5361_v36  ;;  %4194 = vpow2.f32 %v3471_v55  ;;  %v3574_v14 = vpack.c.bf16 %v1107_v19, %v1105_v3 }
 0x100   :  { %v2311_v62 = vsel %vm5402_vm8, %v2310_v58, %v2306_v37  ;;  %4196 = vrcp.f32 %v5409_v40  ;;  %v715_v58 = vmul.f32 %v5252_v22, %v5354_v26  ;;  %v993_v55 = vpack.c.bf16 %v943_v11, %v5398_v32  ;;  %v1340_v37 = vpop.f32.mrf.mxu1 }
 0x101   :  { %v3884_v23 = vpack.c.bf16 %v2311_v62, %v2296_v20  ;;  %v2315_v35 = vsub.f32 1.0, %v2314_v54  ;;  %v749_v20 = vmul.f32 %v5252_v22, %v5041_v34  ;;  %v750_v54 = vmul.f32 %v5252_v22, %v5044_v1  ;;  %4034 = vst [vmem:[#allocation13 + $0x20] sm:$0xff] %v3574_v14  }
 0x102   :  { %v3734_v38 = vpack.c.bf16 %v1340_v37, %v1338_v10  ;;  %v616_v26 = vadd.f32 %v552_v31, %v5335_v17  ;;  %v716_v32 = vmul.f32 %v5252_v22, %v5365_v63  ;;  %v5450_v1 = vsub.f32 %v147_v5, %v5430_v12 }
 0x103   :  { %4094 = vst [vmem:[#allocation12 + $0x10] sm:$0xff] %v3884_v23   ;;  %v1227_v28 = vpop.f32.mrf.mxu3  ;;  %v2316_v62 = vmul.f32 %v5406_v61, %v2315_v35  ;;  %v5456_v10 = vsub.f32 %v5400_v48, %v5442_v50  ;;  %v779_v31 = vadd.f32 %v715_v58, %v5335_v17  ;;  %v2322_v33 = vand.u32 2147483647, %v5361_v36 }
 0x104   :  { %v1573_v3 = vpop.f32.mrf.mxu2  ;;  %v3694_v23 = vpack.c.bf16 %v1227_v28, %v1225_v7  ;;  %4065 = vst [vmem:[#allocation15 + $0x20] sm:$0xff] %v3734_v38   ;;  %v780_v63 = vadd.f32 %v716_v32, %v5349_v27  ;;  %v2324_v7 = vand.u32 2147483648, %v5361_v36  ;;  %v2337_v5 = vand.u32 2147483647, %v5409_v40 }
 0x105   :  { %v4195_v11 = vpop.eup %4194  ;;  %v3472_v19 = vmul.f32 -1.442695, %v1573_v3  ;;  %v2339_v14 = vand.u32 2147483648, %v5409_v40  ;;  %v667_v37 = vpack.c.bf16 %v617_v42, %v616_v26  ;;  %v2317_v28 = vadd.f32 %v5406_v61, %v2316_v62  ;;  %v1110_v58 = vpop.f32.mrf.mxu0 }
 0x106   :  { %v4197_v47 = vpop.eup %4196  ;;  %v5452_v13 = vadd.f32 1.0, %v4195_v11  ;;  %4058 = vst [vmem:[#allocation13 + $0xe0] sm:$0xff] %v3694_v23   ;;  %vm2319_vm10 = vweird.f32 %v5406_v61  ;;  %v880_v27 = vmul.f32 %v5288_v9, %v5450_v1  ;;  %v5472_v3 = vadd.f32 %v749_v20, %v5033_v39  ;;  %v149_v11 = vld [vmem:[#allocation3 + $0xf0] sm:$0xff] }
 0x107   :  { %v2329_v35 = vmul.f32 %v4197_v47, %v5409_v40  ;;  %4198 = vpow2.f32 %v3472_v19  ;;  %v881_v38 = vmul.f32 %v5288_v9, %v5456_v10  ;;  %v830_v26 = vpack.c.bf16 %v780_v63, %v779_v31  ;;  %vm5485_vm14 = vmor %vm2318_vm11, %vm2319_vm10 }
 0x108   :  { %4200 = vrcp.f32 %v5452_v13  ;;  %1462 = vmatmul.bf16.gmra.mxu3 %v846_v46  ;;  %vm5476_vm12 = vcmp.eq.f32.partialorder %v2322_v33, 8.507059e+37  ;;  %vm2334_vm13 = vweird.f32 %v4197_v47  ;;  %v5481_v46 = vadd.f32 %v750_v54, %v5036_v44  ;;  %1149 = vmatmul.bf16.gmra.mxu0 %v667_v37 }
 0x109   :  { %v2330_v17 = vsub.f32 1.0, %v2329_v35  ;;  %1615 = vmatmul.bf16.gmra.mxu2 %v993_v55  ;;  %v1343_v55 = vpop.f32.mrf.mxu1  ;;  %v2325_v20 = vor.u32 1.1754944e-38, %v2324_v7  ;;  %vm2333_vm15 = vweird.f32 %v5409_v40  ;;  %vm5490_vm1 = vcmp.eq.f32.partialorder %v2337_v5, 8.507059e+37 }
 0x10a   :  { %v2340_v23 = vor.u32 1.1754944e-38, %v2339_v14  ;;  %v2321_v63 = vsel %vm5485_vm14, %v5406_v61, %v2317_v28  ;;  %vm2335_vm2 = vmor %vm2333_vm15, %vm2334_vm13  ;;  %v945_v5 = vadd.f32 %v881_v38, %v5442_v50  ;;  %v312_v14 = vrot.slane %v149_v11, 7 }
 0x10b   :  { %v2331_v32 = vmul.f32 %v4197_v47, %v2330_v17  ;;  %v1230_v19 = vpop.f32.mrf.mxu3  ;;  %v944_v17 = vadd.f32 %v880_v27, %v5430_v12  ;;  %1382 = vmatmul.bf16.gmra.mxu1 %v830_v26  ;;  %v314_v37 = vrot.slane %v5412_v4, 7  ;;  %v554_v28 = vmul.f32 %v5236_v57, %v5450_v1 }
 0x10c   :  { %v1576_v31 = vpop.f32.mrf.mxu2  ;;  %v2326_v27 = vsel %vm5476_vm12, %v2325_v20, %v2321_v63  ;;  %v555_v38 = vmul.f32 %v5236_v57, %v5456_v10  ;;  %v751_v62 = vmul.f32 %v5252_v22, %v5069_v15  ;;  %vm2348_vm4 = vweird.f32 %v5452_v13 }
 0x10d   :  { %v4199_v54 = vpop.eup %4198  ;;  %v2332_v33 = vadd.f32 %v4197_v47, %v2331_v32  ;;  %v3473_v35 = vmul.f32 -1.442695, %v1576_v31  ;;  %v1112_v36 = vpop.f32.mrf.mxu0  ;;  %v847_v31 = vpack.c.bf16 %v5481_v46, %v5472_v3  ;;  %v618_v63 = vadd.f32 %v554_v28, %v5430_v12 }
 0x10e   :  { %v5498_v7 = vpop.eup %4200  ;;  %v5501_v40 = vadd.f32 1.0, %v4199_v54  ;;  %v994_v54 = vpack.c.bf16 %v945_v5, %v944_v17  ;;  %v717_v17 = vmul.f32 %v5252_v22, %v5450_v1  ;;  %v718_v5 = vmul.f32 %v5252_v22, %v5456_v10 }
 0x10f   :  { %v2336_v44 = vsel %vm2335_vm2, %v4197_v47, %v2332_v33  ;;  %v2344_v61 = vmul.f32 %v5498_v7, %v5452_v13  ;;  %4202 = vpow2.f32 %v3473_v35  ;;  %v3579_v33 = vpack.c.bf16 %v1112_v36, %v1110_v58 }
 0x110   :  { %v2341_v32 = vsel %vm5490_vm1, %v2340_v23, %v2336_v44  ;;  %4204 = vrcp.f32 %v5501_v40  ;;  %v7190_v35 = vrot.slane %v5400_v48, 7  ;;  %v2352_v44 = vand.u32 2147483647, %v5452_v13 }
 0x111   :  { %v3889_v26 = vpack.c.bf16 %v2341_v32, %v2326_v27  ;;  %v2345_v47 = vsub.f32 1.0, %v2344_v61  ;;  %v1345_v20 = vpop.f32.mrf.mxu1  ;;  %v5527_v23 = vsel %vm255_vm0, %v312_v14, %v314_v37  ;;  %4035 = vst [vmem:[#allocation13 + $0x28] sm:$0xff] %v3579_v33   ;;  %v619_v48 = vadd.f32 %v555_v38, %v5442_v50 }
 0x112   :  { %v5521_v42 = vsel %vm255_vm0, %v7190_v35, %v312_v14  ;;  %v3739_v58 = vpack.c.bf16 %v1345_v20, %v1343_v55  ;;  %v5543_v55 = vsub.f32 %v5412_v4, %v5527_v23  ;;  %v781_v1 = vadd.f32 %v717_v17, %v5430_v12  ;;  %v5568_v17 = vld [vmem:[#allocation3 + $0x108] sm:$0xff] }
 0x113   :  { %4095 = vst [vmem:[#allocation12 + $0x18] sm:$0xff] %v3889_v26   ;;  %v1232_v3 = vpop.f32.mrf.mxu3  ;;  %v2346_v27 = vmul.f32 %v5498_v7, %v2345_v47  ;;  %v5537_v37 = vsub.f32 %v149_v11, %v5521_v42  ;;  %v782_v10 = vadd.f32 %v718_v5, %v5442_v50  ;;  %v2354_v38 = vand.u32 2147483648, %v5452_v13 }
 0x114   :  { %v1578_v46 = vpop.f32.mrf.mxu2  ;;  %v3699_v32 = vpack.c.bf16 %v1232_v3, %v1230_v19  ;;  %4066 = vst [vmem:[#allocation15 + $0x28] sm:$0xff] %v3739_v58   ;;  %v752_v11 = vmul.f32 %v5252_v22, %v5073_v43  ;;  %v2367_v47 = vand.u32 2147483647, %v5501_v40  ;;  %v2369_v36 = vand.u32 2147483648, %v5501_v40 }
 0x115   :  { %v4203_v61 = vpop.eup %4202  ;;  %v3474_v14 = vmul.f32 -1.442695, %v1578_v46  ;;  %v668_v4 = vpack.c.bf16 %v619_v48, %v618_v63  ;;  %v2347_v12 = vadd.f32 %v5498_v7, %v2346_v27  ;;  %vm2349_vm3 = vweird.f32 %v5498_v7  ;;  %v1115_v35 = vpop.f32.mrf.mxu0  ;;  %v151_v48 = vld [vmem:[#allocation3 + $0x100] sm:$0xff] }
 0x116   :  { %v4205_v28 = vpop.eup %4204  ;;  %v5539_v26 = vadd.f32 1.0, %v4203_v61  ;;  %4059 = vst [vmem:[#allocation13 + $0xe8] sm:$0xff] %v3699_v32   ;;  %v882_v33 = vmul.f32 %v5288_v9, %v5537_v37  ;;  %vm5559_vm5 = vcmp.eq.f32.partialorder %v2352_v44, 8.507059e+37  ;;  %v883_v63 = vmul.f32 %v5288_v9, %v5543_v55  ;;  %vm5572_vm7 = vmor %vm2348_vm4, %vm2349_vm3 }
 0x117   :  { %v2359_v19 = vmul.f32 %v4205_v28, %v5501_v40  ;;  %4206 = vpow2.f32 %v3474_v14  ;;  %v831_v3 = vpack.c.bf16 %v782_v10, %v781_v1  ;;  %v2355_v46 = vor.u32 1.1754944e-38, %v2354_v38 }
 0x118   :  { %4208 = vrcp.f32 %v5539_v26  ;;  %1467 = vmatmul.bf16.gmra.mxu3 %v847_v31  ;;  %vm2364_vm6 = vweird.f32 %v4205_v28  ;;  %v5566_v31 = vadd.f32 %v751_v62, %v5061_v0  ;;  %vm2363_vm8 = vweird.f32 %v5501_v40  ;;  %1154 = vmatmul.bf16.gmra.mxu0 %v668_v4 }
 0x119   :  { %v2360_v50 = vsub.f32 1.0, %v2359_v19  ;;  %1620 = vmatmul.bf16.gmra.mxu2 %v994_v54  ;;  %v1348_v54 = vpop.f32.mrf.mxu1  ;;  %vm5577_vm9 = vcmp.eq.f32.partialorder %v2367_v47, 8.507059e+37  ;;  %v2370_v5 = vor.u32 1.1754944e-38, %v2369_v36  ;;  %v5582_v27 = vadd.f32 %v752_v11, %v5064_v52  ;;  %vm2365_vm10 = vmor %vm2363_vm8, %vm2364_vm6 }
 0x11a   :  { %v2351_v14 = vsel %vm5572_vm7, %v5498_v7, %v2347_v12  ;;  %v5588_v40 = vadd.f32 %v882_v33, %v5521_v42  ;;  %v947_v11 = vadd.f32 %v883_v63, %v5527_v23  ;;  %v316_v47 = vrot.slane %v151_v48, 7  ;;  %v187_v12 = vld [vmem:[#allocation2 + $0x4] sm:$0x1] }
 0x11b   :  { %v2361_v58 = vmul.f32 %v4205_v28, %v2360_v50  ;;  %v1235_v61 = vpop.f32.mrf.mxu3  ;;  %1387 = vmatmul.bf16.gmra.mxu1 %v831_v3  ;;  %v317_v36 = vrot.slane %v5568_v17, 7  ;;  %v556_v50 = vmul.f32 %v5236_v57, %v5537_v37  ;;  %v2356_v33 = vsel %vm5559_vm5, %v2355_v46, %v2351_v14 }
 0x11c   :  { %v1581_v62 = vpop.f32.mrf.mxu2  ;;  %v557_v63 = vmul.f32 %v5236_v57, %v5543_v55  ;;  %v5613_v20 = vsel %vm255_vm0, %v187_v12, %v316_v47  ;;  %v719_v46 = vmul.f32 %v5252_v22, %v5537_v37  ;;  %v848_v44 = vpack.c.bf16 %v5582_v27, %v5566_v31 }
 0x11d   :  { %v4207_v32 = vpop.eup %4206  ;;  %v2362_v1 = vadd.f32 %v4205_v28, %v2361_v58  ;;  %v3475_v10 = vmul.f32 -1.442695, %v1581_v62  ;;  %v1117_v62 = vpop.f32.mrf.mxu0  ;;  %v5623_v14 = vsel %vm255_vm0, %v316_v47, %v317_v36  ;;  %v720_v31 = vmul.f32 %v5252_v22, %v5543_v55 }
 0x11e   :  { %v5590_v38 = vpop.eup %4208  ;;  %v5593_v19 = vadd.f32 1.0, %v4207_v32  ;;  %v901_v32 = vmul.f32 %v5288_v9, %v4768_v30  ;;  %v620_v30 = vadd.f32 %v556_v50, %v5521_v42  ;;  %v5632_v47 = vsub.f32 %v151_v48, %v5613_v20  ;;  %v153_v48 = vld [vmem:[#allocation3 + $0x110] sm:$0xff] }
 0x11f   :  { %v2366_v4 = vsel %vm2365_vm10, %v4205_v28, %v2362_v1  ;;  %v2374_v7 = vmul.f32 %v5590_v38, %v5539_v26  ;;  %4210 = vpow2.f32 %v3475_v10  ;;  %v900_v28 = vmul.f32 %v5288_v9, %v4764_v29 }
 0x120   :  { %v2371_v58 = vsel %vm5577_vm9, %v2370_v5, %v2366_v4  ;;  %4212 = vrcp.f32 %v5593_v19  ;;  %v3584_v1 = vpack.c.bf16 %v1117_v62, %v1115_v35  ;;  %v995_v5 = vpack.c.bf16 %v947_v11, %v5588_v40 }
 0x121   :  { %v3894_v3 = vpack.c.bf16 %v2371_v58, %v2356_v33  ;;  %v2375_v13 = vsub.f32 1.0, %v2374_v7  ;;  %v1350_v29 = vpop.f32.mrf.mxu1  ;;  %v621_v7 = vadd.f32 %v557_v63, %v5527_v23  ;;  %v2382_v40 = vand.u32 2147483647, %v5539_v26 }
 0x122   :  { %4036 = vst [vmem:[#allocation13 + $0x30] sm:$0xff] %v3584_v1   ;;  %v3744_v37 = vpack.c.bf16 %v1350_v29, %v1348_v54  ;;  %v5638_v54 = vsub.f32 %v5568_v17, %v5623_v14  ;;  %v783_v58 = vadd.f32 %v719_v46, %v5521_v42  ;;  %v784_v55 = vadd.f32 %v720_v31, %v5527_v23  ;;  %v7197_v1 = vld [vmem:[#allocation22_spill] sm:$0xff]  ;;  %v5670_v31 = vld [vmem:[#allocation3 + $0x118] sm:$0xff] }
 0x123   :  { %4096 = vst [vmem:[#allocation12 + $0x20] sm:$0xff] %v3894_v3   ;;  %v2376_v35 = vmul.f32 %v5590_v38, %v2375_v13  ;;  %v1237_v10 = vpop.f32.mrf.mxu3  ;;  %vm2379_vm11 = vweird.f32 %v5590_v38  ;;  %v2397_v13 = vand.u32 2147483647, %v5593_v19  ;;  %v669_v62 = vpack.c.bf16 %v621_v7, %v620_v30  ;;  %v7198_v30 = vld [vmem:[#allocation21_spill] sm:$0xff] }
 0x124   :  { %v1583_v4 = vpop.f32.mrf.mxu2  ;;  %v3704_v11 = vpack.c.bf16 %v1237_v10, %v1235_v61  ;;  %4067 = vst [vmem:[#allocation15 + $0x30] sm:$0xff] %v3744_v37   ;;  %v2384_v61 = vand.u32 2147483648, %v5539_v26  ;;  %v5649_v42 = vadd.f32 %v900_v28, %v7197_v1  ;;  %v2399_v46 = vand.u32 2147483648, %v5593_v19 }
 0x125   :  { %v4211_v27 = vpop.eup %4210  ;;  %v3476_v12 = vmul.f32 -1.442695, %v1583_v4  ;;  %v2377_v3 = vadd.f32 %v5590_v38, %v2376_v35  ;;  %v884_v29 = vmul.f32 %v5288_v9, %v5632_v47  ;;  %v1120_v10 = vpop.f32.mrf.mxu0  ;;  %vm2378_vm12 = vweird.f32 %v5539_v26 }
 0x126   :  { %v4213_v50 = vpop.eup %4212  ;;  %v5634_v33 = vadd.f32 1.0, %v4211_v27  ;;  %4060 = vst [vmem:[#allocation13 + $0xf0] sm:$0xff] %v3704_v11   ;;  %v885_v35 = vmul.f32 %v5288_v9, %v5638_v54  ;;  %v832_v4 = vpack.c.bf16 %v784_v55, %v783_v58  ;;  %v319_v37 = vrot.slane %v153_v48, 7  ;;  %vm5662_vm13 = vmor %vm2378_vm12, %vm2379_vm11 }
 0x127   :  { %v2389_v63 = vmul.f32 %v4213_v50, %v5593_v19  ;;  %4214 = vpow2.f32 %v3476_v12  ;;  %v5658_v7 = vadd.f32 %v901_v32, %v7198_v30  ;;  %vm5666_vm14 = vcmp.eq.f32.partialorder %v2382_v40, 8.507059e+37 }
 0x128   :  { %4216 = vrcp.f32 %v5634_v33  ;;  %1472 = vmatmul.bf16.gmra.mxu3 %v848_v44  ;;  %vm2394_vm15 = vweird.f32 %v4213_v50  ;;  %v2381_v32 = vsel %vm5662_vm13, %v5590_v38, %v2377_v3  ;;  %v2385_v27 = vor.u32 1.1754944e-38, %v2384_v61  ;;  %1159 = vmatmul.bf16.gmra.mxu0 %v669_v62 }
 0x129   :  { %v2390_v23 = vsub.f32 1.0, %v2389_v63  ;;  %1625 = vmatmul.bf16.gmra.mxu2 %v995_v5  ;;  %v1353_v26 = vpop.f32.mrf.mxu1  ;;  %vm2393_vm1 = vweird.f32 %v5593_v19  ;;  %vm5676_vm2 = vcmp.eq.f32.partialorder %v2397_v13, 8.507059e+37  ;;  %v2400_v63 = vor.u32 1.1754944e-38, %v2399_v46 }
 0x12a   :  { %vm2395_vm3 = vmor %vm2393_vm1, %vm2394_vm15  ;;  %v949_v19 = vadd.f32 %v885_v35, %v5623_v14  ;;  %v5690_v61 = vsel %vm255_vm0, %v317_v36, %v319_v37  ;;  %v321_v3 = vrot.slane %v5670_v31, 7  ;;  %v2386_v13 = vsel %vm5666_vm14, %v2385_v27, %v2381_v32 }
 0x12b   :  { %v2391_v5 = vmul.f32 %v4213_v50, %v2390_v23  ;;  %v1240_v40 = vpop.f32.mrf.mxu3  ;;  %v948_v23 = vadd.f32 %v884_v29, %v5613_v20  ;;  %1392 = vmatmul.bf16.gmra.mxu1 %v832_v4  ;;  %v558_v17 = vmul.f32 %v5236_v57, %v5632_v47  ;;  %v559_v36 = vmul.f32 %v5236_v57, %v5638_v54 }
 0x12c   :  { %v1586_v12 = vpop.f32.mrf.mxu2  ;;  %vm2408_vm4 = vweird.f32 %v5634_v33  ;;  %v5710_v32 = vsel %vm255_vm0, %v319_v37, %v321_v3  ;;  %v2412_v57 = vand.u32 2147483647, %v5634_v33 }
 0x12d   :  { %v4215_v58 = vpop.eup %4214  ;;  %v2392_v55 = vadd.f32 %v4213_v50, %v2391_v5  ;;  %v3477_v1 = vmul.f32 -1.442695, %v1586_v12  ;;  %v1122_v28 = vpop.f32.mrf.mxu0  ;;  %v996_v44 = vpack.c.bf16 %v949_v19, %v948_v23  ;;  %v5715_v12 = vsub.f32 %v153_v48, %v5690_v61 }
 0x12e   :  { %v5681_v30 = vpop.eup %4216  ;;  %v5684_v38 = vadd.f32 1.0, %v4215_v58  ;;  %v3589_v5 = vpack.c.bf16 %v1122_v28, %v1120_v10  ;;  %v623_v37 = vadd.f32 %v559_v36, %v5623_v14  ;;  %v2414_v23 = vand.u32 2147483648, %v5634_v33 }
 0x12f   :  { %v2396_v62 = vsel %vm2395_vm3, %v4213_v50, %v2392_v55  ;;  %v2404_v46 = vmul.f32 %v5681_v30, %v5634_v33  ;;  %4218 = vpow2.f32 %v3477_v1  ;;  %v1004_v50 = vpack.c.bf16 %v5658_v7, %v5649_v42 }
 0x130   :  { %v2401_v29 = vsel %vm5676_vm2, %v2400_v63, %v2396_v62  ;;  %4220 = vrcp.f32 %v5684_v38  ;;  %v721_v42 = vmul.f32 %v5252_v22, %v5632_v47  ;;  %4037 = vst [vmem:[#allocation13 + $0x38] sm:$0xff] %v3589_v5   ;;  %v622_v55 = vadd.f32 %v558_v17, %v5613_v20  ;;  %v5737_v17 = vld [vmem:[#allocation3 + $0x120] sm:$0xff] }
 0x131   :  { %v3899_v35 = vpack.c.bf16 %v2401_v29, %v2386_v13  ;;  %v2405_v4 = vsub.f32 1.0, %v2404_v46  ;;  %v1355_v11 = vpop.f32.mrf.mxu1  ;;  %v722_v63 = vmul.f32 %v5252_v22, %v5638_v54  ;;  %v5726_v13 = vsub.f32 %v5670_v31, %v5710_v32 }
 0x132   :  { %v3749_v10 = vpack.c.bf16 %v1355_v11, %v1353_v26  ;;  %v7205_v26 = vld [vmem:[#allocation25_spill] sm:$0xff]  ;;  %v785_v29 = vadd.f32 %v721_v42, %v5613_v20  ;;  %vm2409_vm5 = vweird.f32 %v5681_v30  ;;  %v886_v36 = vmul.f32 %v5288_v9, %v5715_v12 }
 0x133   :  { %4097 = vst [vmem:[#allocation12 + $0x28] sm:$0xff] %v3899_v35   ;;  %v2406_v27 = vmul.f32 %v5681_v30, %v2405_v4  ;;  %v1242_v7 = vpop.f32.mrf.mxu3  ;;  %v902_v46 = vmul.f32 %v5288_v9, %v7205_v26  ;;  %v786_v22 = vadd.f32 %v722_v63, %v5623_v14  ;;  %v7206_v35 = vld [vmem:[#allocation26_spill] sm:$0xff]  ;;  %v670_v4 = vpack.c.bf16 %v623_v37, %v622_v55  ;;  %vm5757_vm7 = vmor %vm2408_vm4, %vm2409_vm5  ;;  %v7212_v26 = vld [vmem:[#allocation24_spill] sm:$0xff] }
 0x134   :  { %v1588_v58 = vpop.f32.mrf.mxu2  ;;  %v3709_v19 = vpack.c.bf16 %v1242_v7, %v1240_v40  ;;  %4068 = vst [vmem:[#allocation15 + $0x38] sm:$0xff] %v3749_v10   ;;  %v903_v20 = vmul.f32 %v5288_v9, %v7206_v35  ;;  %v5744_v14 = vld [vmem:[#allocation3 + $0x128] sm:$0xff]  ;;  %vm5746_vm6 = vcmp.eq.f32.partialorder %v2412_v57, 8.507059e+37  ;;  %v887_v11 = vmul.f32 %v5288_v9, %v5726_v13 }
 0x135   :  { %v4219_v1 = vpop.eup %4218  ;;  %v3478_v48 = vmul.f32 -1.442695, %v1588_v58  ;;  %v2407_v54 = vadd.f32 %v5681_v30, %v2406_v27  ;;  %v2427_v27 = vand.u32 2147483647, %v5684_v38  ;;  %v1125_v42 = vpop.f32.mrf.mxu0  ;;  %v2415_v57 = vor.u32 1.1754944e-38, %v2414_v23 }
 0x136   :  { %v4221_v47 = vpop.eup %4220  ;;  %v5728_v62 = vadd.f32 1.0, %v4219_v1  ;;  %4061 = vst [vmem:[#allocation13 + $0xf8] sm:$0xff] %v3709_v19   ;;  %v2429_v58 = vand.u32 2147483648, %v5684_v38  ;;  %v833_v10 = vpack.c.bf16 %v786_v22, %v785_v29  ;;  %v323_v55 = vrot.slane %v5737_v17, 7  ;;  %v7211_v19 = vld [vmem:[#allocation23_spill] sm:$0xff] }
 0x137   :  { %v2419_v40 = vmul.f32 %v4221_v47, %v5684_v38  ;;  %4222 = vpow2.f32 %v3478_v48  ;;  %vm2424_vm8 = vweird.f32 %v4221_v47  ;;  %v325_v63 = vrot.slane %v5744_v14, 7 }
 0x138   :  { %4224 = vrcp.f32 %v5728_v62  ;;  %1670 = vmatmul.bf16.vlgmr.msra.gmra.mxu3 %v1004_v50  ;;  %v2411_v50 = vsel %vm5757_vm7, %v5681_v30, %v2407_v54  ;;  %vm2423_vm9 = vweird.f32 %v5684_v38  ;;  %v5771_v23 = vadd.f32 %v886_v36, %v5690_v61  ;;  %1164 = vmatmul.bf16.gmra.mxu0 %v670_v4 }
 0x139   :  { %v2420_v5 = vsub.f32 1.0, %v2419_v40  ;;  %1630 = vmatmul.bf16.gmra.mxu2 %v996_v44  ;;  %v1358_v37 = vpop.f32.mrf.mxu1  ;;  %v5774_v48 = vadd.f32 %v902_v46, %v7211_v19  ;;  %v5777_v29 = vadd.f32 %v903_v20, %v7212_v26  ;;  %vm5779_vm10 = vcmp.eq.f32.partialorder %v2427_v27, 8.507059e+37  ;;  %vm2425_vm11 = vmor %vm2423_vm9, %vm2424_vm8 }
 0x13a   :  { %v5784_v40 = vadd.f32 %v887_v11, %v5710_v32  ;;  %v2416_v46 = vsel %vm5746_vm6, %v2415_v57, %v2411_v50  ;;  %v2430_v36 = vor.u32 1.1754944e-38, %v2429_v58  ;;  %v5796_v4 = vsel %vm255_vm0, %v321_v3, %v323_v55  ;;  %v5811_v3 = vld [vmem:[#allocation6] ss:$0 sm:$0xff] }
 0x13b   :  { %v2421_v44 = vmul.f32 %v4221_v47, %v2420_v5  ;;  %v5768_v33 = vpop.f32.mrf.mxu3  ;;  %1397 = vmatmul.bf16.gmra.mxu1 %v833_v10  ;;  %v5798_v5 = vld [vmem:[#allocation3 + $0x138] sm:$0xff]  ;;  %v5805_v28 = vsel %vm255_vm0, %v323_v55, %v325_v63  ;;  %v561_v7 = vmul.f32 %v5811_v3, %v5726_v13  ;;  %v2442_v55 = vand.u32 2147483647, %v5728_v62 }
 0x13c   :  { %v1591_v1 = vpop.f32.mrf.mxu2  ;;  %452 = vst [vmem:[#allocation2 - $0x3] sm:$0x80] %v5798_v5  ;;  %v997_v50 = vpack.c.bf16 %v5784_v40, %v5771_v23  ;;  %v5834_v23 = vld [vmem:[%s7147_s2] ss:$0 sm:$0xff]  ;;  %vm2438_vm13 = vweird.f32 %v5728_v62 }
 0x13d   :  { %v4223_v30 = vpop.eup %4222  ;;  %v2422_v22 = vadd.f32 %v4221_v47, %v2421_v44  ;;  %v3479_v38 = vmul.f32 -1.442695, %v1591_v1  ;;  %v1127_v10 = vpop.f32.mrf.mxu0  ;;  %v1005_v44 = vpack.c.bf16 %v5777_v29, %v5774_v48  ;;  %v724_v40 = vmul.f32 %v5834_v23, %v5726_v13 }
 0x13e   :  { %v5786_v35 = vpop.eup %4224  ;;  %v5791_v20 = vadd.f32 1.0, %v4223_v30  ;;  %v3594_v1 = vpack.c.bf16 %v1127_v10, %v1125_v42  ;;  %v5825_v30 = vsub.f32 %v5737_v17, %v5796_v4  ;;  %v723_v42 = vmul.f32 %v5834_v23, %v5715_v12 }
 0x13f   :  { %v2426_v27 = vsel %vm2425_vm11, %v4221_v47, %v2422_v22  ;;  %v2434_v11 = vmul.f32 %v5786_v35, %v5728_v62  ;;  %4226 = vpow2.f32 %v3479_v38  ;;  %v560_v47 = vmul.f32 %v5811_v3, %v5715_v12 }
 0x140   :  { %v2431_v31 = vsel %vm5779_vm10, %v2430_v36, %v2426_v27  ;;  %4228 = vrcp.f32 %v5791_v20  ;;  %v5829_v22 = vsub.f32 %v5744_v14, %v5805_v28  ;;  %4038 = vst [vmem:[#allocation13 + $0x40] sm:$0xff] %v3594_v1   ;;  %v625_v17 = vadd.f32 %v561_v7, %v5710_v32 }
 0x141   :  { %v3904_v57 = vpack.c.bf16 %v2431_v31, %v2416_v46  ;;  %v2435_v58 = vsub.f32 1.0, %v2434_v11  ;;  %v1360_v26 = vpop.f32.mrf.mxu1  ;;  %v624_v38 = vadd.f32 %v560_v47, %v5690_v61  ;;  %v2444_v36 = vand.u32 2147483648, %v5728_v62 }
 0x142   :  { %v3754_v54 = vpack.c.bf16 %v1360_v26, %v1358_v37  ;;  %v904_v12 = vmul.f32 %v5288_v9, %v4898_v24  ;;  %v905_v37 = vmul.f32 %v5288_v9, %v4902_v45  ;;  %v787_v47 = vadd.f32 %v723_v42, %v5690_v61  ;;  %v157_v24 = vld [vmem:[#allocation3 + $0x130] sm:$0xff] }
 0x143   :  { %4098 = vst [vmem:[#allocation12 + $0x30] sm:$0xff] %v3904_v57   ;;  %v2436_v19 = vmul.f32 %v5786_v35, %v2435_v58  ;;  %v1440_v48 = vpop.f32.mrf.mxu3  ;;  %v788_v13 = vadd.f32 %v724_v40, %v5710_v32  ;;  %vm2439_vm12 = vweird.f32 %v5786_v35  ;;  %v5859_v58 = vld [vmem:[%s7148_s3] ss:$0 sm:$0xff]  ;;  %v671_v61 = vpack.c.bf16 %v625_v17, %v624_v38  ;;  %s4639_s3 = smov [#allocation13]  }
 0x144   :  { %v1593_v29 = vpop.f32.mrf.mxu2  ;;  %v3834_v27 = vpack.c.bf16 %v1440_v48, %v5768_v33  ;;  %4069 = vst [vmem:[#allocation15 + $0x40] sm:$0xff] %v3754_v54   ;;  %v888_v45 = vmul.f32 %v5859_v58, %v5825_v30  ;;  %v889_v9 = vmul.f32 %v5859_v58, %v5829_v22  ;;  %vm5866_vm14 = vcmp.eq.f32.partialorder %v2442_v55, 8.507059e+37  ;;  %vm5873_vm15 = vmor %vm2438_vm13, %vm2439_vm12  ;;  %s7006_s24 = sshll.u32 %s4639_s3, 4  ;;  %s3329_s24 = int_to_ptr.vmem [resolvable:$true] %s7006_s24 }
 0x145   :  { %v4227_v46 = vpop.eup %4226  ;;  %v3480_v11 = vmul.f32 -1.442695, %v1593_v29  ;;  %v2437_v7 = vadd.f32 %v5786_v35, %v2436_v19  ;;  %v2457_v1 = vand.u32 2147483647, %v5791_v20  ;;  %v1130_v19 = vpop.f32.mrf.mxu0  ;;  %v2445_v42 = vor.u32 1.1754944e-38, %v2444_v36 }
 0x146   :  { %v4229_v31 = vpop.eup %4228  ;;  %v5846_v57 = vadd.f32 1.0, %v4227_v46  ;;  %4085 = vst [vmem:[#allocation15 + $0xc0] sm:$0xff] %v3834_v27   ;;  %v2459_v48 = vand.u32 2147483648, %v5791_v20  ;;  %v834_v62 = vpack.c.bf16 %v788_v13, %v787_v47  ;;  %v327_v55 = vrot.slane %v157_v24, 7 }
 0x147   :  { %v2449_v33 = vmul.f32 %v4229_v31, %v5791_v20  ;;  %4230 = vpow2.f32 %v3480_v11  ;;  %v2441_v29 = vsel %vm5873_vm15, %v5786_v35, %v2437_v7  ;;  %vm2454_vm1 = vweird.f32 %v4229_v31 }
 0x148   :  { %4232 = vrcp.f32 %v5846_v57  ;;  %1675 = vmatmul.bf16.gmra.mxu3 %v1005_v44  ;;  %v329_v44 = vrot.slane %v5798_v5, 7  ;;  %v5883_v40 = vadd.f32 %v888_v45, %v5796_v4  ;;  %v5886_v46 = vadd.f32 %v889_v9, %v5805_v28  ;;  %1169 = vmatmul.bf16.gmra.mxu0 %v671_v61 }
 0x149   :  { %v2450_v10 = vsub.f32 1.0, %v2449_v33  ;;  %1635 = vmatmul.bf16.gmra.mxu2 %v997_v50  ;;  %v1363_v50 = vpop.f32.mrf.mxu1  ;;  %v5889_v36 = vadd.f32 %v904_v12, %v4887_v6  ;;  %v5892_v27 = vadd.f32 %v905_v37, %v4890_v8  ;;  %vm2453_vm2 = vweird.f32 %v5791_v20 }
 0x14a   :  { %vm2458_vm3 = vcmp.eq.f32.partialorder %v2457_v1, 8.507059e+37  ;;  %v2446_v7 = vsel %vm5866_vm14, %v2445_v42, %v2441_v29  ;;  %vm2455_vm4 = vmor %vm2453_vm2, %vm2454_vm1  ;;  %v2460_v33 = vor.u32 1.1754944e-38, %v2459_v48  ;;  %v5905_v8 = vsel %vm255_vm0, %v325_v63, %v327_v55 }
 0x14b   :  { %v2451_v54 = vmul.f32 %v4229_v31, %v2450_v10  ;;  %v1443_v38 = vpop.f32.mrf.mxu3  ;;  %1402 = vmatmul.bf16.gmra.mxu1 %v834_v62  ;;  %v5910_v37 = vsel %vm255_vm0, %v327_v55, %v329_v44  ;;  %v562_v9 = vmul.f32 %v5811_v3, %v5825_v30  ;;  %v563_v14 = vmul.f32 %v5811_v3, %v5829_v22 }
 0x14c   :  { %v1596_v17 = vpop.f32.mrf.mxu2  ;;  %v998_v10 = vpack.c.bf16 %v5886_v46, %v5883_v40  ;;  %v1006_v1 = vpack.c.bf16 %v5892_v27, %v5889_v36  ;;  %v5924_v62 = vsub.f32 %v157_v24, %v5905_v8  ;;  %v5928_v55 = vsub.f32 %v5798_v5, %v5910_v37 }
 0x14d   :  { %v4231_v35 = vpop.eup %4230  ;;  %v2452_v11 = vadd.f32 %v4229_v31, %v2451_v54  ;;  %v3481_v47 = vmul.f32 -1.442695, %v1596_v17  ;;  %v1132_v32 = vpop.f32.mrf.mxu0  ;;  %v725_v29 = vmul.f32 %v5834_v23, %v5825_v30  ;;  %v627_v40 = vadd.f32 %v563_v14, %v5805_v28 }
 0x14e   :  { %v5895_v13 = vpop.eup %4232  ;;  %v5900_v6 = vadd.f32 1.0, %v4231_v35  ;;  %v3599_v26 = vpack.c.bf16 %v1132_v32, %v1130_v19  ;;  %v626_v19 = vadd.f32 %v562_v9, %v5796_v4  ;;  %v726_v46 = vmul.f32 %v5834_v23, %v5829_v22 }
 0x14f   :  { %v2456_v12 = vsel %vm2455_vm4, %v4229_v31, %v2452_v11  ;;  %v2464_v20 = vmul.f32 %v5895_v13, %v5846_v57  ;;  %4234 = vpow2.f32 %v3481_v47  ;;  %v2472_v31 = vand.u32 2147483647, %v5846_v57 }
 0x150   :  { %v2461_v45 = vsel %vm2458_vm3, %v2460_v33, %v2456_v12  ;;  %4236 = vrcp.f32 %v5900_v6  ;;  %4039 = vst [vmem:[#allocation13 + $0x48] sm:$0xff] %v3599_v26   ;;  %v2474_v36 = vand.u32 2147483648, %v5846_v57  ;;  %v906_v35 = vmul.f32 %v5859_v58, %v4932_v18  ;;  %v159_v18 = vld [vmem:[#allocation3 + $0x140] sm:$0xff]  ;;  %v5948_v33 = vld [vmem:[#allocation3 + $0x148] sm:$0xff] }
 0x151   :  { %v3909_v61 = vpack.c.bf16 %v2461_v45, %v2446_v7  ;;  %v2465_v63 = vsub.f32 1.0, %v2464_v20  ;;  %v1365_v48 = vpop.f32.mrf.mxu1  ;;  %v789_v47 = vadd.f32 %v725_v29, %v5796_v4  ;;  %v790_v7 = vadd.f32 %v726_v46, %v5805_v28 }
 0x152   :  { %v3759_v17 = vpack.c.bf16 %v1365_v48, %v1363_v50  ;;  %v907_v50 = vmul.f32 %v5859_v58, %v4936_v2  ;;  %vm2469_vm5 = vweird.f32 %v5895_v13  ;;  %v890_v2 = vmul.f32 %v5859_v58, %v5924_v62 }
 0x153   :  { %4099 = vst [vmem:[#allocation12 + $0x38] sm:$0xff] %v3909_v61   ;;  %v2466_v42 = vmul.f32 %v5895_v13, %v2465_v63  ;;  %v1445_v54 = vpop.f32.mrf.mxu3  ;;  %v891_v4 = vmul.f32 %v5859_v58, %v5928_v55  ;;  %v672_v28 = vpack.c.bf16 %v627_v40, %v626_v19  ;;  %vm2468_vm6 = vweird.f32 %v5846_v57 }
 0x154   :  { %v1598_v44 = vpop.f32.mrf.mxu2  ;;  %v3839_v27 = vpack.c.bf16 %v1445_v54, %v1443_v38  ;;  %4070 = vst [vmem:[#allocation15 + $0x48] sm:$0xff] %v3759_v17   ;;  %vm5956_vm7 = vcmp.eq.f32.partialorder %v2472_v31, 8.507059e+37  ;;  %v2487_v45 = vand.u32 2147483647, %v5900_v6  ;;  %vm5963_vm8 = vmor %vm2468_vm6, %vm2469_vm5  ;;  %v2489_v61 = vand.u32 2147483648, %v5900_v6 }
 0x155   :  { %v4235_v24 = vpop.eup %4234  ;;  %v3482_v5 = vmul.f32 -1.442695, %v1598_v44  ;;  %v2467_v22 = vadd.f32 %v5895_v13, %v2466_v42  ;;  %v1135_v9 = vpop.f32.mrf.mxu0  ;;  %v835_v63 = vpack.c.bf16 %v790_v7, %v789_v47  ;;  %v331_v57 = vrot.slane %v159_v18, 7 }
 0x156   :  { %v4237_v30 = vpop.eup %4236  ;;  %v5939_v11 = vadd.f32 1.0, %v4235_v24  ;;  %4086 = vst [vmem:[#allocation15 + $0xc8] sm:$0xff] %v3839_v27   ;;  %v332_v32 = vrot.slane %v5948_v33, 7  ;;  %v2475_v26 = vor.u32 1.1754944e-38, %v2474_v36  ;;  %v5973_v29 = vadd.f32 %v890_v2, %v5905_v8 }
 0x157   :  { %v2479_v38 = vmul.f32 %v4237_v30, %v5900_v6  ;;  %4238 = vpow2.f32 %v3482_v5  ;;  %v2471_v31 = vsel %vm5963_vm8, %v5895_v13, %v2467_v22  ;;  %vm2484_vm9 = vweird.f32 %v4237_v30  ;;  %v188_v13 = vld [vmem:[#allocation2 + $0x5] sm:$0x1] }
 0x158   :  { %4240 = vrcp.f32 %v5939_v11  ;;  %1680 = vmatmul.bf16.gmra.mxu3 %v1006_v1  ;;  %v5976_v54 = vadd.f32 %v891_v4, %v5910_v37  ;;  %v5979_v44 = vadd.f32 %v906_v35, %v4924_v21  ;;  %v5982_v17 = vadd.f32 %v907_v50, %v4927_v59  ;;  %1174 = vmatmul.bf16.gmra.mxu0 %v672_v28 }
 0x159   :  { %v2480_v20 = vsub.f32 1.0, %v2479_v38  ;;  %1640 = vmatmul.bf16.gmra.mxu2 %v998_v10  ;;  %v1368_v1 = vpop.f32.mrf.mxu1  ;;  %vm2483_vm10 = vweird.f32 %v5900_v6  ;;  %vm2488_vm11 = vcmp.eq.f32.partialorder %v2487_v45, 8.507059e+37  ;;  %v2476_v36 = vsel %vm5956_vm7, %v2475_v26, %v2471_v31 }
 0x15a   :  { %vm2485_vm12 = vmor %vm2483_vm10, %vm2484_vm9  ;;  %v2490_v21 = vor.u32 1.1754944e-38, %v2489_v61  ;;  %v5995_v59 = vsel %vm255_vm0, %v331_v57, %v332_v32  ;;  %v6000_v35 = vsel %vm255_vm0, %v188_v13, %v331_v57  ;;  %v564_v47 = vmul.f32 %v5811_v3, %v5924_v62 }
 0x15b   :  { %v2481_v10 = vmul.f32 %v4237_v30, %v2480_v20  ;;  %v1448_v42 = vpop.f32.mrf.mxu3  ;;  %1407 = vmatmul.bf16.gmra.mxu1 %v835_v63  ;;  %v565_v7 = vmul.f32 %v5811_v3, %v5928_v55  ;;  %v999_v4 = vpack.c.bf16 %v5976_v54, %v5973_v29  ;;  %v1007_v28 = vpack.c.bf16 %v5982_v17, %v5979_v44 }
 0x15c   :  { %v1601_v48 = vpop.f32.mrf.mxu2  ;;  %v6014_v14 = vsub.f32 %v159_v18, %v6000_v35  ;;  %v6018_v61 = vsub.f32 %v5948_v33, %v5995_v59  ;;  %v727_v63 = vmul.f32 %v5834_v23, %v5924_v62  ;;  %v2504_v29 = vand.u32 2147483648, %v5939_v11 }
 0x15d   :  { %v4239_v19 = vpop.eup %4238  ;;  %v2482_v40 = vadd.f32 %v4237_v30, %v2481_v10  ;;  %v3483_v46 = vmul.f32 -1.442695, %v1601_v48  ;;  %v1137_v2 = vpop.f32.mrf.mxu0  ;;  %v629_v10 = vadd.f32 %v565_v7, %v5910_v37  ;;  %v728_v48 = vmul.f32 %v5834_v23, %v5928_v55 }
 0x15e   :  { %v5985_v24 = vpop.eup %4240  ;;  %v5990_v27 = vadd.f32 1.0, %v4239_v19  ;;  %v3604_v12 = vpack.c.bf16 %v1137_v2, %v1135_v9  ;;  %v628_v9 = vadd.f32 %v564_v47, %v5905_v8  ;;  %v908_v17 = vmul.f32 %v5859_v58, %v4970_v56  ;;  %v161_v56 = vld [vmem:[#allocation3 + $0x150] sm:$0xff] }
 0x15f   :  { %v2486_v5 = vsel %vm2485_vm12, %v4237_v30, %v2482_v40  ;;  %v2494_v6 = vmul.f32 %v5985_v24, %v5939_v11  ;;  %4242 = vpow2.f32 %v3483_v46  ;;  %v2502_v30 = vand.u32 2147483647, %v5939_v11 }
 0x160   :  { %v2491_v50 = vsel %vm2488_vm11, %v2490_v21, %v2486_v5  ;;  %4244 = vrcp.f32 %v5990_v27  ;;  %4040 = vst [vmem:[#allocation13 + $0x50] sm:$0xff] %v3604_v12   ;;  %v791_v19 = vadd.f32 %v727_v63, %v5905_v8  ;;  %v792_v40 = vadd.f32 %v728_v48, %v5910_v37 }
 0x161   :  { %v3914_v22 = vpack.c.bf16 %v2491_v50, %v2476_v36  ;;  %v2495_v38 = vsub.f32 1.0, %v2494_v6  ;;  %v1370_v45 = vpop.f32.mrf.mxu1  ;;  %vm2499_vm13 = vweird.f32 %v5985_v24  ;;  %v892_v46 = vmul.f32 %v5859_v58, %v6014_v14  ;;  %v6043_v36 = vld [vmem:[#allocation3 + $0x158] sm:$0xff] }
 0x162   :  { %v3764_v26 = vpack.c.bf16 %v1370_v45, %v1368_v1  ;;  %v909_v1 = vmul.f32 %v5859_v58, %v4974_v25  ;;  %v893_v25 = vmul.f32 %v5859_v58, %v6018_v61  ;;  %v673_v8 = vpack.c.bf16 %v629_v10, %v628_v9 }
 0x163   :  { %4100 = vst [vmem:[#allocation12 + $0x40] sm:$0xff] %v3914_v22   ;;  %v2496_v20 = vmul.f32 %v5985_v24, %v2495_v38  ;;  %v1450_v57 = vpop.f32.mrf.mxu3  ;;  %vm2498_vm14 = vweird.f32 %v5939_v11  ;;  %vm6046_vm15 = vcmp.eq.f32.partialorder %v2502_v30, 8.507059e+37  ;;  %v2517_v5 = vand.u32 2147483647, %v5990_v27 }
 0x164   :  { %v1603_v31 = vpop.f32.mrf.mxu2  ;;  %v3844_v54 = vpack.c.bf16 %v1450_v57, %v1448_v42  ;;  %4071 = vst [vmem:[#allocation15 + $0x50] sm:$0xff] %v3764_v26   ;;  %vm6053_vm1 = vmor %vm2498_vm14, %vm2499_vm13  ;;  %v2505_v47 = vor.u32 1.1754944e-38, %v2504_v29  ;;  %v2519_v7 = vand.u32 2147483648, %v5990_v27  ;;  %v836_v11 = vpack.c.bf16 %v792_v40, %v791_v19 }
 0x165   :  { %v4243_v18 = vpop.eup %4242  ;;  %v3484_v44 = vmul.f32 -1.442695, %v1603_v31  ;;  %v2497_v55 = vadd.f32 %v5985_v24, %v2496_v20  ;;  %v1140_v6 = vpop.f32.mrf.mxu0  ;;  %v334_v22 = vrot.slane %v161_v56, 7  ;;  %v6063_v20 = vadd.f32 %v892_v46, %v6000_v35 }
 0x166   :  { %v4245_v62 = vpop.eup %4244  ;;  %v6029_v13 = vadd.f32 1.0, %v4243_v18  ;;  %4087 = vst [vmem:[#allocation15 + $0xd0] sm:$0xff] %v3844_v54   ;;  %v6066_v45 = vadd.f32 %v893_v25, %v5995_v59  ;;  %v6069_v63 = vadd.f32 %v908_v17, %v4965_v51  ;;  %v6072_v57 = vadd.f32 %v909_v1, %v4962_v49 }
 0x167   :  { %v2509_v42 = vmul.f32 %v4245_v62, %v5990_v27  ;;  %4246 = vpow2.f32 %v3484_v44  ;;  %v2501_v38 = vsel %vm6053_vm1, %v5985_v24, %v2497_v55  ;;  %vm2514_vm2 = vweird.f32 %v4245_v62 }
 0x168   :  { %4248 = vrcp.f32 %v6029_v13  ;;  %1685 = vmatmul.bf16.gmra.mxu3 %v1007_v28  ;;  %1179 = vmatmul.bf16.gmra.mxu0 %v673_v8  ;;  %vm2513_vm3 = vweird.f32 %v5990_v27  ;;  %vm2518_vm4 = vcmp.eq.f32.partialorder %v2517_v5, 8.507059e+37  ;;  %v2506_v10 = vsel %vm6046_vm15, %v2505_v47, %v2501_v38 }
 0x169   :  { %v2510_v21 = vsub.f32 1.0, %v2509_v42  ;;  %1645 = vmatmul.bf16.gmra.mxu2 %v999_v4  ;;  %v1373_v30 = vpop.f32.mrf.mxu1  ;;  %v336_v4 = vrot.slane %v6043_v36, 7  ;;  %vm2515_vm5 = vmor %vm2513_vm3, %vm2514_vm2  ;;  %v2520_v48 = vor.u32 1.1754944e-38, %v2519_v7  ;;  %v6085_v49 = vsel %vm255_vm0, %v332_v32, %v334_v22 }
 0x16a   :  { %v566_v44 = vmul.f32 %v5811_v3, %v6014_v14  ;;  %v567_v33 = vmul.f32 %v5811_v3, %v6018_v61  ;;  %v1000_v1 = vpack.c.bf16 %v6066_v45, %v6063_v20  ;;  %v1008_v19 = vpack.c.bf16 %v6072_v57, %v6069_v63  ;;  %v163_v45 = vld [vmem:[#allocation3 + $0x160] sm:$0xff] }
 0x16b   :  { %v2511_v2 = vmul.f32 %v4245_v62, %v2510_v21  ;;  %v1453_v28 = vpop.f32.mrf.mxu3  ;;  %1412 = vmatmul.bf16.gmra.mxu1 %v836_v11  ;;  %v6092_v29 = vsel %vm255_vm0, %v334_v22, %v336_v4  ;;  %vm2528_vm6 = vweird.f32 %v6029_v13  ;;  %v6105_v42 = vsub.f32 %v161_v56, %v6085_v49 }
 0x16c   :  { %v1606_v12 = vpop.f32.mrf.mxu2  ;;  %v6109_v46 = vsub.f32 %v6043_v36, %v6092_v29  ;;  %v729_v25 = vmul.f32 %v5834_v23, %v6014_v14  ;;  %v630_v5 = vadd.f32 %v566_v44, %v6000_v35  ;;  %v730_v50 = vmul.f32 %v5834_v23, %v6018_v61 }
 0x16d   :  { %v4247_v24 = vpop.eup %4246  ;;  %v2512_v31 = vadd.f32 %v4245_v62, %v2511_v2  ;;  %v3485_v26 = vmul.f32 -1.442695, %v1606_v12  ;;  %v2532_v7 = vand.u32 2147483647, %v6029_v13  ;;  %v2534_v14 = vand.u32 2147483648, %v6029_v13 }
 0x16e   :  { %v6075_v9 = vpop.eup %4248  ;;  %v6080_v51 = vadd.f32 1.0, %v4247_v24  ;;  %v794_v12 = vadd.f32 %v730_v50, %v5995_v59  ;;  %v910_v61 = vmul.f32 %v5859_v58, %v5007_v16  ;;  %v894_v63 = vmul.f32 %v5859_v58, %v6105_v42 }
 0x16f   :  { %v2516_v18 = vsel %vm2515_vm5, %v4245_v62, %v2512_v31  ;;  %v2524_v27 = vmul.f32 %v6075_v9, %v6029_v13  ;;  %4250 = vpow2.f32 %v3485_v26  ;;  %v1142_v62 = vpop.f32.mrf.mxu0  ;;  %vm2529_vm7 = vweird.f32 %v6075_v9 }
 0x170   :  { %v2521_v54 = vsel %vm2518_vm4, %v2520_v48, %v2516_v18  ;;  %4252 = vrcp.f32 %v6080_v51  ;;  %v3609_v40 = vpack.c.bf16 %v1142_v62, %v1140_v6  ;;  %v631_v6 = vadd.f32 %v567_v33, %v5995_v59  ;;  %v6145_v33 = vld [vmem:[#allocation3 + $0x168] sm:$0xff]  ;;  %vm6151_vm10 = vmor %vm2528_vm6, %vm2529_vm7 }
 0x171   :  { %v3919_v32 = vpack.c.bf16 %v2521_v54, %v2506_v10  ;;  %v2525_v17 = vsub.f32 1.0, %v2524_v27  ;;  %v1375_v55 = vpop.f32.mrf.mxu1  ;;  %v2547_v16 = vand.u32 2147483647, %v6080_v51  ;;  %vm6137_vm8 = vcmp.eq.f32.partialorder %v2532_v7, 8.507059e+37 }
 0x172   :  { %4041 = vst [vmem:[#allocation13 + $0x58] sm:$0xff] %v3609_v40   ;;  %v3769_v21 = vpack.c.bf16 %v1375_v55, %v1373_v30  ;;  %v793_v30 = vadd.f32 %v729_v25, %v6000_v35  ;;  %v895_v35 = vmul.f32 %v5859_v58, %v6109_v46  ;;  %v674_v59 = vpack.c.bf16 %v631_v6, %v630_v5  ;;  %v6183_v5 = vld [vmem:[#allocation3 + $0x178] sm:$0xff] }
 0x173   :  { %4101 = vst [vmem:[#allocation12 + $0x48] sm:$0xff] %v3919_v32   ;;  %v1455_v8 = vpop.f32.mrf.mxu3  ;;  %v2526_v47 = vmul.f32 %v6075_v9, %v2525_v17  ;;  %v2549_v26 = vand.u32 2147483648, %v6080_v51  ;;  %v338_v48 = vrot.slane %v163_v45, 7  ;;  %v2535_v18 = vor.u32 1.1754944e-38, %v2534_v14 }
 0x174   :  { %v1608_v37 = vpop.f32.mrf.mxu2  ;;  %v3849_v11 = vpack.c.bf16 %v1455_v8, %v1453_v28  ;;  %4072 = vst [vmem:[#allocation15 + $0x58] sm:$0xff] %v3769_v21   ;;  %v911_v28 = vmul.f32 %v5859_v58, %v5011_v53  ;;  %v837_v10 = vpack.c.bf16 %v794_v12, %v793_v30  ;;  %v6143_v54 = vadd.f32 %v910_v61, %v4999_v41 }
 0x175   :  { %v4251_v56 = vpop.eup %4250  ;;  %v3486_v22 = vmul.f32 -1.442695, %v1608_v37  ;;  %v2527_v57 = vadd.f32 %v6075_v9, %v2526_v47  ;;  %vm2543_vm11 = vweird.f32 %v6080_v51  ;;  %v6160_v41 = vadd.f32 %v895_v35, %v6092_v29  ;;  %453 = vst [vmem:[#allocation2 - $0x2] sm:$0x80] %v6183_v5 }
 0x176   :  { %v4253_v38 = vpop.eup %4252  ;;  %v6120_v2 = vadd.f32 1.0, %v4251_v56  ;;  %4088 = vst [vmem:[#allocation15 + $0xd8] sm:$0xff] %v3849_v11   ;;  %vm6168_vm12 = vcmp.eq.f32.partialorder %v2547_v16, 8.507059e+37  ;;  %v2550_v37 = vor.u32 1.1754944e-38, %v2549_v26  ;;  %v568_v56 = vmul.f32 %v5811_v3, %v6105_v42 }
 0x177   :  { %v2539_v20 = vmul.f32 %v4253_v38, %v6080_v51  ;;  %4254 = vpow2.f32 %v3486_v22  ;;  %v1145_v53 = vpop.f32.mrf.mxu0  ;;  %vm2544_vm9 = vweird.f32 %v4253_v38  ;;  %v2531_v13 = vsel %vm6151_vm10, %v6075_v9, %v2527_v57 }
 0x178   :  { %4256 = vrcp.f32 %v6120_v2  ;;  %1690 = vmatmul.bf16.gmra.mxu3 %v1008_v19  ;;  %v6163_v19 = vadd.f32 %v911_v28, %v5002_v60  ;;  %1184 = vmatmul.bf16.gmra.mxu0 %v674_v59  ;;  %vm2545_vm13 = vmor %vm2543_vm11, %vm2544_vm9  ;;  %v6180_v60 = vsel %vm255_vm0, %v336_v4, %v338_v48  ;;  %v340_v9 = vrot.slane %v6145_v33, 7 }
 0x179   :  { %v2540_v24 = vsub.f32 1.0, %v2539_v20  ;;  %1650 = vmatmul.bf16.gmra.mxu2 %v1000_v1  ;;  %v1378_v44 = vpop.f32.mrf.mxu1  ;;  %v6157_v1 = vadd.f32 %v894_v63, %v6085_v49  ;;  %v2536_v36 = vsel %vm6137_vm8, %v2535_v18, %v2531_v13  ;;  %v569_v47 = vmul.f32 %v5811_v3, %v6109_v46 }
 0x17a   :  { %v1009_v14 = vpack.c.bf16 %v6163_v19, %v6143_v54  ;;  %v6204_v12 = vsel %vm255_vm0, %v338_v48, %v340_v9  ;;  %v2562_v20 = vand.u32 2147483647, %v6120_v2  ;;  %v6208_v28 = vsub.f32 %v163_v45, %v6180_v60 }
 0x17b   :  { %v2541_v27 = vmul.f32 %v4253_v38, %v2540_v24  ;;  %v1458_v17 = vpop.f32.mrf.mxu3  ;;  %1417 = vmatmul.bf16.gmra.mxu1 %v837_v10  ;;  %v632_v63 = vadd.f32 %v568_v56, %v6085_v49  ;;  %v731_v35 = vmul.f32 %v5834_v23, %v6105_v42  ;;  %v732_v31 = vmul.f32 %v5834_v23, %v6109_v46  ;;  %v165_v56 = vld [vmem:[#allocation3 + $0x170] sm:$0xff] }
 0x17c   :  { %v1611_v62 = vpop.f32.mrf.mxu2  ;;  %v2564_v45 = vand.u32 2147483648, %v6120_v2  ;;  %v6220_v18 = vsub.f32 %v6145_v33, %v6204_v12  ;;  %v912_v54 = vmul.f32 %v5859_v58, %v5041_v34  ;;  %vm2558_vm15 = vweird.f32 %v6120_v2 }
 0x17d   :  { %v4255_v40 = vpop.eup %4254  ;;  %v2542_v55 = vadd.f32 %v4253_v38, %v2541_v27  ;;  %v3487_v25 = vmul.f32 -1.442695, %v1611_v62  ;;  %v796_v46 = vadd.f32 %v732_v31, %v6092_v29  ;;  %v7233_v62 = vld [vmem:[#allocation28_spill] sm:$0xff]  ;;  %vm6245_vm2 = vcmp.eq.f32.partialorder %v2562_v20, 8.507059e+37 }
 0x17e   :  { %v6172_v8 = vpop.eup %4256  ;;  %v6175_v21 = vadd.f32 1.0, %v4255_v40 }
 0x17f   :  { %v2546_v6 = vsel %vm2545_vm13, %v4253_v38, %v2542_v55  ;;  %v2554_v50 = vmul.f32 %v6172_v8, %v6120_v2  ;;  %4258 = vpow2.f32 %v3487_v25  ;;  %v1147_v22 = vpop.f32.mrf.mxu0  ;;  %v1001_v38 = vpack.c.bf16 %v6160_v41, %v6157_v1 }
 0x180   :  { %v2551_v4 = vsel %vm6168_vm12, %v2550_v37, %v2546_v6  ;;  %4260 = vrcp.f32 %v6175_v21  ;;  %v3614_v30 = vpack.c.bf16 %v1147_v22, %v1145_v53  ;;  %v633_v53 = vadd.f32 %v569_v47, %v6092_v29 }
 0x181   :  { %v3924_v7 = vpack.c.bf16 %v2551_v4, %v2536_v36  ;;  %v2555_v11 = vsub.f32 1.0, %v2554_v50  ;;  %v1380_v61 = vpop.f32.mrf.mxu1  ;;  %v913_v1 = vmul.f32 %v5859_v58, %v7233_v62  ;;  %vm2559_vm14 = vweird.f32 %v6172_v8 }
 0x182   :  { %4042 = vst [vmem:[#allocation13 + $0x60] sm:$0xff] %v3614_v30   ;;  %v3774_v16 = vpack.c.bf16 %v1380_v61, %v1378_v44  ;;  %v795_v44 = vadd.f32 %v731_v35, %v6085_v49  ;;  %v675_v34 = vpack.c.bf16 %v633_v53, %v632_v63  ;;  %v897_v29 = vmul.f32 %v5859_v58, %v6220_v18  ;;  %vm6241_vm1 = vmor %vm2558_vm15, %vm2559_vm14 }
 0x183   :  { %4102 = vst [vmem:[#allocation12 + $0x50] sm:$0xff] %v3924_v7   ;;  %v2556_v59 = vmul.f32 %v6172_v8, %v2555_v11  ;;  %v1460_v57 = vpop.f32.mrf.mxu3  ;;  %v2577_v40 = vand.u32 2147483647, %v6175_v21  ;;  %v2579_v13 = vand.u32 2147483648, %v6175_v21  ;;  %v2565_v37 = vor.u32 1.1754944e-38, %v2564_v45  ;;  %v7238_v11 = vld [vmem:[#allocation27_spill] sm:$0xff] }
 0x184   :  { %v1613_v24 = vpop.f32.mrf.mxu2  ;;  %v3854_v10 = vpack.c.bf16 %v1460_v57, %v1458_v17  ;;  %4073 = vst [vmem:[#allocation15 + $0x60] sm:$0xff] %v3774_v16   ;;  %v896_v17 = vmul.f32 %v5859_v58, %v6208_v28  ;;  %v838_v55 = vpack.c.bf16 %v796_v46, %v795_v44  ;;  %v6256_v7 = vadd.f32 %v912_v54, %v5033_v39 }
 0x185   :  { %v4259_v26 = vpop.eup %4258  ;;  %v3488_v48 = vmul.f32 -1.442695, %v1613_v24  ;;  %v2557_v41 = vadd.f32 %v6172_v8, %v2556_v59  ;;  %v6259_v22 = vadd.f32 %v913_v1, %v7238_v11  ;;  %vm2573_vm4 = vweird.f32 %v6175_v21 }
 0x186   :  { %v4261_v42 = vpop.eup %4260  ;;  %v6222_v27 = vadd.f32 1.0, %v4259_v26  ;;  %4089 = vst [vmem:[#allocation15 + $0xe0] sm:$0xff] %v3854_v10   ;;  %v6253_v47 = vadd.f32 %v896_v17, %v6180_v60  ;;  %v961_v20 = vadd.f32 %v897_v29, %v6204_v12  ;;  %vm2578_vm6 = vcmp.eq.f32.partialorder %v2577_v40, 8.507059e+37 }
 0x187   :  { %v2569_v32 = vmul.f32 %v4261_v42, %v6175_v21  ;;  %4262 = vpow2.f32 %v3488_v48  ;;  %v1150_v19 = vpop.f32.mrf.mxu0  ;;  %vm2574_vm3 = vweird.f32 %v4261_v42  ;;  %v2561_v2 = vsel %vm6241_vm1, %v6172_v8, %v2557_v41 }
 0x188   :  { %4264 = vrcp.f32 %v6222_v27  ;;  %1695 = vmatmul.bf16.gmra.mxu3 %v1009_v14  ;;  %1189 = vmatmul.bf16.gmra.mxu0 %v675_v34  ;;  %vm2575_vm5 = vmor %vm2573_vm4, %vm2574_vm3  ;;  %v2580_v61 = vor.u32 1.1754944e-38, %v2579_v13  ;;  %v342_v39 = vrot.slane %v165_v56, 7  ;;  %v2566_v35 = vsel %vm6245_vm2, %v2565_v37, %v2561_v2 }
 0x189   :  { %v2570_v49 = vsub.f32 1.0, %v2569_v32  ;;  %1655 = vmatmul.bf16.gmra.mxu2 %v1001_v38  ;;  %v1383_v50 = vpop.f32.mrf.mxu1  ;;  %v570_v24 = vmul.f32 %v5811_v3, %v6208_v28  ;;  %v571_v16 = vmul.f32 %v5811_v3, %v6220_v18  ;;  %v344_v45 = vrot.slane %v6183_v5, 7 }
 0x18a   :  { %v1002_v48 = vpack.c.bf16 %v961_v20, %v6253_v47  ;;  %v6284_v44 = vsel %vm255_vm0, %v340_v9, %v342_v39  ;;  %v733_v3 = vmul.f32 %v5834_v23, %v6208_v28  ;;  %v734_v41 = vmul.f32 %v5834_v23, %v6220_v18 }
 0x18b   :  { %v2571_v6 = vmul.f32 %v4261_v42, %v2570_v49  ;;  %v1463_v36 = vpop.f32.mrf.mxu3  ;;  %1422 = vmatmul.bf16.gmra.mxu1 %v838_v55  ;;  %v634_v62 = vadd.f32 %v570_v24, %v6180_v60  ;;  %v635_v1 = vadd.f32 %v571_v16, %v6204_v12  ;;  %v6294_v29 = vsel %vm255_vm0, %v342_v39, %v344_v45 }
 0x18c   :  { %v1616_v4 = vpop.f32.mrf.mxu2  ;;  %v505_v40 = vsub.f32 %v165_v56, %v6284_v44  ;;  %v797_v13 = vadd.f32 %v733_v3, %v6180_v60  ;;  %v798_v55 = vadd.f32 %v734_v41, %v6204_v12  ;;  %v2592_v18 = vand.u32 2147483647, %v6222_v27 }
 0x18d   :  { %v4263_v38 = vpop.eup %4262  ;;  %v2572_v14 = vadd.f32 %v4261_v42, %v2571_v6  ;;  %v3489_v30 = vmul.f32 -1.442695, %v1616_v4  ;;  %v2594_v25 = vand.u32 2147483648, %v6222_v27  ;;  %v506_v37 = vsub.f32 %v6183_v5, %v6294_v29 }
 0x18e   :  { %v6263_v8 = vpop.eup %4264  ;;  %v6266_v63 = vadd.f32 1.0, %v4263_v38  ;;  %v676_v6 = vpack.c.bf16 %v635_v1, %v634_v62  ;;  %v898_v2 = vmul.f32 %v5859_v58, %v505_v40  ;;  %v839_v4 = vpack.c.bf16 %v798_v55, %v797_v13 }
 0x18f   :  { %v2576_v59 = vsel %vm2575_vm5, %v4261_v42, %v2572_v14  ;;  %v2584_v21 = vmul.f32 %v6263_v8, %v6222_v27  ;;  %4266 = vpow2.f32 %v3489_v30  ;;  %v1152_v26 = vpop.f32.mrf.mxu0  ;;  %v1010_v42 = vpack.c.bf16 %v6259_v22, %v6256_v7 }
 0x190   :  { %v2581_v57 = vsel %vm2578_vm6, %v2580_v61, %v2576_v59  ;;  %4268 = vrcp.f32 %v6266_v63  ;;  %v3619_v10 = vpack.c.bf16 %v1152_v26, %v1150_v19  ;;  %vm2589_vm0 = vweird.f32 %v6263_v8 }
 0x191   :  { %v3929_v53 = vpack.c.bf16 %v2581_v57, %v2566_v35  ;;  %v2585_v31 = vsub.f32 1.0, %v2584_v21  ;;  %v1385_v54 = vpop.f32.mrf.mxu1  ;;  %v2609_v56 = vand.u32 2147483648, %v6266_v63  ;;  %vm2588_vm7 = vweird.f32 %v6222_v27 }
 0x192   :  { %4043 = vst [vmem:[#allocation13 + $0x68] sm:$0xff] %v3619_v10   ;;  %v3779_v17 = vpack.c.bf16 %v1385_v54, %v1383_v50  ;;  %v2607_v47 = vand.u32 2147483647, %v6266_v63  ;;  %vm6315_vm9 = vmor %vm2588_vm7, %vm2589_vm0  ;;  %vm6319_vm10 = vcmp.eq.f32.partialorder %v2592_v18, 8.507059e+37  ;;  %v2595_v38 = vor.u32 1.1754944e-38, %v2594_v25 }
 0x193   :  { %4103 = vst [vmem:[#allocation12 + $0x58] sm:$0xff] %v3929_v53   ;;  %v1465_v46 = vpop.f32.mrf.mxu3  ;;  %v2586_v33 = vmul.f32 %v6263_v8, %v2585_v31  ;;  %v915_v27 = vmul.f32 %v5859_v58, %v5073_v43  ;;  %vm2603_vm11 = vweird.f32 %v6266_v63  ;;  %v2610_v21 = vor.u32 1.1754944e-38, %v2609_v56  ;;  %v4426_v10 = vld [vmem:[#allocation6] ss:$0 sm:$0xff] }
 0x194   :  { %v1618_v32 = vpop.f32.mrf.mxu2  ;;  %v3859_v49 = vpack.c.bf16 %v1465_v46, %v1463_v36  ;;  %4074 = vst [vmem:[#allocation15 + $0x68] sm:$0xff] %v3779_v17   ;;  %v914_v36 = vmul.f32 %v5859_v58, %v5069_v15  ;;  %v899_v15 = vmul.f32 %v5859_v58, %v506_v37  ;;  %v962_v24 = vadd.f32 %v898_v2, %v6284_v44 }
 0x195   :  { %v4267_v34 = vpop.eup %4266  ;;  %v3490_v9 = vmul.f32 -1.442695, %v1618_v32  ;;  %v2587_v50 = vadd.f32 %v6263_v8, %v2586_v33  ;;  %vm2608_vm13 = vcmp.eq.f32.partialorder %v2607_v47, 8.507059e+37  ;;  %v979_v45 = vadd.f32 %v915_v27, %v5064_v52 }
 0x196   :  { %v4269_v28 = vpop.eup %4268  ;;  %v6296_v19 = vadd.f32 1.0, %v4267_v34  ;;  %4090 = vst [vmem:[#allocation15 + $0xe8] sm:$0xff] %v3859_v49   ;;  %v978_v43 = vadd.f32 %v914_v36, %v5061_v0  ;;  %v963_v53 = vadd.f32 %v899_v15, %v6294_v29  ;;  %v573_v54 = vmul.f32 %v4426_v10, %v506_v37 }
 0x197   :  { %v2599_v51 = vmul.f32 %v4269_v28, %v6266_v63  ;;  %4270 = vpow2.f32 %v3490_v9  ;;  %v1155_v12 = vpop.f32.mrf.mxu0  ;;  %vm2604_vm8 = vweird.f32 %v4269_v28  ;;  %v2591_v61 = vsel %vm6315_vm9, %v6263_v8, %v2587_v50 }
 0x198   :  { %4272 = vrcp.f32 %v6296_v19  ;;  %1700 = vmatmul.bf16.gmra.mxu3 %v1010_v42  ;;  %1194 = vmatmul.bf16.gmra.mxu0 %v676_v6  ;;  %vm2605_vm12 = vmor %vm2603_vm11, %vm2604_vm8  ;;  %v2596_v63 = vsel %vm6319_vm10, %v2595_v38, %v2591_v61  ;;  %v735_v3 = vmul.f32 %v5834_v23, %v505_v40  ;;  %v736_v32 = vmul.f32 %v5834_v23, %v506_v37 }
 0x199   :  { %v2600_v60 = vsub.f32 1.0, %v2599_v51  ;;  %1660 = vmatmul.bf16.gmra.mxu2 %v1002_v48  ;;  %v1388_v7 = vpop.f32.mrf.mxu1  ;;  %v572_v48 = vmul.f32 %v4426_v10, %v505_v40  ;;  %v1003_v1 = vpack.c.bf16 %v963_v53, %v962_v24  ;;  %v637_v52 = vadd.f32 %v573_v54, %v6294_v29 }
 0x19a   :  { %v1011_v13 = vpack.c.bf16 %v979_v45, %v978_v43  ;;  %v799_v23 = vadd.f32 %v735_v3, %v6284_v44  ;;  %v800_v18 = vadd.f32 %v736_v32, %v6294_v29  ;;  %vm2618_vm15 = vweird.f32 %v6296_v19 }
 0x19b   :  { %v2601_v5 = vmul.f32 %v4269_v28, %v2600_v60  ;;  %v1468_v14 = vpop.f32.mrf.mxu3  ;;  %1427 = vmatmul.bf16.gmra.mxu1 %v839_v4  ;;  %v636_v34 = vadd.f32 %v572_v48, %v6284_v44  ;;  %v2622_v60 = vand.u32 2147483647, %v6296_v19  ;;  %v2624_v44 = vand.u32 2147483648, %v6296_v19 }
 0x19c   :  { %v1621_v30 = vpop.f32.mrf.mxu2 }
 0x19d   :  { %v4271_v20 = vpop.eup %4270  ;;  %v2602_v39 = vadd.f32 %v4269_v28, %v2601_v5  ;;  %v3491_v35 = vmul.f32 -1.442695, %v1621_v30  ;;  %v677_v25 = vpack.c.bf16 %v637_v52, %v636_v34  ;;  %vm2623_vm4 = vcmp.eq.f32.partialorder %v2622_v60, 8.507059e+37 }
 0x19e   :  { %v6330_v59 = vpop.eup %4272  ;;  %v6333_v57 = vadd.f32 1.0, %v4271_v20 }
 0x19f   :  { %v2606_v58 = vsel %vm2605_vm12, %v4269_v28, %v2602_v39  ;;  %v2614_v8 = vmul.f32 %v6330_v59, %v6296_v19  ;;  %4274 = vpow2.f32 %v3491_v35  ;;  %v1157_v0 = vpop.f32.mrf.mxu0  ;;  %vm2619_vm14 = vweird.f32 %v6330_v59 }
 0x1a0   :  { %v2611_v16 = vsel %vm2608_vm13, %v2610_v21, %v2606_v58  ;;  %4276 = vrcp.f32 %v6333_v57  ;;  %v3624_v42 = vpack.c.bf16 %v1157_v0, %v1155_v12  ;;  %v2639_v29 = vand.u32 2147483648, %v6333_v57  ;;  %vm6362_vm2 = vmor %vm2618_vm15, %vm2619_vm14 }
 0x1a1   :  { %v3934_v31 = vpack.c.bf16 %v2611_v16, %v2596_v63  ;;  %v2615_v26 = vsub.f32 1.0, %v2614_v8  ;;  %v1390_v46 = vpop.f32.mrf.mxu1  ;;  %v840_v12 = vpack.c.bf16 %v800_v18, %v799_v23  ;;  %v2637_v2 = vand.u32 2147483647, %v6333_v57 }
 0x1a2   :  { %4044 = vst [vmem:[#allocation13 + $0x70] sm:$0xff] %v3624_v42   ;;  %v3784_v41 = vpack.c.bf16 %v1390_v46, %v1388_v7  ;;  %vm2633_vm3 = vweird.f32 %v6333_v57  ;;  %v2640_v30 = vor.u32 1.1754944e-38, %v2639_v29 }
 0x1a3   :  { %4104 = vst [vmem:[#allocation12 + $0x60] sm:$0xff] %v3934_v31   ;;  %v1470_v17 = vpop.f32.mrf.mxu3  ;;  %v2616_v49 = vmul.f32 %v6330_v59, %v2615_v26  ;;  %vm2638_vm6 = vcmp.eq.f32.partialorder %v2637_v2, 8.507059e+37 }
 0x1a4   :  { %v1623_v62 = vpop.f32.mrf.mxu2  ;;  %v3864_v9 = vpack.c.bf16 %v1470_v17, %v1468_v14  ;;  %4075 = vst [vmem:[#allocation15 + $0x70] sm:$0xff] %v3784_v41   ;;  %v2625_v14 = vor.u32 1.1754944e-38, %v2624_v44 }
 0x1a5   :  { %v4275_v33 = vpop.eup %4274  ;;  %v3492_v28 = vmul.f32 -1.442695, %v1623_v62  ;;  %v2617_v37 = vadd.f32 %v6330_v59, %v2616_v49 }
 0x1a6   :  { %v4277_v40 = vpop.eup %4276  ;;  %v6349_v55 = vadd.f32 1.0, %v4275_v33  ;;  %4091 = vst [vmem:[#allocation15 + $0xf0] sm:$0xff] %v3864_v9  }
 0x1a7   :  { %v2629_v51 = vmul.f32 %v4277_v40, %v6333_v57  ;;  %4278 = vpow2.f32 %v3492_v28  ;;  %v1160_v50 = vpop.f32.mrf.mxu0  ;;  %vm2634_vm1 = vweird.f32 %v4277_v40  ;;  %v2621_v11 = vsel %vm6362_vm2, %v6330_v59, %v2617_v37 }
 0x1a8   :  { %4280 = vrcp.f32 %v6349_v55  ;;  %1705 = vmatmul.bf16.gmra.mxu3 %v1011_v13  ;;  %1199 = vmatmul.bf16.gmra.mxu0 %v677_v25  ;;  %vm2635_vm5 = vmor %vm2633_vm3, %vm2634_vm1  ;;  %v2626_v61 = vsel %vm2623_vm4, %v2625_v14, %v2621_v11  ;;  %v2652_v54 = vand.u32 2147483647, %v6349_v55  ;;  %v2654_v3 = vand.u32 2147483648, %v6349_v55 }
 0x1a9   :  { %v2630_v6 = vsub.f32 1.0, %v2629_v51  ;;  %1665 = vmatmul.bf16.gmra.mxu2 %v1003_v1  ;;  %v1393_v36 = vpop.f32.mrf.mxu1  ;;  %vm2648_vm7 = vweird.f32 %v6349_v55 }
 0x1aa   :  { %vm2653_vm11 = vcmp.eq.f32.partialorder %v2652_v54, 8.507059e+37 }
 0x1ab   :  { %v2631_v56 = vmul.f32 %v4277_v40, %v2630_v6  ;;  %v1473_v5 = vpop.f32.mrf.mxu3  ;;  %1432 = vmatmul.bf16.gmra.mxu1 %v840_v12 }
 0x1ac   :  { %v1626_v47 = vpop.f32.mrf.mxu2 }
 0x1ad   :  { %v4279_v7 = vpop.eup %4278  ;;  %v2632_v22 = vadd.f32 %v4277_v40, %v2631_v56  ;;  %v3493_v19 = vmul.f32 -1.442695, %v1626_v47 }
 0x1ae   :  { %v6370_v38 = vpop.eup %4280  ;;  %v2188_v15 = vadd.f32 1.0, %v4279_v7 }
 0x1af   :  { %v2636_v27 = vsel %vm2635_vm5, %v4277_v40, %v2632_v22  ;;  %v2644_v20 = vmul.f32 %v6370_v38, %v6349_v55  ;;  %4282 = vpow2.f32 %v3493_v19  ;;  %v1162_v21 = vpop.f32.mrf.mxu0  ;;  %vm2649_vm0 = vweird.f32 %v6370_v38 }
 0x1b0   :  { %v2641_v39 = vsel %vm2638_vm6, %v2640_v30, %v2636_v27  ;;  %4284 = vrcp.f32 %v2188_v15  ;;  %v3629_v57 = vpack.c.bf16 %v1162_v21, %v1160_v50  ;;  %v2669_v46 = vand.u32 2147483648, %v2188_v15  ;;  %vm6384_vm9 = vmor %vm2648_vm7, %vm2649_vm0 }
 0x1b1   :  { %v3939_v35 = vpack.c.bf16 %v2641_v39, %v2626_v61  ;;  %v2645_v59 = vsub.f32 1.0, %v2644_v20  ;;  %v1395_v24 = vpop.f32.mrf.mxu1  ;;  %v2667_v17 = vand.u32 2147483647, %v2188_v15  ;;  %vm2663_vm10 = vweird.f32 %v2188_v15 }
 0x1b2   :  { %4045 = vst [vmem:[#allocation13 + $0x78] sm:$0xff] %v3629_v57   ;;  %v3789_v8 = vpack.c.bf16 %v1395_v24, %v1393_v36  ;;  %v2655_v40 = vor.u32 1.1754944e-38, %v2654_v3  ;;  %v2670_v55 = vor.u32 1.1754944e-38, %v2669_v46 }
 0x1b3   :  { %4105 = vst [vmem:[#allocation12 + $0x68] sm:$0xff] %v3939_v35   ;;  %v1475_v43 = vpop.f32.mrf.mxu3  ;;  %v2646_v16 = vmul.f32 %v6370_v38, %v2645_v59  ;;  %vm2668_vm13 = vcmp.eq.f32.partialorder %v2667_v17, 8.507059e+37 }
 0x1b4   :  { %v1628_v58 = vpop.f32.mrf.mxu2  ;;  %v3869_v53 = vpack.c.bf16 %v1475_v43, %v1473_v5  ;;  %4076 = vst [vmem:[#allocation15 + $0x78] sm:$0xff] %v3789_v8  }
 0x1b5   :  { %v4283_v63 = vpop.eup %4282  ;;  %v3494_v31 = vmul.f32 -1.442695, %v1628_v58  ;;  %v2647_v10 = vadd.f32 %v6370_v38, %v2646_v16 }
 0x1b6   :  { %v4285_v26 = vpop.eup %4284  ;;  %v6376_v45 = vadd.f32 1.0, %v4283_v63  ;;  %4092 = vst [vmem:[#allocation15 + $0xf8] sm:$0xff] %v3869_v53  }
 0x1b7   :  { %v2659_v0 = vmul.f32 %v4285_v26, %v2188_v15  ;;  %4286 = vpow2.f32 %v3494_v31  ;;  %v1165_v42 = vpop.f32.mrf.mxu0  ;;  %vm2664_vm8 = vweird.f32 %v4285_v26  ;;  %v2651_v33 = vsel %vm6384_vm9, %v6370_v38, %v2647_v10 }
 0x1b8   :  { %4288 = vrcp.f32 %v6376_v45  ;;  %vm2665_vm12 = vmor %vm2663_vm10, %vm2664_vm8  ;;  %v2656_v25 = vsel %vm2653_vm11, %v2655_v40, %v2651_v33  ;;  %v2682_v38 = vand.u32 2147483647, %v6376_v45  ;;  %vm2678_vm15 = vweird.f32 %v6376_v45 }
 0x1b9   :  { %v2660_v48 = vsub.f32 1.0, %v2659_v0  ;;  %v1398_v62 = vpop.f32.mrf.mxu1  ;;  %v2684_v20 = vand.u32 2147483648, %v6376_v45 }
 0x1ba   :  { %vm6420_vm3 = vcmp.eq.f32.partialorder %v2682_v38, 8.507059e+37 }
 0x1bb   :  { %v2661_v32 = vmul.f32 %v4285_v26, %v2660_v48  ;;  %v1671_v34 = vpop.f32.mrf.mxu3  ;;  %v2685_v31 = vor.u32 1.1754944e-38, %v2684_v20 }
 0x1bc   :  { %v1631_v41 = vpop.f32.mrf.mxu2  ;;  %v3511_v28 = vmul.f32 -1.442695, %v1671_v34 }
 0x1bd   :  { %v4287_v52 = vpop.eup %4286  ;;  %v2662_v49 = vadd.f32 %v4285_v26, %v2661_v32  ;;  %v3495_v9 = vmul.f32 -1.442695, %v1631_v41 }
 0x1be   :  { %v6391_v13 = vpop.eup %4288  ;;  %v6394_v23 = vadd.f32 1.0, %v4287_v52 }
 0x1bf   :  { %v2666_v18 = vsel %vm2665_vm12, %v4285_v26, %v2662_v49  ;;  %v2674_v51 = vmul.f32 %v6391_v13, %v6376_v45  ;;  %4290 = vpow2.f32 %v3495_v9  ;;  %v1167_v60 = vpop.f32.mrf.mxu0  ;;  %vm2679_vm14 = vweird.f32 %v6391_v13 }
 0x1c0   :  { %v2671_v37 = vsel %vm2668_vm13, %v2670_v55, %v2666_v18  ;;  %4292 = vrcp.f32 %v6394_v23  ;;  %v3634_v44 = vpack.c.bf16 %v1167_v60, %v1165_v42  ;;  %v2699_v61 = vand.u32 2147483648, %v6394_v23  ;;  %vm6416_vm2 = vmor %vm2678_vm15, %vm2679_vm14 }
 0x1c1   :  { %v3944_v6 = vpack.c.bf16 %v2671_v37, %v2656_v25  ;;  %v2675_v50 = vsub.f32 1.0, %v2674_v51  ;;  %4294 = vpow2.f32 %v3511_v28  ;;  %v1400_v29 = vpop.f32.mrf.mxu1  ;;  %v2697_v35 = vand.u32 2147483647, %v6394_v23 }
 0x1c2   :  { %4046 = vst [vmem:[#allocation13 + $0x80] sm:$0xff] %v3634_v44   ;;  %v3794_v2 = vpack.c.bf16 %v1400_v29, %v1398_v62  ;;  %vm2693_vm4 = vweird.f32 %v6394_v23  ;;  %v2700_v26 = vor.u32 1.1754944e-38, %v2699_v61 }
 0x1c3   :  { %4106 = vst [vmem:[#allocation12 + $0x70] sm:$0xff] %v3944_v6   ;;  %v1673_v56 = vpop.f32.mrf.mxu3  ;;  %v2676_v4 = vmul.f32 %v6391_v13, %v2675_v50  ;;  %vm2698_vm6 = vcmp.eq.f32.partialorder %v2697_v35, 8.507059e+37 }
 0x1c4   :  { %v1633_v12 = vpop.f32.mrf.mxu2  ;;  %v3512_v47 = vmul.f32 -1.442695, %v1673_v56  ;;  %4077 = vst [vmem:[#allocation15 + $0x80] sm:$0xff] %v3794_v2  }
 0x1c5   :  { %v4291_v36 = vpop.eup %4290  ;;  %v3496_v5 = vmul.f32 -1.442695, %v1633_v12  ;;  %v2677_v14 = vadd.f32 %v6391_v13, %v2676_v4 }
 0x1c6   :  { %v4293_v7 = vpop.eup %4292  ;;  %v6400_v11 = vadd.f32 1.0, %v4291_v36 }
 0x1c7   :  { %v4295_v22 = vpop.eup %4294  ;;  %v2689_v19 = vmul.f32 %v4293_v7, %v6394_v23  ;;  %4296 = vpow2.f32 %v3496_v5  ;;  %v1170_v27 = vpop.f32.mrf.mxu0  ;;  %vm2694_vm1 = vweird.f32 %v4293_v7  ;;  %v2681_v8 = vsel %vm6416_vm2, %v6391_v13, %v2677_v14 }
 0x1c8   :  { %4298 = vrcp.f32 %v6400_v11  ;;  %v6407_v15 = vadd.f32 1.0, %v4295_v22  ;;  %vm2695_vm5 = vmor %vm2693_vm4, %vm2694_vm1  ;;  %v2686_v54 = vsel %vm6420_vm3, %v2685_v31, %v2681_v8  ;;  %v2714_v62 = vand.u32 2147483648, %v6400_v11 }
 0x1c9   :  { %v2690_v30 = vsub.f32 1.0, %v2689_v19  ;;  %4300 = vpow2.f32 %v3512_v47  ;;  %v1403_v59 = vpop.f32.mrf.mxu1  ;;  %v2712_v34 = vand.u32 2147483647, %v6400_v11  ;;  %vm2708_vm0 = vweird.f32 %v6400_v11 }
 0x1ca   :  { %4302 = vrcp.f32 %v6407_v15  ;;  %v2954_v33 = vand.u32 2147483648, %v6407_v15  ;;  %v2715_v18 = vor.u32 1.1754944e-38, %v2714_v62  ;;  %vm2948_vm8 = vweird.f32 %v6407_v15 }
 0x1cb   :  { %v2691_v39 = vmul.f32 %v4293_v7, %v2690_v30  ;;  %v1676_v43 = vpop.f32.mrf.mxu3  ;;  %vm6450_vm7 = vcmp.eq.f32.partialorder %v2712_v34, 8.507059e+37  ;;  %v2952_v50 = vand.u32 2147483647, %v6407_v15 }
 0x1cc   :  { %v1636_v24 = vpop.f32.mrf.mxu2  ;;  %v3513_v0 = vmul.f32 -1.442695, %v1676_v43  ;;  %v6458_v29 = vor.u32 1.1754944e-38, %v2954_v33 }
 0x1cd   :  { %v4297_v58 = vpop.eup %4296  ;;  %v2692_v63 = vadd.f32 %v4293_v7, %v2691_v39  ;;  %v3497_v16 = vmul.f32 -1.442695, %v1636_v24  ;;  %vm6471_vm11 = vcmp.eq.f32.partialorder %v2952_v50, 8.507059e+37 }
 0x1ce   :  { %v6428_v53 = vpop.eup %4298  ;;  %v6431_v45 = vadd.f32 1.0, %v4297_v58 }
 0x1cf   :  { %v4301_v10 = vpop.eup %4300  ;;  %v2696_v48 = vsel %vm2695_vm5, %v4293_v7, %v2692_v63  ;;  %v2704_v42 = vmul.f32 %v6428_v53, %v6400_v11  ;;  %4304 = vpow2.f32 %v3497_v16  ;;  %v1172_v41 = vpop.f32.mrf.mxu0  ;;  %vm2709_vm9 = vweird.f32 %v6428_v53 }
 0x1d0   :  { %v2701_v3 = vsel %vm2698_vm6, %v2700_v26, %v2696_v48  ;;  %4306 = vrcp.f32 %v6431_v45  ;;  %v6438_v46 = vpop.eup %4302  ;;  %v6441_v1 = vadd.f32 1.0, %v4301_v10  ;;  %v3639_v55 = vpack.c.bf16 %v1172_v41, %v1170_v27  ;;  %vm6479_vm13 = vmor %vm2708_vm0, %vm2709_vm9 }
 0x1d1   :  { %v3949_v32 = vpack.c.bf16 %v2701_v3, %v2686_v54  ;;  %v2705_v17 = vsub.f32 1.0, %v2704_v42  ;;  %v2944_v52 = vmul.f32 %v6438_v46, %v6407_v15  ;;  %4308 = vpow2.f32 %v3513_v0  ;;  %v1405_v49 = vpop.f32.mrf.mxu1 }
 0x1d2   :  { %4310 = vrcp.f32 %v6441_v1  ;;  %v3799_v25 = vpack.c.bf16 %v1405_v49, %v1403_v59  ;;  %4047 = vst [vmem:[#allocation13 + $0x88] sm:$0xff] %v3639_v55   ;;  %v2727_v56 = vand.u32 2147483647, %v6431_v45  ;;  %v2729_v7 = vand.u32 2147483648, %v6431_v45 }
 0x1d3   :  { %4107 = vst [vmem:[#allocation12 + $0x78] sm:$0xff] %v3949_v32   ;;  %v2706_v9 = vmul.f32 %v6428_v53, %v2705_v17  ;;  %v2945_v28 = vsub.f32 1.0, %v2944_v52  ;;  %v1678_v40 = vpop.f32.mrf.mxu3  ;;  %v2967_v22 = vand.u32 2147483647, %v6441_v1  ;;  %vm2949_vm10 = vweird.f32 %v6438_v46 }
 0x1d4   :  { %v1638_v13 = vpop.f32.mrf.mxu2  ;;  %v3514_v44 = vmul.f32 -1.442695, %v1678_v40  ;;  %4078 = vst [vmem:[#allocation15 + $0x88] sm:$0xff] %v3799_v25   ;;  %vm2723_vm12 = vweird.f32 %v6431_v45  ;;  %vm6483_vm15 = vcmp.eq.f32.partialorder %v2727_v56, 8.507059e+37  ;;  %v2969_v39 = vand.u32 2147483648, %v6441_v1  ;;  %vm6513_vm5 = vmor %vm2948_vm8, %vm2949_vm10 }
 0x1d5   :  { %v4305_v23 = vpop.eup %4304  ;;  %v3498_v51 = vmul.f32 -1.442695, %v1638_v13  ;;  %v2707_v36 = vadd.f32 %v6428_v53, %v2706_v9  ;;  %v2946_v4 = vmul.f32 %v6438_v46, %v2945_v28  ;;  %v2730_v8 = vor.u32 1.1754944e-38, %v2729_v7 }
 0x1d6   :  { %v4307_v37 = vpop.eup %4306  ;;  %v6456_v60 = vadd.f32 1.0, %v4305_v23  ;;  %vm2963_vm1 = vweird.f32 %v6441_v1  ;;  %vm6496_vm2 = vcmp.eq.f32.partialorder %v2967_v22, 8.507059e+37  ;;  %v2970_v42 = vor.u32 1.1754944e-38, %v2969_v39 }
 0x1d7   :  { %v2719_v12 = vmul.f32 %v4307_v37, %v6431_v45  ;;  %4312 = vpow2.f32 %v3498_v51  ;;  %v4309_v2 = vpop.eup %4308  ;;  %v1175_v38 = vpop.f32.mrf.mxu0  ;;  %vm2724_vm14 = vweird.f32 %v4307_v37  ;;  %v2711_v59 = vsel %vm6479_vm13, %v6428_v53, %v2707_v36 }
 0x1d8   :  { %4314 = vrcp.f32 %v6456_v60  ;;  %v4311_v5 = vpop.eup %4310  ;;  %v6468_v19 = vadd.f32 1.0, %v4309_v2  ;;  %v2947_v11 = vadd.f32 %v6438_v46, %v2946_v4  ;;  %vm2725_vm3 = vmor %vm2723_vm12, %vm2724_vm14  ;;  %v2716_v0 = vsel %vm6450_vm7, %v2715_v18, %v2711_v59 }
 0x1d9   :  { %v2720_v47 = vsub.f32 1.0, %v2719_v12  ;;  %v2959_v30 = vmul.f32 %v4311_v5, %v6441_v1  ;;  %4316 = vpow2.f32 %v3514_v44  ;;  %v6488_v35 = vpop.f32.mrf.mxu1  ;;  %vm2964_vm4 = vweird.f32 %v4311_v5 }
 0x1da   :  { %4318 = vrcp.f32 %v6468_v19  ;;  %v2951_v3 = vsel %vm6513_vm5, %v6438_v46, %v2947_v11  ;;  %vm2965_vm6 = vmor %vm2963_vm1, %vm2964_vm4  ;;  %v2742_v41 = vand.u32 2147483647, %v6456_v60  ;;  %v2744_v13 = vand.u32 2147483648, %v6456_v60 }
 0x1db   :  { %v2721_v20 = vmul.f32 %v4307_v37, %v2720_v47  ;;  %v2960_v21 = vsub.f32 1.0, %v2959_v30  ;;  %v1681_v24 = vpop.f32.mrf.mxu3  ;;  %v2956_v28 = vsel %vm6471_vm11, %v6458_v29, %v2951_v3  ;;  %vm2738_vm0 = vweird.f32 %v6456_v60 }
 0x1dc   :  { %v1641_v57 = vpop.f32.mrf.mxu2  ;;  %v3515_v34 = vmul.f32 -1.442695, %v1681_v24  ;;  %v2984_v50 = vand.u32 2147483648, %v6468_v19  ;;  %vm6544_vm7 = vcmp.eq.f32.partialorder %v2742_v41, 8.507059e+37  ;;  %v2745_v56 = vor.u32 1.1754944e-38, %v2744_v13 }
 0x1dd   :  { %v4313_v43 = vpop.eup %4312  ;;  %v2722_v58 = vadd.f32 %v4307_v37, %v2721_v20  ;;  %v2961_v53 = vmul.f32 %v4311_v5, %v2960_v21  ;;  %v3499_v26 = vmul.f32 -1.442695, %v1641_v57  ;;  %v2982_v2 = vand.u32 2147483647, %v6468_v19 }
 0x1de   :  { %v6500_v16 = vpop.eup %4314  ;;  %v6505_v31 = vadd.f32 1.0, %v4313_v43  ;;  %vm2978_vm9 = vweird.f32 %v6468_v19  ;;  %v2985_v27 = vor.u32 1.1754944e-38, %v2984_v50 }
 0x1df   :  { %v2726_v48 = vsel %vm2725_vm3, %v4307_v37, %v2722_v58  ;;  %v2734_v45 = vmul.f32 %v6500_v16, %v6456_v60  ;;  %v4317_v54 = vpop.eup %4316  ;;  %v2962_v17 = vadd.f32 %v4311_v5, %v2961_v53  ;;  %v1177_v52 = vpop.f32.mrf.mxu0  ;;  %vm2739_vm8 = vweird.f32 %v6500_v16 }
 0x1e0   :  { %v2731_v32 = vsel %vm6483_vm15, %v2730_v8, %v2726_v48  ;;  %4320 = vrcp.f32 %v6505_v31  ;;  %v6528_v33 = vpop.eup %4318  ;;  %v6530_v9 = vadd.f32 1.0, %v4317_v54  ;;  %v3644_v46 = vpack.c.bf16 %v1177_v52, %v1175_v38  ;;  %vm6573_vm13 = vmor %vm2738_vm0, %vm2739_vm8 }
 0x1e1   :  { %v3954_v15 = vpack.c.bf16 %v2731_v32, %v2716_v0  ;;  %v2735_v62 = vsub.f32 1.0, %v2734_v45  ;;  %v2966_v49 = vsel %vm2965_vm6, %v4311_v5, %v2962_v17  ;;  %4322 = vpow2.f32 %v3499_v26  ;;  %v1410_v55 = vpop.f32.mrf.mxu1 }
 0x1e2   :  { %v2971_v1 = vsel %vm6496_vm2, %v2970_v42, %v2966_v49  ;;  %v2974_v40 = vmul.f32 %v6528_v33, %v6468_v19  ;;  %4324 = vrcp.f32 %v6530_v9  ;;  %4048 = vst [vmem:[#allocation13 + $0x90] sm:$0xff] %v3644_v46   ;;  %v2757_v47 = vand.u32 2147483647, %v6505_v31 }
 0x1e3   :  { %4108 = vst [vmem:[#allocation12 + $0x80] sm:$0xff] %v3954_v15   ;;  %v3994_v23 = vpack.c.bf16 %v2971_v1, %v2956_v28  ;;  %v1683_v51 = vpop.f32.mrf.mxu3  ;;  %v2736_v25 = vmul.f32 %v6500_v16, %v2735_v62  ;;  %4326 = vpow2.f32 %v3515_v34  ;;  %v2759_v20 = vand.u32 2147483648, %v6505_v31 }
 0x1e4   :  { %v1643_v18 = vpop.f32.mrf.mxu2  ;;  %v2975_v37 = vsub.f32 1.0, %v2974_v40  ;;  %v3516_v29 = vmul.f32 -1.442695, %v1683_v51  ;;  %v3804_v61 = vpack.c.bf16 %v1410_v55, %v6488_v35  ;;  %vm6561_vm10 = vcmp.eq.f32.partialorder %v2982_v2, 8.507059e+37 }
 0x1e5   :  { %4116 = vst [vmem:[#allocation12 + $0xc0] sm:$0xff] %v3994_v23   ;;  %v3500_v44 = vmul.f32 -1.442695, %v1643_v18  ;;  %v2737_v7 = vadd.f32 %v6500_v16, %v2736_v25  ;;  %vm2753_vm11 = vweird.f32 %v6505_v31  ;;  %vm2979_vm14 = vweird.f32 %v6528_v33 }
 0x1e6   :  { %v4321_v6 = vpop.eup %4320  ;;  %v2976_v5 = vmul.f32 %v6528_v33, %v2975_v37  ;;  %vm6579_vm15 = vcmp.eq.f32.partialorder %v2757_v47, 8.507059e+37  ;;  %4079 = vst [vmem:[#allocation15 + $0x90] sm:$0xff] %v3804_v61   ;;  %v2760_v10 = vor.u32 1.1754944e-38, %v2759_v20  ;;  %v2997_v48 = vand.u32 2147483647, %v6530_v9  ;;  %vm6598_vm2 = vmor %vm2978_vm9, %vm2979_vm14 }
 0x1e7   :  { %v2749_v36 = vmul.f32 %v4321_v6, %v6505_v31  ;;  %v4323_v4 = vpop.eup %4322  ;;  %4328 = vpow2.f32 %v3500_v44  ;;  %v6556_v14 = vpop.f32.mrf.mxu0  ;;  %vm2754_vm12 = vweird.f32 %v4321_v6  ;;  %v2741_v60 = vsel %vm6573_vm13, %v6500_v16, %v2737_v7 }
 0x1e8   :  { %v6554_v38 = vadd.f32 1.0, %v4323_v4  ;;  %4330 = vpow2.f32 %v3516_v29  ;;  %v4325_v30 = vpop.eup %4324  ;;  %v2977_v35 = vadd.f32 %v6528_v33, %v2976_v5  ;;  %vm2755_vm1 = vmor %vm2753_vm11, %vm2754_vm12  ;;  %v2999_v42 = vand.u32 2147483648, %v6530_v9 }
 0x1e9   :  { %v2750_v22 = vsub.f32 1.0, %v2749_v36  ;;  %v2989_v11 = vmul.f32 %v4325_v30, %v6530_v9  ;;  %v6567_v21 = vpop.f32.mrf.mxu1  ;;  %v4327_v57 = vpop.eup %4326  ;;  %vm2994_vm3 = vweird.f32 %v4325_v30  ;;  %v2746_v31 = vsel %vm6544_vm7, %v2745_v56, %v2741_v60 }
 0x1ea   :  { %4332 = vrcp.f32 %v6554_v38  ;;  %v6587_v26 = vadd.f32 1.0, %v4327_v57  ;;  %v2981_v17 = vsel %vm6598_vm2, %v6528_v33, %v2977_v35  ;;  %vm2993_vm4 = vweird.f32 %v6530_v9 }
 0x1eb   :  { %v2751_v59 = vmul.f32 %v4321_v6, %v2750_v22  ;;  %v1686_v8 = vpop.f32.mrf.mxu3  ;;  %v2990_v53 = vsub.f32 1.0, %v2989_v11  ;;  %vm2995_vm5 = vmor %vm2993_vm4, %vm2994_vm3  ;;  %vm2998_vm6 = vcmp.eq.f32.partialorder %v2997_v48, 8.507059e+37  ;;  %v3000_v49 = vor.u32 1.1754944e-38, %v2999_v42 }
 0x1ec   :  { %v1646_v58 = vpop.f32.mrf.mxu2  ;;  %4334 = vrcp.f32 %v6587_v26  ;;  %v2774_v46 = vand.u32 2147483648, %v6554_v38  ;;  %v3517_v9 = vmul.f32 -1.442695, %v1686_v8  ;;  %v2986_v13 = vsel %vm6561_vm10, %v2985_v27, %v2981_v17 }
 0x1ed   :  { %v2752_v63 = vadd.f32 %v4321_v6, %v2751_v59  ;;  %v4329_v0 = vpop.eup %4328  ;;  %v3501_v45 = vmul.f32 -1.442695, %v1646_v58  ;;  %v2991_v32 = vmul.f32 %v4325_v30, %v2990_v53  ;;  %v3014_v44 = vand.u32 2147483648, %v6587_v26 }
 0x1ee   :  { %v4331_v54 = vpop.eup %4330  ;;  %v6611_v41 = vadd.f32 1.0, %v4329_v0  ;;  %vm2768_vm0 = vweird.f32 %v6554_v38  ;;  %v6634_v12 = vor.u32 1.1754944e-38, %v2774_v46  ;;  %v3012_v36 = vand.u32 2147483647, %v6587_v26 }
 0x1ef   :  { %v2756_v3 = vsel %vm2755_vm1, %v4321_v6, %v2752_v63  ;;  %v2992_v62 = vadd.f32 %v4325_v30, %v2991_v32  ;;  %v6613_v34 = vadd.f32 1.0, %v4331_v54  ;;  %4336 = vpow2.f32 %v3501_v45  ;;  %v1182_v1 = vpop.f32.mrf.mxu0 }
 0x1f0   :  { %v2761_v15 = vsel %vm6579_vm15, %v2760_v10, %v2756_v3  ;;  %v6615_v52 = vpop.eup %4332  ;;  %4338 = vrcp.f32 %v6611_v41  ;;  %v2772_v6 = vand.u32 2147483647, %v6554_v38  ;;  %v3649_v5 = vpack.c.bf16 %v1182_v1, %v6556_v14 }
 0x1f1   :  { %v3959_v19 = vpack.c.bf16 %v2761_v15, %v2746_v31  ;;  %v2996_v33 = vsel %vm2995_vm5, %v4325_v30, %v2992_v62  ;;  %v2764_v28 = vmul.f32 %v6615_v52, %v6554_v38  ;;  %4340 = vrcp.f32 %v6613_v34  ;;  %v6626_v37 = vpop.f32.mrf.mxu1 }
 0x1f2   :  { %v3001_v40 = vsel %vm2998_vm6, %v3000_v49, %v2996_v33  ;;  %v6623_v18 = vpop.eup %4334  ;;  %4342 = vpow2.f32 %v3517_v9  ;;  %vm3008_vm7 = vweird.f32 %v6587_v26  ;;  %v2787_v7 = vand.u32 2147483647, %v6611_v41  ;;  %4049 = vst [vmem:[#allocation13 + $0x98] sm:$0xff] %v3649_v5  }
 0x1f3   :  { %4109 = vst [vmem:[#allocation12 + $0x88] sm:$0xff] %v3959_v19   ;;  %v1688_v23 = vpop.f32.mrf.mxu3  ;;  %v3999_v51 = vpack.c.bf16 %v3001_v40, %v2986_v13  ;;  %v2765_v25 = vsub.f32 1.0, %v2764_v28  ;;  %v3004_v50 = vmul.f32 %v6623_v18, %v6587_v26  ;;  %vm6642_vm8 = vcmp.eq.f32.partialorder %v2772_v6, 8.507059e+37 }
 0x1f4   :  { %v1648_v55 = vpop.f32.mrf.mxu2  ;;  %v3518_v30 = vmul.f32 -1.442695, %v1688_v23  ;;  %v3015_v61 = vor.u32 1.1754944e-38, %v3014_v44  ;;  %vm2769_vm9 = vweird.f32 %v6615_v52  ;;  %vm2783_vm10 = vweird.f32 %v6611_v41 }
 0x1f5   :  { %4117 = vst [vmem:[#allocation12 + $0xc8] sm:$0xff] %v3999_v51   ;;  %v2766_v29 = vmul.f32 %v6615_v52, %v2765_v25  ;;  %v4337_v56 = vpop.eup %4336  ;;  %v3005_v2 = vsub.f32 1.0, %v3004_v50  ;;  %v3502_v4 = vmul.f32 -1.442695, %v1648_v55  ;;  %vm6654_vm11 = vcmp.eq.f32.partialorder %v3012_v36, 8.507059e+37  ;;  %vm6673_vm15 = vmor %vm2768_vm0, %vm2769_vm9 }
 0x1f6   :  { %v4339_v47 = vpop.eup %4338  ;;  %v6640_v22 = vadd.f32 1.0, %v4337_v56  ;;  %v2789_v35 = vand.u32 2147483648, %v6611_v41  ;;  %vm3023_vm12 = vweird.f32 %v6613_v34  ;;  %vm3009_vm13 = vweird.f32 %v6623_v18 }
 0x1f7   :  { %v3006_v20 = vmul.f32 %v6623_v18, %v3005_v2  ;;  %v2779_v39 = vmul.f32 %v4339_v47, %v6611_v41  ;;  %4344 = vpow2.f32 %v3502_v4  ;;  %v4341_v14 = vpop.eup %4340  ;;  %v2767_v59 = vadd.f32 %v6615_v52, %v2766_v29  ;;  %v6652_v11 = vpop.f32.mrf.mxu0  ;;  %vm6686_vm2 = vmor %vm3008_vm7, %vm3009_vm13 }
 0x1f8   :  { %4346 = vrcp.f32 %v6640_v22  ;;  %v3019_v43 = vmul.f32 %v4341_v14, %v6613_v34  ;;  %v4343_v60 = vpop.eup %4342  ;;  %vm6663_vm14 = vcmp.eq.f32.partialorder %v2787_v7, 8.507059e+37  ;;  %vm2784_vm1 = vweird.f32 %v4339_v47 }
 0x1f9   :  { %v2780_v24 = vsub.f32 1.0, %v2779_v39  ;;  %v3007_v63 = vadd.f32 %v6623_v18, %v3006_v20  ;;  %4348 = vpow2.f32 %v3518_v30  ;;  %v6667_v0 = vpop.f32.mrf.mxu1  ;;  %v6677_v45 = vadd.f32 1.0, %v4343_v60  ;;  %vm2785_vm4 = vmor %vm2783_vm10, %vm2784_vm1 }
 0x1fa   :  { %v3020_v42 = vsub.f32 1.0, %v3019_v43  ;;  %v2771_v54 = vsel %vm6673_vm15, %v6615_v52, %v2767_v59  ;;  %v3027_v16 = vand.u32 2147483647, %v6613_v34  ;;  %v3029_v3 = vand.u32 2147483648, %v6613_v34 }
 0x1fb   :  { %v1691_v8 = vpop.f32.mrf.mxu3  ;;  %v2781_v48 = vmul.f32 %v4339_v47, %v2780_v24  ;;  %vm3024_vm3 = vweird.f32 %v4341_v14  ;;  %4350 = vrcp.f32 %v6677_v45  ;;  %v3011_v62 = vsel %vm6686_vm2, %v6623_v18, %v3007_v63 }
 0x1fc   :  { %v1651_v58 = vpop.f32.mrf.mxu2  ;;  %v3021_v15 = vmul.f32 %v4341_v14, %v3020_v42  ;;  %v2790_v26 = vor.u32 1.1754944e-38, %v2789_v35  ;;  %v3519_v28 = vmul.f32 -1.442695, %v1691_v8  ;;  %v2776_v1 = vsel %vm6642_vm8, %v6634_v12, %v2771_v54  ;;  %vm3025_vm5 = vmor %vm3023_vm12, %vm3024_vm3 }
 0x1fd   :  { %v3503_v32 = vmul.f32 -1.442695, %v1651_v58  ;;  %v4345_v31 = vpop.eup %4344  ;;  %v2782_v17 = vadd.f32 %v4339_v47, %v2781_v48  ;;  %v3030_v41 = vor.u32 1.1754944e-38, %v3029_v3  ;;  %vm3028_vm6 = vcmp.eq.f32.partialorder %v3027_v16, 8.507059e+37 }
 0x1fe   :  { %v6691_v19 = vpop.eup %4346  ;;  %v6699_v52 = vadd.f32 1.0, %v4345_v31  ;;  %v3022_v46 = vadd.f32 %v4341_v14, %v3021_v15  ;;  %v3016_v6 = vsel %vm6654_vm11, %v3015_v61, %v3011_v62  ;;  %v2802_v44 = vand.u32 2147483647, %v6640_v22 }
 0x1ff   :  { %4352 = vpow2.f32 %v3503_v32  ;;  %v2786_v49 = vsel %vm2785_vm4, %v4339_v47, %v2782_v17  ;;  %v2794_v33 = vmul.f32 %v6691_v19, %v6640_v22  ;;  %v4349_v9 = vpop.eup %4348  ;;  %v6712_v40 = vpop.f32.mrf.mxu0  ;;  %v2804_v2 = vand.u32 2147483648, %v6640_v22 }
 0x200   :  { %v2791_v13 = vsel %vm6663_vm14, %v2790_v26, %v2786_v49  ;;  %4354 = vrcp.f32 %v6699_v52  ;;  %v3026_v23 = vsel %vm3025_vm5, %v4341_v14, %v3022_v46  ;;  %v6717_v29 = vadd.f32 1.0, %v4349_v9 }
 0x201   :  { %v3964_v55 = vpack.c.bf16 %v2791_v13, %v2776_v1  ;;  %v2795_v18 = vsub.f32 1.0, %v2794_v33  ;;  %v3031_v50 = vsel %vm3028_vm6, %v3030_v41, %v3026_v23  ;;  %v6719_v34 = vpop.f32.mrf.mxu1  ;;  %v6721_v12 = vpop.eup %4350  ;;  %4356 = vpow2.f32 %v3519_v28 }
 0x202   :  { %v4004_v56 = vpack.c.bf16 %v3031_v50, %v3016_v6  ;;  %v3034_v47 = vmul.f32 %v6721_v12, %v6677_v45  ;;  %vm2798_vm0 = vweird.f32 %v6640_v22  ;;  %4358 = vrcp.f32 %v6717_v29 }
 0x203   :  { %v1693_v25 = vpop.f32.mrf.mxu3  ;;  %4110 = vst [vmem:[#allocation12 + $0x90] sm:$0xff] %v3964_v55   ;;  %v2796_v5 = vmul.f32 %v6691_v19, %v2795_v18  ;;  %v3044_v27 = vand.u32 2147483648, %v6677_v45  ;;  %vm6732_vm7 = vcmp.eq.f32.partialorder %v2802_v44, 8.507059e+37  ;;  %v2805_v39 = vor.u32 1.1754944e-38, %v2804_v2 }
 0x204   :  { %v1653_v51 = vpop.f32.mrf.mxu2  ;;  %4118 = vst [vmem:[#allocation12 + $0xd0] sm:$0xff] %v4004_v56   ;;  %v3035_v30 = vsub.f32 1.0, %v3034_v47  ;;  %v3042_v14 = vand.u32 2147483647, %v6677_v45  ;;  %vm2799_vm8 = vweird.f32 %v6691_v19  ;;  %v2817_v24 = vand.u32 2147483647, %v6699_v52 }
 0x205   :  { %v3504_v36 = vmul.f32 -1.442695, %v1653_v51  ;;  %v4353_v4 = vpop.eup %4352  ;;  %v2797_v57 = vadd.f32 %v6691_v19, %v2796_v5  ;;  %vm3038_vm9 = vweird.f32 %v6677_v45  ;;  %v2819_v8 = vand.u32 2147483648, %v6699_v52  ;;  %vm6755_vm10 = vmor %vm2798_vm0, %vm2799_vm8 }
 0x206   :  { %v4355_v7 = vpop.eup %4354  ;;  %v6730_v20 = vadd.f32 1.0, %v4353_v4  ;;  %v3036_v43 = vmul.f32 %v6721_v12, %v3035_v30  ;;  %v3045_v53 = vor.u32 1.1754944e-38, %v3044_v27  ;;  %v3520_v48 = vmul.f32 -1.442695, %v1693_v25 }
 0x207   :  { %4360 = vpow2.f32 %v3504_v36  ;;  %v2809_v59 = vmul.f32 %v4355_v7, %v6699_v52  ;;  %v4357_v35 = vpop.eup %4356  ;;  %v3809_v42 = vpack.c.bf16 %v6626_v37, %v6567_v21  ;;  %v6749_v54 = vpop.f32.mrf.mxu0  ;;  %vm3039_vm11 = vweird.f32 %v6721_v12 }
 0x208   :  { %4362 = vrcp.f32 %v6730_v20  ;;  %v6745_v10 = vadd.f32 1.0, %v4357_v35  ;;  %v4359_v16 = vpop.eup %4358  ;;  %vm2813_vm12 = vweird.f32 %v6699_v52  ;;  %vm2814_vm13 = vweird.f32 %v4355_v7  ;;  %vm6796_vm3 = vmor %vm3038_vm9, %vm3039_vm11 }
 0x209   :  { %v2810_v58 = vsub.f32 1.0, %v2809_v59  ;;  %v6761_v31 = vpop.f32.mrf.mxu1  ;;  %v2801_v37 = vsel %vm6755_vm10, %v6691_v19, %v2797_v57  ;;  %vm6766_vm14 = vcmp.eq.f32.partialorder %v3042_v14, 8.507059e+37  ;;  %vm6770_vm15 = vcmp.eq.f32.partialorder %v2817_v24, 8.507059e+37  ;;  %4080 = vst [vmem:[#allocation15 + $0x98] sm:$0xff] %v3809_v42   ;;  %vm2815_vm1 = vmor %vm2813_vm12, %vm2814_vm13 }
 0x20a   :  { %v3049_v17 = vmul.f32 %v4359_v16, %v6717_v29  ;;  %4364 = vrcp.f32 %v6745_v10  ;;  %v3037_v15 = vadd.f32 %v6721_v12, %v3036_v43  ;;  %v2820_v26 = vor.u32 1.1754944e-38, %v2819_v8 }
 0x20b   :  { %v1696_v63 = vpop.f32.mrf.mxu3  ;;  %v2811_v32 = vmul.f32 %v4355_v7, %v2810_v58  ;;  %v3057_v49 = vand.u32 2147483647, %v6717_v29  ;;  %4366 = vpow2.f32 %v3520_v48  ;;  %v2806_v9 = vsel %vm6732_vm7, %v2805_v39, %v2801_v37 }
 0x20c   :  { %v1656_v60 = vpop.f32.mrf.mxu2  ;;  %v3050_v46 = vsub.f32 1.0, %v3049_v17  ;;  %v3059_v13 = vand.u32 2147483648, %v6717_v29  ;;  %vm3054_vm2 = vweird.f32 %v4359_v16  ;;  %vm3053_vm4 = vweird.f32 %v6717_v29 }
 0x20d   :  { %v4361_v21 = vpop.eup %4360  ;;  %v2812_v62 = vadd.f32 %v4355_v7, %v2811_v32  ;;  %v3505_v28 = vmul.f32 -1.442695, %v1656_v60  ;;  %vm6801_vm5 = vcmp.eq.f32.partialorder %v3057_v49, 8.507059e+37  ;;  %v3041_v45 = vsel %vm6796_vm3, %v6721_v12, %v3037_v15  ;;  %vm3055_vm6 = vmor %vm3053_vm4, %vm3054_vm2 }
 0x20e   :  { %v6778_v19 = vpop.eup %4362  ;;  %v6782_v33 = vadd.f32 1.0, %v4361_v21  ;;  %v3051_v23 = vmul.f32 %v4359_v16, %v3050_v46  ;;  %v3521_v2 = vmul.f32 -1.442695, %v1696_v63  ;;  %v3060_v29 = vor.u32 1.1754944e-38, %v3059_v13 }
 0x20f   :  { %v2816_v1 = vsel %vm2815_vm1, %v4355_v7, %v2812_v62  ;;  %v2824_v41 = vmul.f32 %v6778_v19, %v6730_v20  ;;  %v2832_v36 = vand.u32 2147483647, %v6730_v20  ;;  %v2834_v4 = vand.u32 2147483648, %v6730_v20  ;;  %v6816_v27 = vpop.f32.mrf.mxu0 }
 0x210   :  { %v2821_v55 = vsel %vm6770_vm15, %v2820_v26, %v2816_v1  ;;  %4368 = vrcp.f32 %v6782_v33  ;;  %v6805_v44 = vpop.eup %4364  ;;  %v3052_v56 = vadd.f32 %v4359_v16, %v3051_v23  ;;  %v3046_v61 = vsel %vm6766_vm14, %v3045_v53, %v3041_v45 }
 0x211   :  { %v3969_v18 = vpack.c.bf16 %v2821_v55, %v2806_v9  ;;  %v2825_v25 = vsub.f32 1.0, %v2824_v41  ;;  %4370 = vpow2.f32 %v3505_v28  ;;  %v3064_v5 = vmul.f32 %v6805_v44, %v6745_v10  ;;  %v4367_v47 = vpop.eup %4366  ;;  %v6824_v59 = vpop.f32.mrf.mxu1 }
 0x212   :  { %v3056_v7 = vsel %vm3055_vm6, %v4359_v16, %v3052_v56  ;;  %4372 = vpow2.f32 %v3521_v2  ;;  %v6822_v14 = vadd.f32 1.0, %v4367_v47  ;;  %v3654_v43 = vpack.c.bf16 %v6712_v40, %v6652_v11 }
 0x213   :  { %v1698_v50 = vpop.f32.mrf.mxu3  ;;  %4111 = vst [vmem:[#allocation12 + $0x98] sm:$0xff] %v3969_v18   ;;  %v2826_v30 = vmul.f32 %v6778_v19, %v2825_v25  ;;  %v3061_v39 = vsel %vm6801_vm5, %v3060_v29, %v3056_v7  ;;  %vm2828_vm0 = vweird.f32 %v6730_v20  ;;  %vm6829_vm7 = vcmp.eq.f32.partialorder %v2832_v36, 8.507059e+37 }
 0x214   :  { %v1658_v6 = vpop.f32.mrf.mxu2  ;;  %v4009_v24 = vpack.c.bf16 %v3061_v39, %v3046_v61  ;;  %v3522_v35 = vmul.f32 -1.442695, %v1698_v50  ;;  %v3065_v8 = vsub.f32 1.0, %v3064_v5  ;;  %vm2829_vm8 = vweird.f32 %v6778_v19  ;;  %4050 = vst [vmem:[#allocation13 + $0xa0] sm:$0xff] %v3654_v43  }
 0x215   :  { %v3506_v12 = vmul.f32 -1.442695, %v1658_v6  ;;  %v2827_v53 = vadd.f32 %v6778_v19, %v2826_v30  ;;  %v2835_v48 = vor.u32 1.1754944e-38, %v2834_v4  ;;  %vm3068_vm9 = vweird.f32 %v6745_v10  ;;  %vm6848_vm10 = vmor %vm2828_vm0, %vm2829_vm8 }
 0x216   :  { %v4369_v57 = vpop.eup %4368  ;;  %4119 = vst [vmem:[#allocation12 + $0xd8] sm:$0xff] %v4009_v24   ;;  %v2847_v40 = vand.u32 2147483647, %v6782_v33  ;;  %v2849_v21 = vand.u32 2147483648, %v6782_v33  ;;  %v3814_v37 = vpack.c.bf16 %v6719_v34, %v6667_v0  ;;  %v3066_v17 = vmul.f32 %v6805_v44, %v3065_v8 }
 0x217   :  { %4374 = vpow2.f32 %v3506_v12  ;;  %v2839_v60 = vmul.f32 %v4369_v57, %v6782_v33  ;;  %v4371_v63 = vpop.eup %4370  ;;  %vm2844_vm11 = vweird.f32 %v4369_v57  ;;  %v2831_v0 = vsel %vm6848_vm10, %v6778_v19, %v2827_v53  ;;  %v6860_v20 = vpop.f32.mrf.mxu0 }
 0x218   :  { %4376 = vrcp.f32 %v6822_v14  ;;  %v6839_v42 = vadd.f32 1.0, %v4371_v63  ;;  %v4373_v32 = vpop.eup %4372  ;;  %v3072_v34 = vand.u32 2147483647, %v6745_v10  ;;  %v3074_v26 = vand.u32 2147483648, %v6745_v10  ;;  %4081 = vst [vmem:[#allocation15 + $0xa0] sm:$0xff] %v3814_v37  }
 0x219   :  { %v2840_v11 = vsub.f32 1.0, %v2839_v60  ;;  %4378 = vpow2.f32 %v3522_v35  ;;  %vm2843_vm12 = vweird.f32 %v6782_v33  ;;  %v6862_v46 = vadd.f32 1.0, %v4373_v32  ;;  %v6866_v9 = vpop.f32.mrf.mxu1 }
 0x21a   :  { %4380 = vrcp.f32 %v6839_v42  ;;  %vm3069_vm13 = vweird.f32 %v6805_v44  ;;  %vm2845_vm14 = vmor %vm2843_vm12, %vm2844_vm11  ;;  %vm2848_vm15 = vcmp.eq.f32.partialorder %v2847_v40, 8.507059e+37  ;;  %v2850_v19 = vor.u32 1.1754944e-38, %v2849_v21 }
 0x21b   :  { %v1701_v3 = vpop.f32.mrf.mxu3  ;;  %v2841_v15 = vmul.f32 %v4369_v57, %v2840_v11  ;;  %v3659_v33 = vpack.c.bf16 %v6816_v27, %v6749_v54  ;;  %v3067_v13 = vadd.f32 %v6805_v44, %v3066_v17  ;;  %v2836_v52 = vsel %vm6829_vm7, %v2835_v48, %v2831_v0  ;;  %vm6891_vm2 = vmor %vm3068_vm9, %vm3069_vm13 }
 0x21c   :  { %v1661_v16 = vpop.f32.mrf.mxu2  ;;  %vm6877_vm1 = vcmp.eq.f32.partialorder %v3072_v34, 8.507059e+37  ;;  %v3523_v25 = vmul.f32 -1.442695, %v1701_v3  ;;  %v3087_v45 = vand.u32 2147483647, %v6822_v14  ;;  %v3075_v36 = vor.u32 1.1754944e-38, %v3074_v26 }
 0x21d   :  { %v3507_v38 = vmul.f32 -1.442695, %v1661_v16  ;;  %v4375_v62 = vpop.eup %4374  ;;  %v2842_v49 = vadd.f32 %v4369_v57, %v2841_v15  ;;  %4051 = vst [vmem:[#allocation13 + $0xa8] sm:$0xff] %v3659_v33   ;;  %vm3083_vm3 = vweird.f32 %v6822_v14  ;;  %v3089_v4 = vand.u32 2147483648, %v6822_v14 }
 0x21e   :  { %v6864_v28 = vadd.f32 1.0, %v4375_v62  ;;  %v4377_v1 = vpop.eup %4376  ;;  %v3071_v7 = vsel %vm6891_vm2, %v6805_v44, %v3067_v13  ;;  %v2862_v27 = vand.u32 2147483647, %v6839_v42  ;;  %vm3088_vm5 = vcmp.eq.f32.partialorder %v3087_v45, 8.507059e+37 }
 0x21f   :  { %4382 = vpow2.f32 %v3507_v38  ;;  %v2846_v41 = vsel %vm2845_vm14, %v4369_v57, %v2842_v49  ;;  %v3079_v55 = vmul.f32 %v4377_v1, %v6822_v14  ;;  %v4379_v23 = vpop.eup %4378  ;;  %vm3084_vm4 = vweird.f32 %v4377_v1  ;;  %v6907_v39 = vpop.f32.mrf.mxu0 }
 0x220   :  { %4384 = vrcp.f32 %v6862_v46  ;;  %v2851_v51 = vsel %vm2848_vm15, %v2850_v19, %v2846_v41  ;;  %v6881_v6 = vpop.eup %4380  ;;  %v6902_v10 = vadd.f32 1.0, %v4379_v23  ;;  %v2864_v35 = vand.u32 2147483648, %v6839_v42  ;;  %vm3085_vm6 = vmor %vm3083_vm3, %vm3084_vm4 }
 0x221   :  { %v3974_v54 = vpack.c.bf16 %v2851_v51, %v2836_v52  ;;  %v3080_v50 = vsub.f32 1.0, %v3079_v55  ;;  %4386 = vrcp.f32 %v6864_v28  ;;  %v2854_v5 = vmul.f32 %v6881_v6, %v6839_v42  ;;  %v6913_v44 = vpop.f32.mrf.mxu1 }
 0x222   :  { %4388 = vpow2.f32 %v3523_v25  ;;  %v3076_v43 = vsel %vm6877_vm1, %v3075_v36, %v3071_v7  ;;  %v3090_v58 = vor.u32 1.1754944e-38, %v3089_v4  ;;  %vm2858_vm0 = vweird.f32 %v6839_v42 }
 0x223   :  { %v6885_v2 = vpop.f32.mrf.mxu3  ;;  %4112 = vst [vmem:[#allocation12 + $0xa0] sm:$0xff] %v3974_v54   ;;  %v3081_v30 = vmul.f32 %v4377_v1, %v3080_v50  ;;  %v2855_v12 = vsub.f32 1.0, %v2854_v5  ;;  %4390 = vrcp.f32 %v6902_v10  ;;  %v3104_v48 = vand.u32 2147483648, %v6862_v46 }
 0x224   :  { %v1663_v56 = vpop.f32.mrf.mxu2  ;;  %vm6925_vm7 = vcmp.eq.f32.partialorder %v2862_v27, 8.507059e+37  ;;  %v3102_v16 = vand.u32 2147483647, %v6862_v46  ;;  %v2865_v21 = vor.u32 1.1754944e-38, %v2864_v35  ;;  %vm3098_vm8 = vweird.f32 %v6862_v46 }
 0x225   :  { %v4383_v47 = vpop.eup %4382  ;;  %v3082_v24 = vadd.f32 %v4377_v1, %v3081_v30  ;;  %v2856_v8 = vmul.f32 %v6881_v6, %v2855_v12  ;;  %v2877_v37 = vand.u32 2147483647, %v6864_v28  ;;  %vm2859_vm9 = vweird.f32 %v6881_v6 }
 0x226   :  { %v6905_v61 = vadd.f32 1.0, %v4383_v47  ;;  %v6909_v57 = vpop.eup %4384  ;;  %v3105_v26 = vor.u32 1.1754944e-38, %v3104_v48  ;;  %vm2873_vm10 = vweird.f32 %v6864_v28  ;;  %v2879_v49 = vand.u32 2147483648, %v6864_v28  ;;  %vm6953_vm13 = vmor %vm2858_vm0, %vm2859_vm9 }
 0x227   :  { %v3094_v60 = vmul.f32 %v6909_v57, %v6862_v46  ;;  %v4387_v63 = vpop.eup %4386  ;;  %v3086_v53 = vsel %vm3085_vm6, %v4377_v1, %v3082_v24  ;;  %v2857_v15 = vadd.f32 %v6881_v6, %v2856_v8  ;;  %vm6940_vm11 = vcmp.eq.f32.partialorder %v3102_v16, 8.507059e+37  ;;  %v6945_v55 = vpop.f32.mrf.mxu0 }
 0x228   :  { %4392 = vrcp.f32 %v6905_v61  ;;  %v3091_v11 = vsel %vm3088_vm5, %v3090_v58, %v3086_v53  ;;  %v2869_v3 = vmul.f32 %v4387_v63, %v6864_v28  ;;  %v4389_v17 = vpop.eup %4388  ;;  %vm2874_vm12 = vweird.f32 %v4387_v63 }
 0x229   :  { %v3095_v14 = vsub.f32 1.0, %v3094_v60  ;;  %v4014_v32 = vpack.c.bf16 %v3091_v11, %v3076_v43  ;;  %v4391_v34 = vpop.eup %4390  ;;  %v6938_v1 = vadd.f32 1.0, %v4389_v17  ;;  %v3508_v41 = vmul.f32 -1.442695, %v1663_v56  ;;  %v6964_v25 = vpop.f32.mrf.mxu1  ;;  %vm2875_vm1 = vmor %vm2873_vm10, %vm2874_vm12 }
 0x22a   :  { %v2870_v0 = vsub.f32 1.0, %v2869_v3  ;;  %v3109_v13 = vmul.f32 %v4391_v34, %v6902_v10  ;;  %vm3099_vm14 = vweird.f32 %v6909_v57  ;;  %vm6958_vm15 = vcmp.eq.f32.partialorder %v2877_v37, 8.507059e+37 }
 0x22b   :  { %v1706_v22 = vpop.f32.mrf.mxu3  ;;  %v3096_v62 = vmul.f32 %v6909_v57, %v3095_v14  ;;  %4120 = vst [vmem:[#allocation12 + $0xe0] sm:$0xff] %v4014_v32   ;;  %v3119_v51 = vand.u32 2147483648, %v6902_v10  ;;  %4394 = vrcp.f32 %v6938_v1  ;;  %v2861_v42 = vsel %vm6953_vm13, %v6881_v6, %v2857_v15  ;;  %vm6983_vm4 = vmor %vm3098_vm8, %vm3099_vm14 }
 0x22c   :  { %v1666_v38 = vpop.f32.mrf.mxu2  ;;  %v2871_v33 = vmul.f32 %v4387_v63, %v2870_v0  ;;  %v3110_v45 = vsub.f32 1.0, %v3109_v13  ;;  %v2880_v56 = vor.u32 1.1754944e-38, %v2879_v49  ;;  %vm3113_vm2 = vweird.f32 %v6902_v10 }
 0x22d   :  { %v3097_v54 = vadd.f32 %v6909_v57, %v3096_v62  ;;  %vm3114_vm3 = vweird.f32 %v4391_v34  ;;  %v3117_v29 = vand.u32 2147483647, %v6902_v10  ;;  %4396 = vpow2.f32 %v3508_v41 }
 0x22e   :  { %v6947_v23 = vpop.eup %4392  ;;  %v2872_v50 = vadd.f32 %v4387_v63, %v2871_v33  ;;  %v3111_v4 = vmul.f32 %v4391_v34, %v3110_v45  ;;  %v2866_v6 = vsel %vm6925_vm7, %v2865_v21, %v2861_v42  ;;  %v3120_v7 = vor.u32 1.1754944e-38, %v3119_v51  ;;  %vm3115_vm5 = vmor %vm3113_vm2, %vm3114_vm3 }
 0x22f   :  { %v2884_v5 = vmul.f32 %v6947_v23, %v6905_v61  ;;  %v3524_v30 = vmul.f32 -1.442695, %v6885_v2  ;;  %v3101_v27 = vsel %vm6983_vm4, %v6909_v57, %v3097_v54  ;;  %v3819_v46 = vpack.c.bf16 %v6824_v59, %v6761_v31  ;;  %v1202_v48 = vpop.f32.mrf.mxu0 }
 0x230   :  { %v2876_v36 = vsel %vm2875_vm1, %v4387_v63, %v2872_v50  ;;  %v3112_v35 = vadd.f32 %v4391_v34, %v3111_v4  ;;  %v3509_v58 = vmul.f32 -1.442695, %v1666_v38  ;;  %v3525_v8 = vmul.f32 -1.442695, %v1706_v22 }
 0x231   :  { %v2881_v47 = vsel %vm6958_vm15, %v2880_v56, %v2876_v36  ;;  %v6995_v43 = vpop.eup %4394  ;;  %4398 = vpow2.f32 %v3524_v30  ;;  %vm3118_vm6 = vcmp.eq.f32.partialorder %v3117_v29, 8.507059e+37  ;;  %v2885_v57 = vsub.f32 1.0, %v2884_v5  ;;  %4082 = vst [vmem:[#allocation15 + $0xa8] sm:$0xff] %v3819_v46   ;;  %v1435_v11 = vpop.f32.mrf.mxu1 }
 0x232   :  { %v3979_v24 = vpack.c.bf16 %v2881_v47, %v2866_v6  ;;  %v3116_v63 = vsel %vm3115_vm5, %v4391_v34, %v3112_v35  ;;  %v3124_v53 = vmul.f32 %v6995_v43, %v6938_v1  ;;  %v3106_v31 = vsel %vm6940_vm11, %v3105_v26, %v3101_v27 }
 0x233   :  { %v1708_v60 = vpop.f32.mrf.mxu3  ;;  %v3121_v59 = vsel %vm3118_vm6, %v3120_v7, %v3116_v63  ;;  %4400 = vpow2.f32 %v3509_v58  ;;  %v3664_v10 = vpack.c.bf16 %v6907_v39, %v6860_v20  ;;  %v4397_v40 = vpop.eup %4396  ;;  %v3824_v3 = vpack.c.bf16 %v6913_v44, %v6866_v9 }
 0x234   :  { %v1668_v12 = vpop.f32.mrf.mxu2  ;;  %4113 = vst [vmem:[#allocation12 + $0xa8] sm:$0xff] %v3979_v24   ;;  %v4019_v14 = vpack.c.bf16 %v3121_v59, %v3106_v31  ;;  %4402 = vpow2.f32 %v3525_v8  ;;  %v3526_v16 = vmul.f32 -1.442695, %v1708_v60  ;;  %v3125_v20 = vsub.f32 1.0, %v3124_v53 }
 0x235   :  { %v3510_v2 = vmul.f32 -1.442695, %v1668_v12  ;;  %v7016_v39 = vadd.f32 1.0, %v4397_v40  ;;  %4052 = vst [vmem:[#allocation13 + $0xb0] sm:$0xff] %v3664_v10   ;;  %v2886_v32 = vmul.f32 %v6947_v23, %v2885_v57  ;;  %v3669_v21 = vpack.c.bf16 %v1202_v48, %v6945_v55 }
 0x236   :  { %4121 = vst [vmem:[#allocation12 + $0xe8] sm:$0xff] %v4019_v14   ;;  %v3829_v37 = vpack.c.bf16 %v1435_v11, %v6964_v25  ;;  %v3126_v9 = vmul.f32 %v6995_v43, %v3125_v20  ;;  %vm2889_vm0 = vweird.f32 %v6947_v23  ;;  %v2892_v62 = vand.u32 2147483647, %v6905_v61 }
 0x237   :  { %4404 = vpow2.f32 %v3510_v2  ;;  %v4399_v38 = vpop.eup %4398  ;;  %4083 = vst [vmem:[#allocation15 + $0xb0] sm:$0xff] %v3824_v3   ;;  %v2887_v15 = vadd.f32 %v6947_v23, %v2886_v32  ;;  %v2894_v34 = vand.u32 2147483648, %v6905_v61  ;;  %vm2888_vm7 = vweird.f32 %v6905_v61 }
 0x238   :  { %4406 = vrcp.f32 %v7016_v39  ;;  %v7026_v22 = vadd.f32 1.0, %v4399_v38  ;;  %4053 = vst [vmem:[#allocation13 + $0xb8] sm:$0xff] %v3669_v21   ;;  %v3132_v19 = vand.u32 2147483647, %v6938_v1  ;;  %v3134_v33 = vand.u32 2147483648, %v6938_v1  ;;  %vm7049_vm8 = vmor %vm2888_vm7, %vm2889_vm0 }
 0x239   :  { %v4401_v17 = vpop.eup %4400  ;;  %4408 = vpow2.f32 %v3526_v16  ;;  %4084 = vst [vmem:[#allocation15 + $0xb8] sm:$0xff] %v3829_v37   ;;  %3336 = dma.vmem_to_hbm [thread:$0]  %s3329_s24, 4096, %s3331_s26, [#allocation14], %s4631_s1, %s4631_s1, %s4632_s22   ;;  %v3127_v52 = vadd.f32 %v6995_v43, %v3126_v9  ;;  %vm3129_vm9 = vweird.f32 %v6995_v43  ;;  %v2891_v61 = vsel %vm7049_vm8, %v6947_v23, %v2887_v15 }
 0x23a   :  { %v4403_v44 = vpop.eup %4402  ;;  %4410 = vrcp.f32 %v7026_v22  ;;  %3349 = dma.vmem_to_hbm [thread:$0]  %s3342_s28, 4096, %s3344_s30, [#allocation14], %s4631_s1, %s4631_s1, %s4632_s22   ;;  %v7040_v26 = vadd.f32 1.0, %v4401_v17  ;;  %vm2893_vm10 = vcmp.eq.f32.partialorder %v2892_v62, 8.507059e+37  ;;  %v2895_v25 = vor.u32 1.1754944e-38, %v2894_v34 }
 0x23b   :  { %v7042_v49 = vadd.f32 1.0, %v4403_v44  ;;  %vm3128_vm11 = vweird.f32 %v6938_v1  ;;  %v2907_v42 = vand.u32 2147483647, %v7016_v39  ;;  %v2909_v54 = vand.u32 2147483648, %v7016_v39 }
 0x23c   :  { %4412 = vrcp.f32 %v7040_v26  ;;  %vm7064_vm12 = vmor %vm3128_vm11, %vm3129_vm9  ;;  %vm7068_vm13 = vcmp.eq.f32.partialorder %v3132_v19, 8.507059e+37  ;;  %v3135_v56 = vor.u32 1.1754944e-38, %v3134_v33  ;;  %v2896_v36 = vsel %vm2893_vm10, %v2895_v25, %v2891_v61 }
 0x23d   :  { %v4405_v0 = vpop.eup %4404  ;;  %4414 = vrcp.f32 %v7042_v49  ;;  %v3131_v1 = vsel %vm7064_vm12, %v6995_v43, %v3127_v52  ;;  %v3147_v5 = vand.u32 2147483647, %v7026_v22  ;;  %v3149_v28 = vand.u32 2147483648, %v7026_v22 }
 0x23e   :  { %v7047_v13 = vadd.f32 1.0, %v4405_v0  ;;  %v4407_v41 = vpop.eup %4406  ;;  %vm2903_vm15 = vweird.f32 %v7016_v39  ;;  %vm7082_vm1 = vcmp.eq.f32.partialorder %v2907_v42, 8.507059e+37  ;;  %v2910_v12 = vor.u32 1.1754944e-38, %v2909_v54 }
 0x23f   :  { %v2899_v18 = vmul.f32 %v4407_v41, %v7016_v39  ;;  %v4409_v51 = vpop.eup %4408  ;;  %vm2904_vm14 = vweird.f32 %v4407_v41  ;;  %v3136_v35 = vsel %vm7068_vm13, %v3135_v56, %v3131_v1  ;;  %vm3143_vm2 = vweird.f32 %v7026_v22 }
 0x240   :  { %v4411_v50 = vpop.eup %4410  ;;  %4416 = vrcp.f32 %v7047_v13  ;;  %v7079_v47 = vadd.f32 1.0, %v4409_v51  ;;  %vm2905_vm3 = vmor %vm2903_vm15, %vm2904_vm14  ;;  %vm7092_vm5 = vcmp.eq.f32.partialorder %v3147_v5, 8.507059e+37  ;;  %v3150_v57 = vor.u32 1.1754944e-38, %v3149_v28 }
 0x241   :  { %v2900_v29 = vsub.f32 1.0, %v2899_v18  ;;  %v3139_v4 = vmul.f32 %v4411_v50, %v7026_v22  ;;  %vm3144_vm4 = vweird.f32 %v4411_v50  ;;  %vm2918_vm0 = vweird.f32 %v7040_v26 }
 0x242   :  { %v4413_v7 = vpop.eup %4412  ;;  %4418 = vrcp.f32 %v7079_v47  ;;  %vm3145_vm6 = vmor %vm3143_vm2, %vm3144_vm4  ;;  %v2922_v14 = vand.u32 2147483647, %v7040_v26  ;;  %v2924_v20 = vand.u32 2147483648, %v7040_v26  ;;  %v2937_v21 = vand.u32 2147483647, %v7047_v13 }
 0x243   :  { %v2901_v6 = vmul.f32 %v4407_v41, %v2900_v29  ;;  %v3140_v27 = vsub.f32 1.0, %v3139_v4  ;;  %v7086_v24 = vpop.eup %4414  ;;  %v2914_v43 = vmul.f32 %v4413_v7, %v7040_v26  ;;  %vm2919_vm7 = vweird.f32 %v4413_v7 }
 0x244   :  { %v3154_v2 = vmul.f32 %v7086_v24, %v7042_v49  ;;  %v2939_v37 = vand.u32 2147483648, %v7047_v13  ;;  %vm7114_vm9 = vmor %vm2918_vm0, %vm2919_vm7  ;;  %vm7118_vm10 = vcmp.eq.f32.partialorder %v2922_v14, 8.507059e+37  ;;  %vm3158_vm11 = vweird.f32 %v7042_v49 }
 0x245   :  { %v2902_v46 = vadd.f32 %v4407_v41, %v2901_v6  ;;  %v3141_v58 = vmul.f32 %v4411_v50, %v3140_v27  ;;  %v2915_v53 = vsub.f32 1.0, %v2914_v43  ;;  %vm2933_vm12 = vweird.f32 %v7047_v13 }
 0x246   :  { %v4417_v60 = vpop.eup %4416  ;;  %v3155_v10 = vsub.f32 1.0, %v3154_v2  ;;  %v2925_v26 = vor.u32 1.1754944e-38, %v2924_v20  ;;  %v3162_v19 = vand.u32 2147483647, %v7042_v49  ;;  %vm2938_vm14 = vcmp.eq.f32.partialorder %v2937_v21, 8.507059e+37 }
 0x247   :  { %v2906_v63 = vsel %vm2905_vm3, %v4407_v41, %v2902_v46  ;;  %v3142_v59 = vadd.f32 %v4411_v50, %v3141_v58  ;;  %v2929_v48 = vmul.f32 %v4417_v60, %v7047_v13  ;;  %v2916_v40 = vmul.f32 %v4413_v7, %v2915_v53 }
 0x248   :  { %v2911_v31 = vsel %vm7082_vm1, %v2910_v12, %v2906_v63  ;;  %v3156_v22 = vmul.f32 %v7086_v24, %v3155_v10  ;;  %vm2934_vm8 = vweird.f32 %v4417_v60  ;;  %v4419_v9 = vpop.eup %4418  ;;  %v2940_v33 = vor.u32 1.1754944e-38, %v2939_v37 }
 0x249   :  { %v3984_v11 = vpack.c.bf16 %v2911_v31, %v2896_v36  ;;  %v3146_v16 = vsel %vm3145_vm6, %v4411_v50, %v3142_v59  ;;  %v2930_v39 = vsub.f32 1.0, %v2929_v48  ;;  %v2917_v32 = vadd.f32 %v4413_v7, %v2916_v40  ;;  %vm2935_vm13 = vmor %vm2933_vm12, %vm2934_vm8 }
 0x24a   :  { %v3151_v3 = vsel %vm7092_vm5, %v3150_v57, %v3146_v16  ;;  %v3169_v34 = vmul.f32 %v4419_v9, %v7079_v47  ;;  %v3157_v41 = vadd.f32 %v7086_v24, %v3156_v22  ;;  %vm3159_vm15 = vweird.f32 %v7086_v24 }
 0x24b   :  { %4114 = vst [vmem:[#allocation12 + $0xb0] sm:$0xff] %v3984_v11   ;;  %v4024_v38 = vpack.c.bf16 %v3151_v3, %v3136_v35  ;;  %v2931_v17 = vmul.f32 %v4417_v60, %v2930_v39  ;;  %v2921_v62 = vsel %vm7114_vm9, %v4413_v7, %v2917_v32  ;;  %v3164_v18 = vand.u32 2147483648, %v7042_v49  ;;  %vm3160_vm2 = vmor %vm3158_vm11, %vm3159_vm15 }
 0x24c   :  { %v3170_v52 = vsub.f32 1.0, %v3169_v34  ;;  %v2926_v61 = vsel %vm7118_vm10, %v2925_v26, %v2921_v62  ;;  %v3179_v51 = vand.u32 2147483648, %v7079_v47  ;;  %vm3174_vm1 = vweird.f32 %v4419_v9 }
 0x24d   :  { %4122 = vst [vmem:[#allocation12 + $0xf0] sm:$0xff] %v4024_v38   ;;  %v2932_v0 = vadd.f32 %v4417_v60, %v2931_v17  ;;  %v3177_v54 = vand.u32 2147483647, %v7079_v47  ;;  %v3161_v50 = vsel %vm3160_vm2, %v7086_v24, %v3157_v41  ;;  %vm3173_vm3 = vweird.f32 %v7079_v47 }
 0x24e   :  { %v3171_v42 = vmul.f32 %v4419_v9, %v3170_v52  ;;  %v3165_v23 = vor.u32 1.1754944e-38, %v3164_v18  ;;  %vm3175_vm4 = vmor %vm3173_vm3, %vm3174_vm1  ;;  %v3180_v56 = vor.u32 1.1754944e-38, %v3179_v51  ;;  %vm3163_vm5 = vcmp.eq.f32.partialorder %v3162_v19, 8.507059e+37 }
 0x24f   :  { %v2936_v55 = vsel %vm2935_vm13, %v4417_v60, %v2932_v0  ;;  %vm3178_vm6 = vcmp.eq.f32.partialorder %v3177_v54, 8.507059e+37 }
 0x250   :  { %v2941_v13 = vsel %vm2938_vm14, %v2940_v33, %v2936_v55  ;;  %v3172_v45 = vadd.f32 %v4419_v9, %v3171_v42  ;;  %v3166_v49 = vsel %vm3163_vm5, %v3165_v23, %v3161_v50 }
 0x251   :  { %v3989_v25 = vpack.c.bf16 %v2941_v13, %v2926_v61 }
 0x252   :  { %v3176_v29 = vsel %vm3175_vm4, %v4419_v9, %v3172_v45 }
 0x253   :  { %4115 = vst [vmem:[#allocation12 + $0xb8] sm:$0xff] %v3989_v25   ;;  %v3181_v36 = vsel %vm3178_vm6, %v3180_v56, %v3176_v29 }
 0x254   :  { %v4029_v1 = vpack.c.bf16 %v3181_v36, %v3166_v49 }
 0x256   :  { %4123 = vst [vmem:[#allocation12 + $0xf8] sm:$0xff] %v4029_v1  }
 0x257   :  { %3323 = dma.vmem_to_hbm [thread:$0]  %s3316_s9, 4096, %s3318_s12, [#allocation5], %s4631_s1, %s4631_s1, %s4632_s22  }
 0x258   :  { %4625 = dma.done.wait [#allocation5], 4096  }
 0x259   :  { %4626 = vsyncadd [#allocation5], 4294963200 }
 0x25a   :  { %4627 = dma.done.wait [#allocation14], 8192  }
 0x25b   :  { %4628 = vsyncadd [#allocation14], 4294959104 }
 0x25c   :  { %3362 = vsyncpa [#allocation4], 1 }
 0x25d   :  { %3363 = vsyncpa [#allocation7], 1 }
 0x25e   :  { %3364 = vsyncpa [#allocation10], 1 }
 0x25f   :  { %3365 = vsyncpa [#allocation5], 1 }
 0x260   :  { %3366 = vsyncpa [#allocation14], 1 }

</bundles_post_ra>
